<compile_context>
chip_gen: v6e
topology: v6e:2x2x1
jax: 0.10.0
libtpu: 0.0.40
codegen_flags: <defaults>
</compile_context>

<pallas_src>
import functools

import numpy as np

import jax
import jax.numpy as jnp
from jax import lax
from jax.experimental import pallas as pl
from jax.experimental.pallas import tpu as pltpu


# ----------------------------------------------------------------------------
# Host-side helper (numpy, built once at init): fold
# Conv2d(2, 1, k, padding=k//2, bias=False) into a (2*H*W, H*W) matrix so the
# spatial-attention conv becomes ONE matmul inside the kernel.
#   out[i, j] = sum_{c, a, b} w[c, a, b] * x[c, i + a - P, j + b - P]  (0 if OOB)
# Rows [0:HW] correspond to the avg channel, rows [HW:2*HW] to the max channel
# (matching torch.cat([avg_out, max_out], dim=1)).
# ----------------------------------------------------------------------------
def spatial_conv_as_matmul(saw, H, W, ksize=7):
    P = ksize // 2
    w = np.asarray(saw, dtype=np.float32).reshape(2, ksize, ksize)
    HW = H * W
    M = np.zeros((2 * HW, HW), np.float32)
    for c in range(2):
        for a in range(ksize):
            for b in range(ksize):
                for i in range(H):
                    ii = i + a - P
                    if ii < 0 or ii >= H:
                        continue
                    for j in range(W):
                        jj = j + b - P
                        if jj < 0 or jj >= W:
                            continue
                        M[c * HW + ii * W + jj, i * W + j] = w[c, a, b]
    return jnp.asarray(M)


# ----------------------------------------------------------------------------
# Fused kernel: CBAM head (channel attn -> spatial attn -> GAP -> dense1+ReLU
# -> dense2 -> sigmoid) over the WHOLE support+query batch, then class
# prototypes (masked mean) and scores = -cdist(query, proto), all in VMEM.
# ----------------------------------------------------------------------------
def prototypical_kernel(x_ref,       # (N*HW, F)  stem features (already ReLU'd)
                        labels_ref,  # (Ns, 1)    int32 support labels
                        caw1_ref,    # (F, F//R)  channel-attn shared MLP
                        caw2_ref,    # (F//R, F)
                        spm_ref,     # (2*HW, HW) 7x7 conv folded to a matrix
                        d1w_ref,     # (F, H1)
                        d1b_ref,     # (1, H1)
                        d2w_ref,     # (H1, 1)
                        d2b_ref,     # (1, 1)
                        scores_ref,  # (Nq, C)    output scores
                        *, n_total, n_support, hw, num_classes):
    F = caw1_ref.shape[0]
    x3 = x_ref[...].reshape(n_total, hw, F)                      # (N, HW, F)

    # --- Channel attention ---------------------------------------------------
    avg_c = jnp.mean(x3, axis=1)                                 # (N, F)
    max_c = jnp.max(x3, axis=1)                                  # (N, F)
    stacked = jnp.concatenate([avg_c, max_c], axis=0)            # (2N, F)
    hcc = jnp.maximum(
        jnp.dot(stacked, caw1_ref[...], preferred_element_type=jnp.float32),
        0.0)
    mlp = jnp.dot(hcc, caw2_ref[...], preferred_element_type=jnp.float32)
    ch_att = jax.nn.sigmoid(mlp[:n_total] + mlp[n_total:])       # (N, F)
    x3 = x3 * ch_att[:, None, :]

    # --- Spatial attention: 7x7 conv (padding=3, no bias) as ONE K=128 matmul -
    avg_s = jnp.mean(x3, axis=2)                                 # (N, HW)
    max_s = jnp.max(x3, axis=2)                                  # (N, HW)
    am = jnp.concatenate([avg_s, max_s], axis=1)                 # (N, 2*HW)
    sp_att = jax.nn.sigmoid(
        jnp.dot(am, spm_ref[...], preferred_element_type=jnp.float32))  # (N, HW)
    x3 = x3 * sp_att[:, :, None]

    # --- Global average pool + MLP head (dropout = identity at inference) ----
    gap = jnp.mean(x3, axis=1)                                   # (N, F)
    h1 = jnp.maximum(
        jnp.dot(gap, d1w_ref[...], preferred_element_type=jnp.float32)
        + d1b_ref[...], 0.0)
    feat = jax.nn.sigmoid(
        jnp.dot(h1, d2w_ref[...], preferred_element_type=jnp.float32)
        + d2b_ref[...])                                          # (N, 1)

    # --- Prototypes (masked mean) + scores = -cdist(query, proto) ------------
    # Feature dim is 1 (dense2 output), so cdist reduces exactly to |q - p|;
    # no Gram-form cancellation and no extra MXU pushes.
    sup = feat[:n_support]                                       # (Ns, 1)
    qry = feat[n_support:]                                       # (Nq, 1)
    class_ids = lax.broadcasted_iota(jnp.int32, (n_support, num_classes), 1)
    mask_t = (labels_ref[...] == class_ids).astype(jnp.float32)  # (Ns, C)
    counts = jnp.maximum(jnp.sum(mask_t, axis=0, keepdims=True), 1.0)  # (1, C)
    proto = jnp.sum(mask_t * sup, axis=0, keepdims=True) / counts      # (1, C)
    scores_ref[...] = -jnp.abs(qry - proto)                      # (Nq, C)


# ----------------------------------------------------------------------------
# Prototypical.forward  (fully jittable; num_classes is a static argument)
# ----------------------------------------------------------------------------
def prototypical_forward(support_images, support_labels, query_images, params,
                         num_classes):
    wb, caw1, caw2, sp_mat, d1w, d1b, d2w, d2b = params
    ns = support_images.shape[0]
    nq = query_images.shape[0]
    n_total = ns + nq
    _, _, H, W = support_images.shape
    hw = H * W
    F = wb.shape[1]

    # One batch: support followed by query.
    images = jnp.concatenate([support_images, query_images], axis=0)
    # Backbone stem (stand-in for MobileNetV2 `features`): 1x1 conv + ReLU,
    # folded into the host-side NCHW->NHWC layout change so the kernel receives
    # a lane-friendly (N*HW, F) block instead of a (N*HW, 3) one.
    x_stem = jnp.maximum(
        jnp.einsum('nchw,cf->nhwf', images.astype(jnp.float32), wb), 0.0
    ).reshape(n_total * hw, F)

    # labels are assumed to be exactly {0, ..., C-1}, matching the torch code;
    # out-of-range labels simply contribute to no prototype (counts>=1 guard).
    labels_col = support_labels.astype(jnp.int32).reshape(ns, 1)

    kernel = functools.partial(prototypical_kernel, n_total=n_total,
                               n_support=ns, hw=hw, num_classes=num_classes)
    vmem = pl.BlockSpec(memory_space=pltpu.MemorySpace.VMEM)
    return pl.pallas_call(
        kernel,
        out_shape=jax.ShapeDtypeStruct((nq, num_classes), jnp.float32),
        in_specs=[vmem] * 9,
        out_specs=vmem,
    )(x_stem, labels_col, caw1, caw2, sp_mat, d1w, d1b, d2w, d2b)


def init_params(key, H=8, W=8):
    F, R, H1, CIN = 32, 4, 16, 3
    ks = jax.random.split(key, 8)
    wb = 0.3 * jax.random.normal(ks[0], (CIN, F), jnp.float32)       # stem 1x1 conv
    caw1 = 0.3 * jax.random.normal(ks[1], (F, F // R), jnp.float32)
    caw2 = 0.3 * jax.random.normal(ks[2], (F // R, F), jnp.float32)
    saw = 0.2 * jax.random.normal(ks[3], (2 * 7 * 7,), jnp.float32)  # Conv2d(2,1,7,bias=False)
    d1w = 0.3 * jax.random.normal(ks[4], (F, H1), jnp.float32)
    d1b = 0.05 * jax.random.normal(ks[5], (1, H1), jnp.float32)
    d2w = 0.3 * jax.random.normal(ks[6], (H1, 1), jnp.float32)
    d2b = 0.05 * jax.random.normal(ks[7], (1, 1), jnp.float32)
    # fold the spatial-attention conv weights into a matmul matrix once (host)
    sp_mat = spatial_conv_as_matmul(saw, H, W, ksize=7)              # (2*H*W, H*W)
    return (wb, caw1, caw2, sp_mat, d1w, d1b, d2w, d2b)


if __name__ == "__main__":
    key = jax.random.PRNGKey(0)
    kp, ks, kq = jax.random.split(key, 3)
    params = init_params(kp, H=8, W=8)

    # 3 classes, 2 shots each; 4 query images; NCHW like the torch module.
    support_images = jax.random.normal(ks, (6, 3, 8, 8), jnp.float32)
    support_labels = jnp.array([0, 0, 1, 1, 2, 2], jnp.int32)
    query_images = jax.random.normal(kq, (4, 3, 8, 8), jnp.float32)
    num_classes = 3

    forward = jax.jit(prototypical_forward, static_argnums=(4,))
    scores = forward(support_images, support_labels, query_images, params,
                     num_classes)
    scores = jax.block_until_ready(scores)
    assert scores.shape == (4, 3)
    assert bool(jnp.all(jnp.isfinite(scores)))
    assert bool(jnp.all(scores <= 0.0))   # scores are negative distances
    print("KERNEL_OK")
</pallas_src>

<mosaic_0001>
module attributes {stable_mosaic.version = 11 : i64} {
  func.func @prototypical_kernel(%arg0: memref<640x32xf32, #tpu.memory_space<vmem>>, %arg1: memref<6x1xi32, #tpu.memory_space<vmem>>, %arg2: memref<32x8xf32, #tpu.memory_space<vmem>>, %arg3: memref<8x32xf32, #tpu.memory_space<vmem>>, %arg4: memref<128x64xf32, #tpu.memory_space<vmem>>, %arg5: memref<32x16xf32, #tpu.memory_space<vmem>>, %arg6: memref<1x16xf32, #tpu.memory_space<vmem>>, %arg7: memref<16x1xf32, #tpu.memory_space<vmem>>, %arg8: memref<1x1xf32, #tpu.memory_space<vmem>>, %arg9: memref<4x3xf32, #tpu.memory_space<vmem>>) attributes {dimension_semantics = [], scalar_prefetch = 0 : i64, scratch_operands = 0 : i64, tpu.core_type = #tpu.core_type<tc>} {
    %c0 = arith.constant 0 : index
    %c0_0 = arith.constant 0 : index
    %0 = vector.load %arg0[%c0, %c0_0] : memref<640x32xf32, #tpu.memory_space<vmem>>, vector<640x32xf32>
    %1 = vector.shape_cast %0 : vector<640x32xf32> to vector<10x64x32xf32>
    %cst = arith.constant dense<0.000000e+00> : vector<10x32xf32>
    %2 = vector.multi_reduction <add>, %1, %cst [1] : vector<10x64x32xf32> to vector<10x32xf32>
    %cst_1 = arith.constant 6.400000e+01 : f32
    %3 = vector.broadcast %cst_1 : f32 to vector<10x32xf32>
    %4 = arith.divf %2, %3 : vector<10x32xf32>
    %cst_2 = arith.constant dense<0xFF800000> : vector<10x32xf32>
    %5 = vector.multi_reduction <maximumf>, %1, %cst_2 [1] : vector<10x64x32xf32> to vector<10x32xf32>
    %6 = tpu.concatenate %4, %5 in 0 : vector<10x32xf32>, vector<10x32xf32> -> vector<20x32xf32>
    %c0_3 = arith.constant 0 : index
    %c0_4 = arith.constant 0 : index
    %7 = vector.load %arg2[%c0_3, %c0_4] : memref<32x8xf32, #tpu.memory_space<vmem>>, vector<32x8xf32>
    %cst_5 = arith.constant dense<0.000000e+00> : vector<20x8xf32>
    %8 = tpu.matmul %6, %7, %cst_5 {dimension_numbers = #tpu.dot_dimension_numbers<[1], [0], [0], [1], [0, 0, 1, 1], [], []>} : vector<20x32xf32>, vector<32x8xf32>, vector<20x8xf32> -> vector<20x8xf32>
    %cst_6 = arith.constant 0.000000e+00 : f32
    %9 = vector.broadcast %cst_6 : f32 to vector<20x8xf32>
    %10 = arith.maximumf %8, %9 : vector<20x8xf32>
    %c0_7 = arith.constant 0 : index
    %c0_8 = arith.constant 0 : index
    %11 = vector.load %arg3[%c0_7, %c0_8] : memref<8x32xf32, #tpu.memory_space<vmem>>, vector<8x32xf32>
    %cst_9 = arith.constant dense<0.000000e+00> : vector<20x32xf32>
    %12 = tpu.matmul %10, %11, %cst_9 {dimension_numbers = #tpu.dot_dimension_numbers<[1], [0], [0], [1], [0, 0, 1, 1], [], []>} : vector<20x8xf32>, vector<8x32xf32>, vector<20x32xf32> -> vector<20x32xf32>
    %13 = vector.extract_strided_slice %12 {offsets = [0, 0], sizes = [10, 32], strides = [1, 1]} : vector<20x32xf32> to vector<10x32xf32>
    %14 = vector.extract_strided_slice %12 {offsets = [10, 0], sizes = [10, 32], strides = [1, 1]} : vector<20x32xf32> to vector<10x32xf32>
    %15 = arith.addf %13, %14 : vector<10x32xf32>
    %16 = arith.negf %15 : vector<10x32xf32>
    %17 = math.exp %16 : vector<10x32xf32>
    %cst_10 = arith.constant 1.000000e+00 : f32
    %18 = vector.broadcast %cst_10 : f32 to vector<10x32xf32>
    %19 = arith.addf %18, %17 : vector<10x32xf32>
    %20 = arith.divf %18, %19 : vector<10x32xf32>
    %21 = vector.shape_cast %20 : vector<10x32xf32> to vector<10x1x32xf32>
    %22 = vector.broadcast %21 : vector<10x1x32xf32> to vector<10x64x32xf32>
    %23 = arith.mulf %1, %22 : vector<10x64x32xf32>
    %cst_11 = arith.constant dense<0.000000e+00> : vector<10x64xf32>
    %24 = vector.multi_reduction <add>, %23, %cst_11 [2] : vector<10x64x32xf32> to vector<10x64xf32>
    %cst_12 = arith.constant 3.200000e+01 : f32
    %25 = vector.broadcast %cst_12 : f32 to vector<10x64xf32>
    %26 = arith.divf %24, %25 : vector<10x64xf32>
    %cst_13 = arith.constant dense<0xFF800000> : vector<10x64xf32>
    %27 = vector.multi_reduction <maximumf>, %23, %cst_13 [2] : vector<10x64x32xf32> to vector<10x64xf32>
    %28 = tpu.concatenate %26, %27 in 1 : vector<10x64xf32>, vector<10x64xf32> -> vector<10x128xf32>
    %c0_14 = arith.constant 0 : index
    %c0_15 = arith.constant 0 : index
    %29 = vector.load %arg4[%c0_14, %c0_15] : memref<128x64xf32, #tpu.memory_space<vmem>>, vector<128x64xf32>
    %cst_16 = arith.constant dense<0.000000e+00> : vector<10x64xf32>
    %30 = tpu.matmul %28, %29, %cst_16 {dimension_numbers = #tpu.dot_dimension_numbers<[1], [0], [0], [1], [0, 0, 1, 1], [], []>} : vector<10x128xf32>, vector<128x64xf32>, vector<10x64xf32> -> vector<10x64xf32>
    %31 = arith.negf %30 : vector<10x64xf32>
    %32 = math.exp %31 : vector<10x64xf32>
    %cst_17 = arith.constant 1.000000e+00 : f32
    %33 = vector.broadcast %cst_17 : f32 to vector<10x64xf32>
    %34 = arith.addf %33, %32 : vector<10x64xf32>
    %35 = arith.divf %33, %34 : vector<10x64xf32>
    %36 = vector.shape_cast %35 : vector<10x64xf32> to vector<10x64x1xf32>
    %37 = vector.broadcast %36 : vector<10x64x1xf32> to vector<10x64x32xf32>
    %38 = arith.mulf %23, %37 : vector<10x64x32xf32>
    %cst_18 = arith.constant dense<0.000000e+00> : vector<10x32xf32>
    %39 = vector.multi_reduction <add>, %38, %cst_18 [1] : vector<10x64x32xf32> to vector<10x32xf32>
    %cst_19 = arith.constant 6.400000e+01 : f32
    %40 = vector.broadcast %cst_19 : f32 to vector<10x32xf32>
    %41 = arith.divf %39, %40 : vector<10x32xf32>
    %c0_20 = arith.constant 0 : index
    %c0_21 = arith.constant 0 : index
    %42 = vector.load %arg5[%c0_20, %c0_21] : memref<32x16xf32, #tpu.memory_space<vmem>>, vector<32x16xf32>
    %cst_22 = arith.constant dense<0.000000e+00> : vector<10x16xf32>
    %43 = tpu.matmul %41, %42, %cst_22 {dimension_numbers = #tpu.dot_dimension_numbers<[1], [0], [0], [1], [0, 0, 1, 1], [], []>} : vector<10x32xf32>, vector<32x16xf32>, vector<10x16xf32> -> vector<10x16xf32>
    %c0_23 = arith.constant 0 : index
    %c0_24 = arith.constant 0 : index
    %44 = vector.load %arg6[%c0_23, %c0_24] : memref<1x16xf32, #tpu.memory_space<vmem>>, vector<1x16xf32>
    %45 = vector.broadcast %44 : vector<1x16xf32> to vector<10x16xf32>
    %46 = arith.addf %43, %45 : vector<10x16xf32>
    %cst_25 = arith.constant 0.000000e+00 : f32
    %47 = vector.broadcast %cst_25 : f32 to vector<10x16xf32>
    %48 = arith.maximumf %46, %47 : vector<10x16xf32>
    %c0_26 = arith.constant 0 : index
    %c0_27 = arith.constant 0 : index
    %49 = vector.load %arg7[%c0_26, %c0_27] : memref<16x1xf32, #tpu.memory_space<vmem>>, vector<16x1xf32>
    %cst_28 = arith.constant dense<0.000000e+00> : vector<10x1xf32>
    %50 = tpu.matmul %48, %49, %cst_28 {dimension_numbers = #tpu.dot_dimension_numbers<[1], [0], [0], [1], [0, 0, 1, 1], [], []>} : vector<10x16xf32>, vector<16x1xf32>, vector<10x1xf32> -> vector<10x1xf32>
    %c0_29 = arith.constant 0 : index
    %c0_30 = arith.constant 0 : index
    %51 = vector.load %arg8[%c0_29, %c0_30] : memref<1x1xf32, #tpu.memory_space<vmem>>, vector<1x1xf32>
    %52 = vector.broadcast %51 : vector<1x1xf32> to vector<10x1xf32>
    %53 = arith.addf %50, %52 : vector<10x1xf32>
    %54 = arith.negf %53 : vector<10x1xf32>
    %55 = math.exp %54 : vector<10x1xf32>
    %cst_31 = arith.constant 1.000000e+00 : f32
    %56 = vector.broadcast %cst_31 : f32 to vector<10x1xf32>
    %57 = arith.addf %56, %55 : vector<10x1xf32>
    %58 = arith.divf %56, %57 : vector<10x1xf32>
    %59 = vector.extract_strided_slice %58 {offsets = [0, 0], sizes = [6, 1], strides = [1, 1]} : vector<10x1xf32> to vector<6x1xf32>
    %60 = vector.extract_strided_slice %58 {offsets = [6, 0], sizes = [4, 1], strides = [1, 1]} : vector<10x1xf32> to vector<4x1xf32>
    %61 = tpu.iota {dimensions = array<i32: 1>} : vector<6x3xi32>
    %c0_32 = arith.constant 0 : index
    %c0_33 = arith.constant 0 : index
    %62 = vector.load %arg1[%c0_32, %c0_33] : memref<6x1xi32, #tpu.memory_space<vmem>>, vector<6x1xi32>
    %63 = vector.broadcast %62 : vector<6x1xi32> to vector<6x3xi32>
    %64 = arith.cmpi eq, %63, %61 : vector<6x3xi32>
    %65 = arith.extui %64 : vector<6x3xi1> to vector<6x3xi32>
    %66 = arith.sitofp %65 : vector<6x3xi32> to vector<6x3xf32>
    %cst_34 = arith.constant dense<0.000000e+00> : vector<3xf32>
    %67 = vector.multi_reduction <add>, %66, %cst_34 [0] : vector<6x3xf32> to vector<3xf32>
    %68 = vector.shape_cast %67 : vector<3xf32> to vector<1x3xf32>
    %cst_35 = arith.constant 1.000000e+00 : f32
    %69 = vector.broadcast %cst_35 : f32 to vector<1x3xf32>
    %70 = arith.maximumf %68, %69 : vector<1x3xf32>
    %71 = vector.broadcast %59 : vector<6x1xf32> to vector<6x3xf32>
    %72 = arith.mulf %66, %71 : vector<6x3xf32>
    %cst_36 = arith.constant dense<0.000000e+00> : vector<3xf32>
    %73 = vector.multi_reduction <add>, %72, %cst_36 [0] : vector<6x3xf32> to vector<3xf32>
    %74 = vector.shape_cast %73 : vector<3xf32> to vector<1x3xf32>
    %75 = arith.divf %74, %70 : vector<1x3xf32>
    %76 = vector.broadcast %60 : vector<4x1xf32> to vector<4x3xf32>
    %77 = vector.broadcast %75 : vector<1x3xf32> to vector<4x3xf32>
    %78 = arith.subf %76, %77 : vector<4x3xf32>
    %79 = math.absf %78 : vector<4x3xf32>
    %cst_37 = arith.constant 0.000000e+00 : f32
    %80 = vector.broadcast %cst_37 : f32 to vector<4x3xf32>
    %81 = arith.subf %80, %79 : vector<4x3xf32>
    %c0_38 = arith.constant 0 : index
    %c0_39 = arith.constant 0 : index
    %82 = vector.load %arg9[%c0_38, %c0_39] : memref<4x3xf32, #tpu.memory_space<vmem>>, vector<4x3xf32>
    tpu.vector_store %arg9[%c0_38, %c0_39], %81 {strides = array<i32>} : memref<4x3xf32, #tpu.memory_space<vmem>>, vector<4x3xf32>,
    return
  }
}

</mosaic_0001>

<bundles_post_ra>
// kernel: prototypical_forward.1
= control target key start
LH: loop header
LB: loop body
LE: loop exit
PB: predicated region body
PF: predicated region fallthrough
CT: control target
= control target key end

     0   :  { %s6529_s0 = inlined_call_operand.vmem [shape: f32[640,32], index: 0, kind: input, shape index: {}]   ;;  %s6530_s1 = inlined_call_operand.vmem [shape: s32[6,1], index: 1, kind: input, shape index: {}]   ;;  %s6531_s2 = inlined_call_operand.vmem [shape: f32[32,8], index: 2, kind: input, shape index: {}]   ;;  %s6532_s3 = inlined_call_operand.vmem [shape: f32[8,32], index: 3, kind: input, shape index: {}]   ;;  %s6533_s4 = inlined_call_operand.vmem [shape: f32[128,64], index: 4, kind: input, shape index: {}]   ;;  %s6534_s5 = inlined_call_operand.vmem [shape: f32[32,16], index: 5, kind: input, shape index: {}]   ;;  %s6535_s6 = inlined_call_operand.vmem [shape: f32[1,16], index: 6, kind: input, shape index: {}]   ;;  %s6536_s7 = inlined_call_operand.vmem [shape: f32[16,1], index: 7, kind: input, shape index: {}]   ;;  %s6537_s8 = inlined_call_operand.<no memory space> [shape: f32[1,1], index: 8, kind: input, shape index: {}]   ;;  %s6538_s9 = inlined_call_operand.hbm [shape: f32[4,3], index: 9, kind: output, shape index: {}]  }
   0x1   :  { %v14_v0 = vstv %s6537_s8 }
   0x2   :  { %15 = vst [vmem:[#allocation2] sm:$0x1] %v14_v0 }
   0x3   :  { %v597_v1 = vld [vmem:[%s6531_s2 + $0x18] sm:$0xff]  ;;  %v596_v2 = vld [vmem:[%s6531_s2 + $0x10] sm:$0xff]  ;;  %vm6685_vm0 = vcmask 261120   ;;  %v6539_v3 = vmov 0.0   ;;  %v595_v4 = vld [vmem:[%s6531_s2 + $0x8] sm:$0xff]  ;;  %vm3844_vm1 = vmmov 0  }
   0x4   :  { %3643 = vmatprep.subr.mxu0 %v6539_v3  ;;  %3651 = vmatprep.mubr.msk.f32.mxu0 %vm3844_vm1, %v6539_v3  ;;  %v3916_v5 = vld [vmem:[%s6529_s0] sm:$0xff]  ;;  %v3921_v6 = vld [vmem:[%s6529_s0 + $0x8] sm:$0xff]  ;;  %v3926_v7 = vld [vmem:[%s6529_s0 + $0x10] sm:$0xff] }
   0x5   :  { %3644 = vmatpush3.msra.mxu0 %v597_v1  ;;  %v3931_v8 = vld [vmem:[%s6529_s0 + $0x18] sm:$0xff]  ;;  %v3936_v9 = vld [vmem:[%s6529_s0 + $0x20] sm:$0xff]  ;;  %v116_v10 = vsel %vm6685_vm0, %v3916_v5, 0.0  ;;  %v117_v11 = vsel %vm6685_vm0, %v3921_v6, 0.0  ;;  %3660 = vmatprep.subr.mxu1 %v6539_v3  ;;  %v3950_v13 = vld [vmem:[%s6529_s0 + $0x28] sm:$0xff]  ;;  %v119_v17 = vsel %vm6685_vm0, %v3926_v7, 0.0 }
   0x6   :  { %3645 = vmatprep.subr.mxu0 %v6539_v3  ;;  %v594_v12 = vld [vmem:[%s6531_s2] sm:$0xff]  ;;  %v3955_v14 = vld [vmem:[%s6529_s0 + $0x30] sm:$0xff]  ;;  %v3960_v15 = vld [vmem:[%s6529_s0 + $0x38] sm:$0xff]  ;;  %v118_v16 = vadd.f32 %v117_v11, %v116_v10  ;;  %3662 = vmatprep.mubr.msk.f32.mxu1 %vm3844_vm1, %v6539_v3  ;;  %v121_v21 = vsel %vm6685_vm0, %v3931_v8, 0.0  ;;  %v123_v22 = vsel %vm6685_vm0, %v3936_v9, 0.0  ;;  %v125_v23 = vsel %vm6685_vm0, %v3950_v13, 0.0 }
   0x7   :  { %3646 = vmatpush3.msra.mxu0 %v596_v2  ;;  %v3969_v18 = vld [vmem:[%s6529_s0 + $0x40] sm:$0xff]  ;;  %v3974_v19 = vld [vmem:[%s6529_s0 + $0x48] sm:$0xff]  ;;  %v3979_v20 = vld [vmem:[%s6529_s0 + $0x50] sm:$0xff]  ;;  %v127_v34 = vsel %vm6685_vm0, %v3955_v14, 0.0  ;;  %v129_v35 = vsel %vm6685_vm0, %v3960_v15, 0.0 }
   0x8   :  { %3647 = vmatprep.subr.mxu0 %v6539_v3  ;;  %v3991_v24 = vld [vmem:[%s6529_s0 + $0x58] sm:$0xff]  ;;  %v3996_v25 = vld [vmem:[%s6529_s0 + $0x60] sm:$0xff]  ;;  %v4001_v26 = vld [vmem:[%s6529_s0 + $0x68] sm:$0xff]  ;;  %v120_v27 = vadd.f32 %v119_v17, %v118_v16  ;;  %v137_v28 = vsel %vm6685_vm0, %v3969_v18, 0.0  ;;  %v138_v29 = vsel %vm6685_vm0, %v3974_v19, 0.0  ;;  %v140_v30 = vsel %vm6685_vm0, %v3979_v20, 0.0 }
   0x9   :  { %3648 = vmatpush3.msra.mxu0 %v595_v4  ;;  %v4012_v31 = vld [vmem:[%s6529_s0 + $0x70] sm:$0xff]  ;;  %v4017_v32 = vld [vmem:[%s6529_s0 + $0x78] sm:$0xff]  ;;  %v4022_v33 = vld [vmem:[%s6529_s0 + $0x80] sm:$0xff]  ;;  %v139_v36 = vadd.f32 %v138_v29, %v137_v28  ;;  %v142_v37 = vsel %vm6685_vm0, %v3991_v24, 0.0  ;;  %v144_v42 = vsel %vm6685_vm0, %v3996_v25, 0.0  ;;  %v146_v43 = vsel %vm6685_vm0, %v4001_v26, 0.0 }
   0xa   :  { %3649 = vmatprep.subr.mxu0 %v6539_v3  ;;  %v4034_v38 = vld [vmem:[%s6529_s0 + $0x88] sm:$0xff]  ;;  %v4039_v39 = vld [vmem:[%s6529_s0 + $0x90] sm:$0xff]  ;;  %v4044_v40 = vld [vmem:[%s6529_s0 + $0x98] sm:$0xff]  ;;  %v122_v41 = vadd.f32 %v121_v21, %v120_v27  ;;  %v158_v44 = vsel %vm6685_vm0, %v4022_v33, 0.0  ;;  %v148_v49 = vsel %vm6685_vm0, %v4012_v31, 0.0  ;;  %v150_v56 = vsel %vm6685_vm0, %v4017_v32, 0.0 }
   0xb   :  { %3650 = vmatpush3.msra.mxu0 %v594_v12  ;;  %v4055_v45 = vld [vmem:[%s6529_s0 + $0xa0] sm:$0xff]  ;;  %v4060_v46 = vld [vmem:[%s6529_s0 + $0xa8] sm:$0xff]  ;;  %v4065_v47 = vld [vmem:[%s6529_s0 + $0xb0] sm:$0xff]  ;;  %v141_v48 = vadd.f32 %v140_v30, %v139_v36  ;;  %v159_v50 = vsel %vm6685_vm0, %v4034_v38, 0.0  ;;  %v161_v51 = vsel %vm6685_vm0, %v4039_v39, 0.0  ;;  %v163_v58 = vsel %vm6685_vm0, %v4044_v40, 0.0 }
   0xc   :  { %v4076_v52 = vld [vmem:[%s6529_s0 + $0xb8] sm:$0xff]  ;;  %v4081_v53 = vld [vmem:[%s6529_s0 + $0xc0] sm:$0xff]  ;;  %v4086_v54 = vld [vmem:[%s6529_s0 + $0xc8] sm:$0xff]  ;;  %v124_v55 = vadd.f32 %v123_v22, %v122_v41  ;;  %v160_v57 = vadd.f32 %v159_v50, %v158_v44  ;;  %v165_v63 = vsel %vm6685_vm0, %v4055_v45, 0.0  ;;  %v167_v0 = vsel %vm6685_vm0, %v4060_v46, 0.0 }
   0xd   :  { %v4095_v59 = vld [vmem:[%s6529_s0 + $0xd0] sm:$0xff]  ;;  %v4100_v60 = vld [vmem:[%s6529_s0 + $0xd8] sm:$0xff]  ;;  %v4105_v61 = vld [vmem:[%s6529_s0 + $0xe0] sm:$0xff]  ;;  %v143_v62 = vadd.f32 %v142_v37, %v141_v48  ;;  %v179_v1 = vsel %vm6685_vm0, %v4081_v53, 0.0  ;;  %v180_v11 = vsel %vm6685_vm0, %v4086_v54, 0.0  ;;  %v171_v27 = vsel %vm6685_vm0, %v4076_v52, 0.0 }
   0xe   :  { %v4116_v2 = vld [vmem:[%s6529_s0 + $0xe8] sm:$0xff]  ;;  %v126_v4 = vadd.f32 %v125_v23, %v124_v55  ;;  %v162_v10 = vadd.f32 %v161_v51, %v160_v57  ;;  %v182_v12 = vsel %vm6685_vm0, %v4095_v59, 0.0  ;;  %v4125_v16 = vld [vmem:[%s6529_s0 + $0x100] sm:$0xff]  ;;  %v4135_v21 = vld [vmem:[%s6529_s0 + $0x110] sm:$0xff]  ;;  %v169_v23 = vsel %vm6685_vm0, %v4065_v47, 0.0 }
   0xf   :  { %v4130_v17 = vld [vmem:[%s6529_s0 + $0x108] sm:$0xff]  ;;  %6688 = vst [vmem:[#allocation6_spill] sm:$0xff] %v4135_v21  ;;  %v145_v22 = vadd.f32 %v144_v42, %v143_v62  ;;  %v181_v28 = vadd.f32 %v180_v11, %v179_v1  ;;  %v4144_v29 = vld [vmem:[%s6529_s0 + $0xf0] sm:$0xff]  ;;  %v184_v37 = vsel %vm6685_vm0, %v4100_v60, 0.0  ;;  %v186_v41 = vsel %vm6685_vm0, %v4105_v61, 0.0  ;;  %v4153_v42 = vld [vmem:[%s6529_s0 + $0xf8] sm:$0xff] }
  0x10   :  { %v128_v30 = vadd.f32 %v127_v34, %v126_v4  ;;  %v164_v36 = vadd.f32 %v163_v58, %v162_v10  ;;  %6689 = vst [vmem:[#allocation7_spill] sm:$0xff] %v4153_v42  ;;  %v4158_v44 = vld [vmem:[%s6529_s0 + $0x118] sm:$0xff]  ;;  %v188_v34 = vsel %vm6685_vm0, %v4116_v2, 0.0  ;;  %v200_v51 = vsel %vm6685_vm0, %v4125_v16, 0.0  ;;  %v4167_v55 = vld [vmem:[%s6529_s0 + $0x120] sm:$0xff]  ;;  %v4176_v1 = vld [vmem:[%s6529_s0 + $0x128] sm:$0xff] }
  0x11   :  { %6690 = vst [vmem:[#allocation8_spill] sm:$0xff] %v4158_v44  ;;  %v147_v48 = vadd.f32 %v146_v43, %v145_v22  ;;  %v183_v50 = vadd.f32 %v182_v12, %v181_v28  ;;  %6691 = vst [vmem:[#allocation9_spill] sm:$0xff] %v4167_v55  ;;  %v201_v62 = vsel %vm6685_vm0, %v4130_v17, 0.0  ;;  %v203_v43 = vsel %vm6685_vm0, %v4135_v21, 0.0  ;;  %v4181_v4 = vld [vmem:[%s6529_s0 + $0x140] sm:$0xff]  ;;  %v4188_v12 = vld [vmem:[%s6529_s0 + $0x148] sm:$0xff] }
  0x12   :  { %v130_v57 = vadd.f32 %v129_v35, %v128_v30  ;;  %v166_v58 = vadd.f32 %v165_v63, %v164_v36  ;;  %6692 = vst [vmem:[#allocation10_spill] sm:$0xff] %v4176_v1  ;;  %6693 = vst [vmem:[#allocation11_spill] sm:$0xff] %v4181_v4  ;;  %v190_v35 = vsel %vm6685_vm0, %v4144_v29, 0.0  ;;  %v202_v63 = vadd.f32 %v201_v62, %v200_v51 }
  0x13   :  { %v149_v10 = vadd.f32 %v148_v49, %v147_v48  ;;  %v185_v11 = vadd.f32 %v184_v37, %v183_v50  ;;  %6694 = vst [vmem:[#allocation12_spill] sm:$0xff] %v4188_v12  ;;  %v192_v30 = vsel %vm6685_vm0, %v4153_v42, 0.0  ;;  %v205_v36 = vsel %vm6685_vm0, %v4158_v44, 0.0  ;;  %v4197_v49 = vld [vmem:[%s6529_s0 + $0x150] sm:$0xff] }
  0x14   :  { %v131_v22 = vrot.slane %v130_v57, 4  ;;  %v168_v28 = vadd.f32 %v167_v0, %v166_v58  ;;  %6695 = vst [vmem:[#allocation13_spill] sm:$0xff] %v4197_v49  ;;  %v204_v50 = vadd.f32 %v203_v43, %v202_v63  ;;  %v207_v51 = vsel %vm6685_vm0, %v4167_v55, 0.0  ;;  %v4204_v0 = vld [vmem:[%s6529_s0 + $0x158] sm:$0xff] }
  0x15   :  { %v151_v37 = vadd.f32 %v150_v56, %v149_v10  ;;  %v187_v48 = vadd.f32 %v186_v41, %v185_v11  ;;  %6696 = vst [vmem:[#allocation14_spill] sm:$0xff] %v4204_v0  ;;  %v209_v3 = vsel %vm6685_vm0, %v4176_v1, 0.0  ;;  %v221_v42 = vsel %vm6685_vm0, %v4181_v4, 0.0  ;;  %v4213_v56 = vld [vmem:[%s6529_s0 + $0x130] sm:$0xff]  ;;  %v4227_v4 = vld [vmem:[%s6529_s0 + $0x138] sm:$0xff] }
  0x16   :  { %v132_v58 = vadd.f32 %v131_v22, %v130_v57  ;;  %v170_v62 = vadd.f32 %v169_v23, %v168_v28  ;;  %6697 = vst [vmem:[#allocation15_spill] sm:$0xff] %v4213_v56  ;;  %v206_v10 = vadd.f32 %v205_v36, %v204_v50  ;;  %v222_v11 = vsel %vm6685_vm0, %v4188_v12, 0.0  ;;  %v4220_v23 = vld [vmem:[%s6529_s0 + $0x160] sm:$0xff]  ;;  %6699 = vst [vmem:[#allocation17_spill] sm:$0xff] %v4227_v4  ;;  %v4241_v12 = vld [vmem:[%s6529_s0 + $0x170] sm:$0xff] }
  0x17   :  { %v152_v41 = vrot.slane %v151_v37, 4  ;;  %v189_v43 = vadd.f32 %v188_v34, %v187_v48  ;;  %6698 = vst [vmem:[#allocation16_spill] sm:$0xff] %v4220_v23  ;;  %v223_v22 = vadd.f32 %v222_v11, %v221_v42  ;;  %v224_v28 = vsel %vm6685_vm0, %v4197_v49, 0.0  ;;  %v4232_v34 = vld [vmem:[%s6529_s0 + $0x168] sm:$0xff]  ;;  %6701 = vst [vmem:[#allocation19_spill] sm:$0xff] %v4241_v12 }
  0x18   :  { %v133_v57 = vrot.slane %v132_v58, 2  ;;  %v172_v63 = vadd.f32 %v171_v27, %v170_v62  ;;  %6700 = vst [vmem:[#allocation18_spill] sm:$0xff] %v4232_v34  ;;  %v208_v50 = vadd.f32 %v207_v51, %v206_v10  ;;  %v226_v27 = vsel %vm6685_vm0, %v4204_v0, 0.0 }
  0x19   :  { %v153_v36 = vadd.f32 %v152_v41, %v151_v37  ;;  %v191_v48 = vadd.f32 %v190_v35, %v189_v43  ;;  %v211_v11 = vsel %vm6685_vm0, %v4213_v56, 0.0  ;;  %v225_v49 = vadd.f32 %v224_v28, %v223_v22  ;;  %v4246_v37 = vld [vmem:[%s6529_s0 + $0x180] sm:$0xff]  ;;  %v4253_v43 = vld [vmem:[%s6529_s0 + $0x188] sm:$0xff] }
  0x1a   :  { %v134_v42 = vadd.f32 %v133_v57, %v132_v58  ;;  %v173_v62 = vrot.slane %v172_v63, 4  ;;  %6702 = vst [vmem:[#allocation20_spill] sm:$0xff] %v4246_v37  ;;  %v210_v41 = vadd.f32 %v209_v3, %v208_v50  ;;  %v228_v58 = vsel %vm6685_vm0, %v4220_v23, 0.0  ;;  %6703 = vst [vmem:[#allocation21_spill] sm:$0xff] %v4253_v43  ;;  %v4262_v3 = vld [vmem:[%s6529_s0 + $0x190] sm:$0xff] }
  0x1b   :  { %v154_v35 = vrot.slane %v153_v36, 2  ;;  %v193_v51 = vadd.f32 %v192_v30, %v191_v48  ;;  %v213_v57 = vsel %vm6685_vm0, %v4227_v4, 0.0  ;;  %v227_v22 = vadd.f32 %v226_v27, %v225_v49  ;;  %6704 = vst [vmem:[#allocation22_spill] sm:$0xff] %v4262_v3  ;;  %v4272_v49 = vld [vmem:[%s6529_s0 + $0x198] sm:$0xff] }
  0x1c   :  { %v174_v10 = vadd.f32 %v173_v62, %v172_v63  ;;  %v230_v28 = vsel %vm6685_vm0, %v4232_v34, 0.0  ;;  %v135_v30 = vrot.slane %v134_v42, 1  ;;  %v212_v23 = vadd.f32 %v211_v11, %v210_v41  ;;  %v4267_v63 = vld [vmem:[%s6529_s0 + $0x178] sm:$0xff]  ;;  %6706 = vst [vmem:[#allocation24_spill] sm:$0xff] %v4272_v49 }
  0x1d   :  { %v155_v48 = vadd.f32 %v154_v35, %v153_v36  ;;  %v194_v50 = vrot.slane %v193_v51, 4  ;;  %6705 = vst [vmem:[#allocation23_spill] sm:$0xff] %v4267_v63  ;;  %v229_v62 = vadd.f32 %v228_v58, %v227_v22  ;;  %v232_v34 = vsel %vm6685_vm0, %v4241_v12, 0.0 }
  0x1e   :  { %v175_v27 = vrot.slane %v174_v10, 2  ;;  %v242_v36 = vsel %vm6685_vm0, %v4246_v37, 0.0  ;;  %v214_v41 = vadd.f32 %v213_v57, %v212_v23  ;;  %v243_v4 = vsel %vm6685_vm0, %v4253_v43, 0.0 }
  0x1f   :  { %v156_v35 = vrot.slane %v155_v48, 1  ;;  %v195_v11 = vadd.f32 %v194_v50, %v193_v51 }
  0x20   :  { %16 = vsyncpa [#allocation4], 0  ;;  %v4283_v56 = vld [vmem:[%s6529_s0 + $0x1a0] sm:$0xff]  ;;  %v176_v0 = vadd.f32 %v175_v27, %v174_v10  ;;  %v231_v58 = vadd.f32 %v230_v28, %v229_v62  ;;  %v244_v22 = vadd.f32 %v243_v4, %v242_v36  ;;  %v245_v12 = vsel %vm6685_vm0, %v4262_v3, 0.0  ;;  %v4290_v51 = vld [vmem:[%s6529_s0 + $0x1a8] sm:$0xff] }
  0x21   :  { %6707 = vst [vmem:[#allocation25_spill] sm:$0xff] %v4283_v56  ;;  %6708 = vst [vmem:[#allocation26_spill] sm:$0xff] %v4290_v51  ;;  %v4295_v23 = vld [vmem:[%s6529_s0 + $0x1b0] sm:$0xff]  ;;  %v196_v57 = vrot.slane %v195_v11, 2  ;;  %v215_v50 = vrot.slane %v214_v41, 4  ;;  %v234_v10 = vsel %vm6685_vm0, %v4267_v63, 0.0  ;;  %v136_v62 = vadd.f32 %v135_v30, %v134_v42 }
  0x22   :  { %6709 = vst [vmem:[#allocation27_spill] sm:$0xff] %v4295_v23  ;;  %v247_v4 = vsel %vm6685_vm0, %v4272_v49, 0.0  ;;  %vm557_vm2 = vcmask 1041409   ;;  %v4304_v28 = vld [vmem:[%s6529_s0 + $0x1c0] sm:$0xff]  ;;  %v4309_v27 = vld [vmem:[%s6529_s0 + $0x1c8] sm:$0xff]  ;;  %v157_v36 = vadd.f32 %v156_v35, %v155_v48  ;;  %v233_v3 = vadd.f32 %v232_v34, %v231_v58  ;;  %v4314_v49 = vld [vmem:[%s6529_s0 + $0x1d0] sm:$0xff] }
  0x23   :  { %6710 = vst [vmem:[#allocation28_spill] sm:$0xff] %v4304_v28  ;;  %6711 = vst [vmem:[#allocation29_spill] sm:$0xff] %v4309_v27  ;;  %v246_v43 = vadd.f32 %v245_v12, %v244_v22  ;;  %vm6630_vm3 = vcmask 1042434   ;;  %v177_v63 = vrot.slane %v176_v0, 1  ;;  %v197_v37 = vadd.f32 %v196_v57, %v195_v11  ;;  %v4321_v44 = vld [vmem:[%s6529_s0 + $0x1d8] sm:$0xff] }
  0x24   :  { %v216_v1 = vadd.f32 %v215_v50, %v214_v41  ;;  %v249_v55 = vsel %vm6685_vm0, %v4283_v56, 0.0  ;;  %v235_v42 = vadd.f32 %v234_v10, %v233_v3  ;;  %v251_v12 = vsel %vm6685_vm0, %v4290_v51, 0.0  ;;  %v4334_v58 = vld [vmem:[%s6529_s0 + $0x1b8] sm:$0xff] }
  0x25   :  { %v248_v34 = vadd.f32 %v247_v4, %v246_v43  ;;  %v253_v30 = vsel %vm6685_vm0, %v4295_v23, 0.0  ;;  %v198_v48 = vrot.slane %v197_v37, 1  ;;  %v263_v11 = vsel %vm6685_vm0, %v4304_v28, 0.0  ;;  %v4339_v43 = vld [vmem:[%s6529_s0 + $0x1e0] sm:$0xff]  ;;  %v4348_v28 = vld [vmem:[%s6529_s0 + $0x1e8] sm:$0xff] }
  0x26   :  { %v217_v35 = vrot.slane %v216_v1, 2  ;;  %v264_v41 = vsel %vm6685_vm0, %v4309_v27, 0.0  ;;  %6712 = vst [vmem:[#allocation30_spill] sm:$0xff] %v4339_v43  ;;  %v236_v3 = vrot.slane %v235_v42, 4  ;;  %v266_v50 = vsel %vm6685_vm0, %v4314_v49, 0.0 }
  0x27   :  { %v250_v22 = vadd.f32 %v249_v55, %v248_v34  ;;  %v265_v57 = vadd.f32 %v264_v41, %v263_v11  ;;  %v178_v10 = vadd.f32 %v177_v63, %v176_v0  ;;  %v199_v4 = vadd.f32 %v198_v48, %v197_v37  ;;  %v4357_v37 = vld [vmem:[%s6529_s0 + $0x1f0] sm:$0xff] }
  0x28   :  { %v218_v23 = vadd.f32 %v217_v35, %v216_v1  ;;  %v268_v27 = vsel %vm6685_vm0, %v4321_v44, 0.0  ;;  %v237_v51 = vadd.f32 %v236_v3, %v235_v42  ;;  %vm6621_vm4 = vcmask 1043459   ;;  %6713 = vst [vmem:[#allocation31_spill] sm:$0xff] %v4357_v37 }
  0x29   :  { %v252_v56 = vadd.f32 %v251_v12, %v250_v22  ;;  %v267_v21 = vadd.f32 %v266_v50, %v265_v57  ;;  %v255_v34 = vsel %vm6685_vm0, %v4334_v58, 0.0  ;;  %v270_v0 = vsel %vm6685_vm0, %v4339_v43, 0.0  ;;  %v4362_v12 = vld [vmem:[%s6529_s0 + $0x1f8] sm:$0xff] }
  0x2a   :  { %v219_v55 = vrot.slane %v218_v23, 1  ;;  %v327_v1 = vmul.f32 0.015625, %v136_v62  ;;  %v238_v63 = vrot.slane %v237_v51, 2  ;;  %v328_v42 = vmul.f32 0.015625, %v157_v36  ;;  %6714 = vst [vmem:[#allocation32_spill] sm:$0xff] %v4362_v12 }
  0x2b   :  { %v254_v48 = vadd.f32 %v253_v30, %v252_v56  ;;  %v269_v35 = vadd.f32 %v268_v27, %v267_v21  ;;  %v272_v41 = vsel %vm6685_vm0, %v4348_v28, 0.0  ;;  %v329_v3 = vmul.f32 0.015625, %v178_v10  ;;  %v4370_v21 = vld [vmem:[%s6529_s0 + $0x200] sm:$0xff]  ;;  %v4375_v56 = vld [vmem:[%s6529_s0 + $0x208] sm:$0xff] }
  0x2c   :  { %v220_v11 = vadd.f32 %v219_v55, %v218_v23  ;;  %v330_v62 = vmul.f32 0.015625, %v199_v4  ;;  %v239_v22 = vadd.f32 %v238_v63, %v237_v51  ;;  %v558_v43 = vsel %vm557_vm2, %v328_v42, %v327_v1  ;;  %6715 = vst [vmem:[#allocation33_spill] sm:$0xff] %v4375_v56  ;;  %v4380_v23 = vld [vmem:[%s6529_s0 + $0x210] sm:$0xff]  ;;  %v4396_v1 = vld [vmem:[%s6529_s0 + $0x220] sm:$0xff] }
  0x2d   :  { %v256_v57 = vadd.f32 %v255_v34, %v254_v48  ;;  %v271_v50 = vadd.f32 %v270_v0, %v269_v35  ;;  %6716 = vst [vmem:[#allocation34_spill] sm:$0xff] %v4380_v23  ;;  %v274_v51 = vsel %vm6685_vm0, %v4357_v37, 0.0  ;;  %v560_v36 = vsel %vm6630_vm3, %v329_v3, %v558_v43  ;;  %v4389_v34 = vld [vmem:[%s6529_s0 + $0x218] sm:$0xff]  ;;  %6718 = vst [vmem:[#allocation36_spill] sm:$0xff] %v4396_v1  ;;  %v4412_v3 = vld [vmem:[%s6529_s0 + $0x240] sm:$0xff] }
  0x2e   :  { %v331_v27 = vmul.f32 0.015625, %v220_v11  ;;  %vm6617_vm5 = vcmask 1044484   ;;  %v240_v30 = vrot.slane %v239_v22, 1  ;;  %v562_v55 = vsel %vm6621_vm4, %v330_v62, %v560_v36  ;;  %6717 = vst [vmem:[#allocation35_spill] sm:$0xff] %v4389_v34  ;;  %6720 = vst [vmem:[#allocation38_spill] sm:$0xff] %v4412_v3  ;;  %v4417_v62 = vld [vmem:[%s6529_s0 + $0x248] sm:$0xff] }
  0x2f   :  { %v257_v10 = vrot.slane %v256_v57, 4  ;;  %v273_v4 = vadd.f32 %v272_v41, %v271_v50  ;;  %v276_v0 = vsel %vm6685_vm0, %v4362_v12, 0.0  ;;  %v284_v43 = vsel %vm6685_vm0, %v4370_v21, 0.0  ;;  %v4407_v41 = vld [vmem:[%s6529_s0 + $0x228] sm:$0xff]  ;;  %6721 = vst [vmem:[#allocation39_spill] sm:$0xff] %v4417_v62 }
  0x30   :  { %v285_v63 = vsel %vm6685_vm0, %v4375_v56, 0.0  ;;  %v287_v48 = vsel %vm6685_vm0, %v4380_v23, 0.0  ;;  %v241_v35 = vadd.f32 %v240_v30, %v239_v22  ;;  %6719 = vst [vmem:[#allocation37_spill] sm:$0xff] %v4407_v41  ;;  %v564_v22 = vsel %vm6617_vm5, %v331_v27, %v562_v55  ;;  %v4435_v27 = vld [vmem:[%s6529_s0 + $0x238] sm:$0xff]  ;;  %v4465_v23 = vld [vmem:[%s6529_s0 + $0x268] sm:$0xff] }
  0x31   :  { %v258_v42 = vadd.f32 %v257_v10, %v256_v57  ;;  %v275_v11 = vadd.f32 %v274_v51, %v273_v4  ;;  %v286_v50 = vadd.f32 %v285_v63, %v284_v43  ;;  %vm6613_vm6 = vcmask 1045509   ;;  %v4423_v57 = vld [vmem:[%s6529_s0 + $0x250] sm:$0xff]  ;;  %6724 = vst [vmem:[#allocation42_spill] sm:$0xff] %v4435_v27  ;;  %v4440_v43 = vld [vmem:[%s6529_s0 + $0x258] sm:$0xff] }
  0x32   :  { %6722 = vst [vmem:[#allocation40_spill] sm:$0xff] %v4423_v57  ;;  %v289_v51 = vsel %vm6685_vm0, %v4389_v34, 0.0  ;;  %v332_v10 = vmul.f32 0.015625, %v241_v35  ;;  %v4430_v4 = vld [vmem:[%s6529_s0 + $0x230] sm:$0xff]  ;;  %6725 = vst [vmem:[#allocation43_spill] sm:$0xff] %v4440_v43  ;;  %v293_v63 = vsel %vm6685_vm0, %v4407_v41, 0.0 }
  0x33   :  { %v259_v36 = vrot.slane %v258_v42, 2  ;;  %v277_v30 = vadd.f32 %v276_v0, %v275_v11  ;;  %6723 = vst [vmem:[#allocation41_spill] sm:$0xff] %v4430_v4  ;;  %v288_v55 = vadd.f32 %v287_v48, %v286_v50  ;;  %v291_v0 = vsel %vm6685_vm0, %v4396_v1, 0.0  ;;  %v4453_v48 = vld [vmem:[%s6529_s0 + $0x260] sm:$0xff] }
  0x34   :  { %v305_v35 = vsel %vm6685_vm0, %v4412_v3, 0.0  ;;  %v306_v11 = vsel %vm6685_vm0, %v4417_v62, 0.0  ;;  %vm6609_vm7 = vcmask 1046534   ;;  %6726 = vst [vmem:[#allocation44_spill] sm:$0xff] %v4453_v48  ;;  %v308_v1 = vsel %vm6685_vm0, %v4423_v57, 0.0 }
  0x35   :  { %v260_v12 = vadd.f32 %v259_v36, %v258_v42  ;;  %v278_v34 = vrot.slane %v277_v30, 4  ;;  %v290_v50 = vadd.f32 %v289_v51, %v288_v55  ;;  %v566_v41 = vsel %vm6613_vm6, %v332_v10, %v564_v22  ;;  %v4472_v22 = vld [vmem:[%s6529_s0 + $0x270] sm:$0xff] }
  0x36   :  { %v295_v3 = vsel %vm6685_vm0, %v4430_v4, 0.0  ;;  %v297_v62 = vsel %vm6685_vm0, %v4435_v27, 0.0  ;;  %v307_v42 = vadd.f32 %v306_v11, %v305_v35  ;;  %v310_v55 = vsel %vm6685_vm0, %v4440_v43, 0.0 }
  0x37   :  { %v261_v36 = vrot.slane %v260_v12, 1  ;;  %v279_v37 = vadd.f32 %v278_v34, %v277_v30  ;;  %v292_v51 = vadd.f32 %v291_v0, %v290_v50  ;;  %vm6607_vm8 = vcmask 1047559   ;;  %v4483_v50 = vld [vmem:[%s6529_s0 + $0x278] sm:$0xff] }
  0x38   :  { %v309_v10 = vadd.f32 %v308_v1, %v307_v42  ;;  %v312_v35 = vsel %vm6685_vm0, %v4453_v48, 0.0  ;;  %v337_v34 = vsel %vm6685_vm0, %v3916_v5, -inf  ;;  %v338_v30 = vsel %vm6685_vm0, %v3921_v6, -inf }
  0x39   :  { %v262_v0 = vadd.f32 %v261_v36, %v260_v12  ;;  %v280_v11 = vrot.slane %v279_v37, 2  ;;  %v294_v27 = vadd.f32 %v293_v63, %v292_v51  ;;  %v339_v43 = vmax.f32 %v337_v34, %v338_v30 }
  0x3a   :  { %v311_v4 = vadd.f32 %v310_v55, %v309_v10  ;;  %v314_v1 = vsel %vm6685_vm0, %v4465_v23, 0.0  ;;  %v340_v42 = vsel %vm6685_vm0, %v3926_v7, -inf  ;;  %v342_v5 = vsel %vm6685_vm0, %v3931_v8, -inf }
  0x3b   :  { %v281_v6 = vadd.f32 %v280_v11, %v279_v37  ;;  %v296_v12 = vadd.f32 %v295_v3, %v294_v27  ;;  %v316_v36 = vsel %vm6685_vm0, %v4472_v22, 0.0  ;;  %v341_v48 = vmax.f32 %v339_v43, %v340_v42 }
  0x3c   :  { %v333_v57 = vmul.f32 0.015625, %v262_v0  ;;  %v313_v56 = vadd.f32 %v312_v35, %v311_v4  ;;  %v318_v63 = vsel %vm6685_vm0, %v4483_v50, 0.0  ;;  %v344_v51 = vsel %vm6685_vm0, %v3936_v9, -inf }
  0x3d   :  { %v282_v55 = vrot.slane %v281_v6, 1  ;;  %v298_v10 = vadd.f32 %v297_v62, %v296_v12  ;;  %v343_v7 = vmax.f32 %v341_v48, %v342_v5  ;;  %v346_v8 = vsel %vm6685_vm0, %v3950_v13, -inf }
  0x3e   :  { %v315_v37 = vadd.f32 %v314_v1, %v313_v56  ;;  %v358_v3 = vsel %vm6685_vm0, %v3969_v18, -inf  ;;  %v359_v27 = vsel %vm6685_vm0, %v3974_v19, -inf  ;;  %v361_v4 = vsel %vm6685_vm0, %v3979_v20, -inf }
  0x3f   :  { %v283_v43 = vadd.f32 %v282_v55, %v281_v6  ;;  %v299_v35 = vrot.slane %v298_v10, 4  ;;  %v345_v34 = vmax.f32 %v343_v7, %v344_v51  ;;  %v360_v9 = vmax.f32 %v358_v3, %v359_v27 }
  0x40   :  { %v568_v62 = vsel %vm6609_vm7, %v333_v57, %v566_v41  ;;  %v317_v48 = vadd.f32 %v316_v36, %v315_v37  ;;  %v348_v13 = vsel %vm6685_vm0, %v3955_v14, -inf  ;;  %v363_v56 = vsel %vm6685_vm0, %v3991_v24, -inf }
  0x41   :  { %v334_v18 = vmul.f32 0.015625, %v283_v43  ;;  %v300_v30 = vadd.f32 %v299_v35, %v298_v10  ;;  %v347_v0 = vmax.f32 %v345_v34, %v346_v8  ;;  %v362_v19 = vmax.f32 %v360_v9, %v361_v4 }
  0x42   :  { %v319_v11 = vadd.f32 %v318_v63, %v317_v48  ;;  %v350_v20 = vsel %vm6685_vm0, %v3960_v15, -inf  ;;  %v365_v1 = vsel %vm6685_vm0, %v3996_v25, -inf  ;;  %v379_v41 = vsel %vm6685_vm0, %v4022_v33, -inf }
  0x43   :  { %v570_v57 = vsel %vm6607_vm8, %v334_v18, %v568_v62  ;;  %v301_v14 = vrot.slane %v300_v30, 2  ;;  %v349_v42 = vmax.f32 %v347_v0, %v348_v13  ;;  %v364_v5 = vmax.f32 %v362_v19, %v363_v56 }
  0x44   :  { %3652 = vmatmul.mubr.msk.f32.vlgmr.msra.gmra.mxu0 %vm6685_vm0, %v570_v57  ;;  %v320_v24 = vrot.slane %v319_v11, 4  ;;  %v367_v6 = vsel %vm6685_vm0, %v4001_v26, -inf  ;;  %v380_v15 = vsel %vm6685_vm0, %v4034_v38, -inf  ;;  %v382_v25 = vsel %vm6685_vm0, %v4039_v39, -inf }
  0x45   :  { %v6727_v12 = vmov 0.0   ;;  %v302_v33 = vadd.f32 %v301_v14, %v300_v30  ;;  %v351_v36 = vmax.f32 %v349_v42, %v350_v20  ;;  %v366_v63 = vmax.f32 %v364_v5, %v365_v1 }
  0x46   :  { %3654 = vmatprep.mubr.msk.f32.mxu0 %vm3844_vm1, %v6727_v12  ;;  %v381_v51 = vmax.f32 %v379_v41, %v380_v15  ;;  %v321_v55 = vadd.f32 %v320_v24, %v319_v11  ;;  %v369_v10 = vsel %vm6685_vm0, %v4012_v31, -inf  ;;  %v371_v26 = vsel %vm6685_vm0, %v4017_v32, -inf }
  0x47   :  { %v384_v38 = vsel %vm6685_vm0, %v4044_v40, -inf  ;;  %v303_v7 = vrot.slane %v302_v33, 1  ;;  %v352_v8 = vrot.slane %v351_v36, 4  ;;  %v368_v39 = vmax.f32 %v366_v63, %v367_v6 }
  0x48   :  { %v383_v37 = vmax.f32 %v381_v51, %v382_v25  ;;  %v322_v3 = vrot.slane %v321_v55, 2  ;;  %v386_v27 = vsel %vm6685_vm0, %v4055_v45, -inf  ;;  %v400_v4 = vsel %vm6685_vm0, %v4081_v53, -inf }
  0x49   :  { %v401_v31 = vsel %vm6685_vm0, %v4086_v54, -inf  ;;  %v353_v43 = vmax.f32 %v351_v36, %v352_v8  ;;  %v370_v35 = vmax.f32 %v368_v39, %v369_v10  ;;  %v388_v40 = vsel %vm6685_vm0, %v4060_v46, -inf }
  0x4a   :  { %v385_v32 = vmax.f32 %v383_v37, %v384_v38  ;;  %v304_v34 = vadd.f32 %v303_v7, %v302_v33  ;;  %v323_v9 = vadd.f32 %v322_v3, %v321_v55  ;;  %v402_v62 = vmax.f32 %v400_v4, %v401_v31  ;;  %v6732_v38 = vld [vmem:[#allocation10_spill] sm:$0xff]  ;;  %v6733_v37 = vld [vmem:[#allocation11_spill] sm:$0xff] }
  0x4b   :  { %v403_v48 = vsel %vm6685_vm0, %v4095_v59, -inf  ;;  %v354_v13 = vrot.slane %v353_v43, 2  ;;  %v372_v45 = vmax.f32 %v370_v35, %v371_v26  ;;  %v405_v53 = vsel %vm6685_vm0, %v4100_v60, -inf  ;;  %v6731_v26 = vld [vmem:[#allocation9_spill] sm:$0xff] }
  0x4c   :  { %v387_v56 = vmax.f32 %v385_v32, %v386_v27  ;;  %v390_v54 = vsel %vm6685_vm0, %v4065_v47, -inf  ;;  %v392_v18 = vsel %vm6685_vm0, %v4076_v52, -inf  ;;  %v404_v30 = vmax.f32 %v402_v62, %v403_v48  ;;  %v6734_v27 = vld [vmem:[#allocation12_spill] sm:$0xff]  ;;  %v6735_v32 = vld [vmem:[#allocation13_spill] sm:$0xff]  ;;  %v6736_v48 = vld [vmem:[#allocation14_spill] sm:$0xff] }
  0x4d   :  { %v324_v46 = vrot.slane %v323_v9, 1  ;;  %v373_v0 = vrot.slane %v372_v45, 4  ;;  %v407_v11 = vsel %vm6685_vm0, %v4105_v61, -inf  ;;  %v335_v59 = vmul.f32 0.015625, %v304_v34  ;;  %v6728_v61 = vld [vmem:[#allocation6_spill] sm:$0xff] }
  0x4e   :  { %v389_v19 = vmax.f32 %v387_v56, %v388_v40  ;;  %v355_v20 = vmax.f32 %v353_v43, %v354_v13  ;;  %v406_v1 = vmax.f32 %v404_v30, %v405_v53  ;;  %v421_v41 = vsel %vm6685_vm0, %v4125_v16, -inf  ;;  %v6729_v16 = vld [vmem:[#allocation8_spill] sm:$0xff]  ;;  %v6737_v53 = vld [vmem:[#allocation15_spill] sm:$0xff] }
  0x4f   :  { %v374_v60 = vmax.f32 %v372_v45, %v373_v0  ;;  %v409_v47 = vsel %vm6685_vm0, %v4116_v2, -inf  ;;  %v422_v52 = vsel %vm6685_vm0, %v4130_v17, -inf  ;;  %v411_v42 = vsel %vm6685_vm0, %v4144_v29, -inf  ;;  %v6730_v2 = vld [vmem:[#allocation7_spill] sm:$0xff]  ;;  %v6738_v0 = vld [vmem:[#allocation17_spill] sm:$0xff] }
  0x50   :  { %v391_v57 = vmax.f32 %v389_v19, %v390_v54  ;;  %v408_v14 = vmax.f32 %v406_v1, %v407_v11  ;;  %v423_v5 = vmax.f32 %v421_v41, %v422_v52  ;;  %v424_v24 = vsel %vm6685_vm0, %v6728_v61, -inf  ;;  %v6739_v11 = vld [vmem:[#allocation16_spill] sm:$0xff] }
  0x51   :  { %v325_v6 = vadd.f32 %v324_v46, %v323_v9  ;;  %v375_v15 = vrot.slane %v374_v60, 2  ;;  %v426_v33 = vsel %vm6685_vm0, %v6729_v16, -inf  ;;  %v356_v36 = vrot.slane %v355_v20, 1  ;;  %v6742_v61 = vld [vmem:[#allocation20_spill] sm:$0xff] }
  0x52   :  { %v393_v25 = vmax.f32 %v391_v57, %v392_v18  ;;  %v410_v63 = vmax.f32 %v408_v14, %v409_v47  ;;  %v413_v51 = vsel %vm6685_vm0, %v6730_v2, -inf  ;;  %v425_v17 = vmax.f32 %v423_v5, %v424_v24  ;;  %v6740_v47 = vld [vmem:[#allocation18_spill] sm:$0xff] }
  0x53   :  { %v376_v55 = vmax.f32 %v374_v60, %v375_v15  ;;  %v428_v29 = vsel %vm6685_vm0, %v6731_v26, -inf  ;;  %v430_v7 = vsel %vm6685_vm0, %v6732_v38, -inf  ;;  %v442_v3 = vsel %vm6685_vm0, %v6733_v37, -inf  ;;  %v6746_v38 = vld [vmem:[#allocation24_spill] sm:$0xff] }
  0x54   :  { %v394_v10 = vrot.slane %v393_v25, 4  ;;  %v412_v8 = vmax.f32 %v410_v63, %v411_v42  ;;  %v427_v39 = vmax.f32 %v425_v17, %v426_v33  ;;  %v443_v4 = vsel %vm6685_vm0, %v6734_v27, -inf  ;;  %v6741_v42 = vld [vmem:[#allocation19_spill] sm:$0xff]  ;;  %v6744_v33 = vld [vmem:[#allocation22_spill] sm:$0xff] }
  0x55   :  { %v377_v31 = vrot.slane %v376_v55, 1  ;;  %v444_v35 = vmax.f32 %v442_v3, %v443_v4  ;;  %v445_v40 = vsel %vm6685_vm0, %v6735_v32, -inf  ;;  %v336_v34 = vmul.f32 0.015625, %v325_v6  ;;  %v6747_v4 = vld [vmem:[#allocation25_spill] sm:$0xff]  ;;  %v6749_v32 = vld [vmem:[#allocation28_spill] sm:$0xff] }
  0x56   :  { %v395_v43 = vmax.f32 %v393_v25, %v394_v10  ;;  %v414_v9 = vmax.f32 %v412_v8, %v413_v51  ;;  %v429_v62 = vmax.f32 %v427_v39, %v428_v29  ;;  %v447_v13 = vsel %vm6685_vm0, %v6736_v48, -inf  ;;  %v6743_v25 = vld [vmem:[#allocation21_spill] sm:$0xff]  ;;  %v6745_v51 = vld [vmem:[#allocation23_spill] sm:$0xff] }
  0x57   :  { %v357_v45 = vmax.f32 %v355_v20, %v356_v36  ;;  %v432_v54 = vsel %vm6685_vm0, %v6737_v53, -inf  ;;  %v446_v18 = vmax.f32 %v444_v35, %v445_v40  ;;  %v434_v19 = vsel %vm6685_vm0, %v6738_v0, -inf }
  0x58   :  { %v396_v56 = vrot.slane %v395_v43, 2  ;;  %v415_v30 = vrot.slane %v414_v9, 4  ;;  %v431_v46 = vmax.f32 %v429_v62, %v430_v7  ;;  %v449_v1 = vsel %vm6685_vm0, %v6739_v11, -inf  ;;  %v6750_v62 = vld [vmem:[#allocation29_spill] sm:$0xff] }
  0x59   :  { %v378_v41 = vmax.f32 %v376_v55, %v377_v31  ;;  %v448_v57 = vmax.f32 %v446_v18, %v447_v13  ;;  %v451_v52 = vsel %vm6685_vm0, %v6740_v47, -inf  ;;  %v453_v5 = vsel %vm6685_vm0, %v6741_v42, -inf  ;;  %v6752_v47 = vld [vmem:[#allocation30_spill] sm:$0xff]  ;;  %v6753_v42 = vld [vmem:[#allocation33_spill] sm:$0xff] }
  0x5a   :  { %v397_v60 = vmax.f32 %v395_v43, %v396_v56  ;;  %v416_v20 = vmax.f32 %v414_v9, %v415_v30  ;;  %v433_v14 = vmax.f32 %v431_v46, %v432_v54  ;;  %v463_v24 = vsel %vm6685_vm0, %v6742_v61, -inf  ;;  %v6748_v43 = vld [vmem:[#allocation26_spill] sm:$0xff] }
  0x5b   :  { %v450_v15 = vmax.f32 %v448_v57, %v449_v1  ;;  %v464_v16 = vsel %vm6685_vm0, %v6743_v25, -inf  ;;  %v466_v36 = vsel %vm6685_vm0, %v6744_v33, -inf  ;;  %v455_v17 = vsel %vm6685_vm0, %v6745_v51, -inf  ;;  %v6755_v33 = vld [vmem:[#allocation31_spill] sm:$0xff] }
  0x5c   :  { %v398_v6 = vrot.slane %v397_v60, 1  ;;  %v417_v63 = vrot.slane %v416_v20, 2  ;;  %v435_v2 = vmax.f32 %v433_v14, %v434_v19  ;;  %v465_v55 = vmax.f32 %v463_v24, %v464_v16 }
  0x5d   :  { %v452_v10 = vmax.f32 %v450_v15, %v451_v52  ;;  %v4595_v26 = vsel %vm557_vm2, %v336_v34, %v335_v59  ;;  %v583_v29 = vsel %vm6621_vm4, %v378_v41, %v357_v45  ;;  %v468_v7 = vsel %vm6685_vm0, %v6746_v38, -inf  ;;  %v6751_v45 = vld [vmem:[#allocation27_spill] sm:$0xff]  ;;  %v6757_v38 = vld [vmem:[#allocation32_spill] sm:$0xff] }
  0x5e   :  { %v399_v8 = vmax.f32 %v397_v60, %v398_v6  ;;  %v418_v39 = vmax.f32 %v416_v20, %v417_v63  ;;  %v436_v37 = vrot.slane %v435_v2, 4  ;;  %v467_v3 = vmax.f32 %v465_v55, %v466_v36  ;;  %v6754_v6 = vld [vmem:[#allocation34_spill] sm:$0xff]  ;;  %v6756_v36 = vld [vmem:[#allocation35_spill] sm:$0xff] }
  0x5f   :  { %v454_v27 = vmax.f32 %v452_v10, %v453_v5  ;;  %v470_v31 = vsel %vm6685_vm0, %v6747_v4, -inf  ;;  %v472_v35 = vsel %vm6685_vm0, %v6748_v43, -inf  ;;  %v484_v59 = vsel %vm6685_vm0, %v6749_v32, -inf }
  0x60   :  { %v419_v40 = vrot.slane %v418_v39, 1  ;;  %v437_v34 = vmax.f32 %v435_v2, %v436_v37  ;;  %v469_v9 = vmax.f32 %v467_v3, %v468_v7  ;;  %v485_v48 = vsel %vm6685_vm0, %v6750_v62, -inf }
  0x61   :  { %v456_v13 = vmax.f32 %v454_v27, %v455_v17  ;;  %v474_v56 = vsel %vm6685_vm0, %v6751_v45, -inf  ;;  %v486_v53 = vmax.f32 %v484_v59, %v485_v48  ;;  %v487_v54 = vsel %vm6685_vm0, %v4314_v49, -inf  ;;  %v6759_v27 = vld [vmem:[#allocation37_spill] sm:$0xff]  ;;  %v6761_v59 = vld [vmem:[#allocation39_spill] sm:$0xff] }
  0x62   :  { %v438_v18 = vrot.slane %v437_v34, 2  ;;  %v584_v30 = vsel %vm6617_vm5, %v399_v8, %v583_v29  ;;  %v471_v46 = vmax.f32 %v469_v9, %v470_v31  ;;  %v489_v0 = vsel %vm6685_vm0, %v4321_v44, -inf  ;;  %v6758_v8 = vld [vmem:[#allocation36_spill] sm:$0xff]  ;;  %v6760_v31 = vld [vmem:[#allocation38_spill] sm:$0xff] }
  0x63   :  { %v420_v19 = vmax.f32 %v418_v39, %v419_v40  ;;  %v457_v11 = vrot.slane %v456_v13, 4  ;;  %v476_v1 = vsel %vm6685_vm0, %v4334_v58, -inf  ;;  %v488_v41 = vmax.f32 %v486_v53, %v487_v54  ;;  %v6763_v54 = vld [vmem:[#allocation41_spill] sm:$0xff] }
  0x64   :  { %v439_v60 = vmax.f32 %v437_v34, %v438_v18  ;;  %v473_v57 = vmax.f32 %v471_v46, %v472_v35  ;;  %v491_v52 = vsel %vm6685_vm0, %v6752_v47, -inf  ;;  %v493_v49 = vsel %vm6685_vm0, %v4348_v28, -inf  ;;  %v6762_v34 = vld [vmem:[#allocation40_spill] sm:$0xff] }
  0x65   :  { %v458_v20 = vmax.f32 %v456_v13, %v457_v11  ;;  %vm592_vm9 = vcmask 1041408   ;;  %v490_v14 = vmax.f32 %v488_v41, %v489_v0  ;;  %v505_v44 = vsel %vm6685_vm0, %v4370_v21, -inf  ;;  %v6765_v41 = vld [vmem:[#allocation42_spill] sm:$0xff] }
  0x66   :  { %v506_v5 = vsel %vm6685_vm0, %v6753_v42, -inf  ;;  %v440_v61 = vrot.slane %v439_v60, 1  ;;  %v475_v58 = vmax.f32 %v473_v57, %v474_v56  ;;  %v508_v15 = vsel %vm6685_vm0, %v6754_v6, -inf  ;;  %v6766_v57 = vld [vmem:[#allocation44_spill] sm:$0xff] }
  0x67   :  { %v507_v24 = vmax.f32 %v505_v44, %v506_v5  ;;  %v459_v25 = vrot.slane %v458_v20, 2  ;;  %v492_v16 = vmax.f32 %v490_v14, %v491_v52  ;;  %v495_v28 = vsel %vm6685_vm0, %v6755_v33, -inf }
  0x68   :  { %v510_v63 = vsel %vm6685_vm0, %v6756_v36, -inf  ;;  %v441_v2 = vmax.f32 %v439_v60, %v440_v61  ;;  %v585_v51 = vsel %vm6613_vm6, %v420_v19, %v584_v30  ;;  %v477_v17 = vmax.f32 %v475_v58, %v476_v1  ;;  %v6764_v30 = vld [vmem:[#allocation43_spill] sm:$0xff] }
  0x69   :  { %v509_v55 = vmax.f32 %v507_v24, %v508_v15  ;;  %v460_v10 = vmax.f32 %v458_v20, %v459_v25  ;;  %v494_v29 = vmax.f32 %v492_v16, %v493_v49  ;;  %v497_v7 = vsel %vm6685_vm0, %v6757_v38, -inf }
  0x6a   :  { %v512_v39 = vsel %vm6685_vm0, %v6758_v8, -inf  ;;  %v478_v37 = vrot.slane %v477_v17, 4  ;;  %v514_v4 = vsel %vm6685_vm0, %v6759_v27, -inf  ;;  %v526_v43 = vsel %vm6685_vm0, %v6760_v31, -inf }
  0x6b   :  { %v511_v3 = vmax.f32 %v509_v55, %v510_v63  ;;  %v461_v35 = vrot.slane %v460_v10, 1  ;;  %v496_v32 = vmax.f32 %v494_v29, %v495_v28  ;;  %v527_v40 = vsel %vm6685_vm0, %v6761_v59, -inf }
  0x6c   :  { %v529_v9 = vsel %vm6685_vm0, %v6762_v34, -inf  ;;  %v586_v62 = vsel %vm6609_vm7, %v441_v2, %v585_v51  ;;  %v479_v48 = vmax.f32 %v477_v17, %v478_v37  ;;  %v528_v45 = vmax.f32 %v526_v43, %v527_v40 }
  0x6d   :  { %v513_v13 = vmax.f32 %v511_v3, %v512_v39  ;;  %v462_v56 = vmax.f32 %v460_v10, %v461_v35  ;;  %v498_v53 = vmax.f32 %v496_v32, %v497_v7  ;;  %v516_v18 = vsel %vm6685_vm0, %v6763_v54, -inf }
  0x6e   :  { %v531_v46 = vsel %vm6685_vm0, %v6764_v30, -inf  ;;  %v530_v19 = vmax.f32 %v528_v45, %v529_v9  ;;  %v518_v60 = vsel %vm6685_vm0, %v6765_v41, -inf  ;;  %v533_v47 = vsel %vm6685_vm0, %v6766_v57, -inf }
  0x6f   :  { %v515_v0 = vmax.f32 %v513_v13, %v514_v4  ;;  %v587_v11 = vsel %vm6607_vm8, %v462_v56, %v586_v62  ;;  %v499_v1 = vrot.slane %v498_v53, 4  ;;  %v480_v49 = vrot.slane %v479_v48, 2  ;;  %v688_v13 = vld [vmem:[%s6532_s3] sm:$0xff] }
  0x70   :  { %v593_v52 = vsel %vm592_vm9, %v4595_v26, %v587_v11  ;;  %v532_v14 = vmax.f32 %v530_v19, %v531_v46  ;;  %v535_v5 = vsel %vm6685_vm0, %v4465_v23, -inf  ;;  %v537_v15 = vsel %vm6685_vm0, %v4472_v22, -inf  ;;  %3661 = vmatpush3.msra.mxu1 %v688_v13 }
  0x71   :  { %v517_v20 = vmax.f32 %v515_v0, %v516_v18  ;;  %3655 = vmatmul.mubr.msk.f32.gmra.mxu0 %vm6685_vm0, %v593_v52  ;;  %v500_v44 = vmax.f32 %v498_v53, %v499_v1  ;;  %v481_v25 = vmax.f32 %v479_v48, %v480_v49  ;;  %v539_v28 = vsel %vm6685_vm0, %v4483_v50, -inf }
  0x72   :  { %3657 = vmatprep.mubr.msk.f32.mxu0 %vm3844_vm1, %v6727_v12  ;;  %v534_v58 = vmax.f32 %v532_v14, %v533_v47  ;;  %vm689_vm10 = vcmask 64512   ;;  %vm781_vm11 = vcmask 1045504   ;;  %vm1656_vm12 = vcmask 130112  }
  0x73   :  { %v519_v61 = vmax.f32 %v517_v20, %v518_v60  ;;  %v501_v24 = vrot.slane %v500_v44, 2  ;;  %v482_v51 = vrot.slane %v481_v25, 1  ;;  %vm1663_vm13 = vcmask 195712  }
  0x74   :  { %v536_v16 = vmax.f32 %v534_v58, %v535_v5  ;;  %vm1670_vm14 = vcmask 261312   ;;  %vm2151_vm15 = vcmask 654912   ;;  %vm2158_vm9 = vcmask 720512  }
  0x75   :  { %v520_v26 = vrot.slane %v519_v61, 4  ;;  %v502_v33 = vmax.f32 %v500_v44, %v501_v24  ;;  %v483_v7 = vmax.f32 %v481_v25, %v482_v51  ;;  %v807_v51 = vlaneseq }
  0x76   :  { %v538_v2 = vmax.f32 %v536_v16, %v537_v15  ;;  %vm2165_vm8 = vcmask 786112   ;;  %vm2172_vm7 = vcmask 851712   ;;  %vm1698_vm6 = vcmask 523712  }
  0x77   :  { %v521_v63 = vmax.f32 %v519_v61, %v520_v26  ;;  %v503_v17 = vrot.slane %v502_v33, 1  ;;  %vm2179_vm5 = vcmask 917312  }
  0x78   :  { %v540_v10 = vmax.f32 %v538_v2, %v539_v28 }
  0x79   :  { %v522_v55 = vrot.slane %v521_v63, 2  ;;  %v504_v39 = vmax.f32 %v502_v33, %v503_v17 }
  0x7a   :  { %v541_v38 = vrot.slane %v540_v10, 4 }
  0x7b   :  { %v523_v29 = vmax.f32 %v521_v63, %v522_v55  ;;  %v588_v32 = vsel %vm557_vm2, %v504_v39, %v483_v7  ;;  %v3845_v63 = vmov 1966171168   ;;  %v4677_v55 = vshrl.u32 %v807_v51, 7 }
  0x7c   :  { %v542_v3 = vmax.f32 %v540_v10, %v541_v38  ;;  %v805_v2 = vunpack.c.l.s4 %v3845_v63 }
  0x7d   :  { %v524_v37 = vrot.slane %v523_v29, 1  ;;  %6767 = vst [vmem:[#allocation6_spill] sm:$0xff] %v4677_v55  ;;  %v4686_v39 = vsub.s32 0, %v4677_v55 }
  0x7e   :  { %v543_v4 = vrot.slane %v542_v3, 2  ;;  %v806_v17 = vunpack.c.0.s8 %v805_v2 }
  0x7f   :  { %v525_v43 = vmax.f32 %v523_v29, %v524_v37  ;;  %6768 = vst [vmem:[#allocation8_spill] sm:$0xff] %v4686_v39 }
  0x80   :  { %v544_v35 = vmax.f32 %v542_v3, %v543_v4  ;;  %v4680_v10 = vsub.s32 %v806_v17, %v4677_v55 }
  0x81   :  { %v589_v9 = vsel %vm6630_vm3, %v525_v43, %v588_v32  ;;  %vm2193_vm3 = vcmask 1048512  }
  0x82   :  { %v545_v40 = vrot.slane %v544_v35, 1 }
  0x84   :  { %v546_v62 = vmax.f32 %v544_v35, %v545_v40 }
  0x86   :  { %v590_v48 = vsel %vm6621_vm4, %v546_v62, %v589_v9  ;;  %vm2186_vm4 = vcmask 982912  }
  0x87   :  { %3658 = vmatmul.mubr.msk.f32.gmra.mxu0 %vm6685_vm0, %v590_v48 }
 0x104   :  { %v671_v45 = vpop.f32.mrf.mxu0 }
 0x105   :  { %v685_v56 = vmax.f32 %v671_v45, 0.0 }
 0x106   :  { %v3653_v53 = vpop.f32.mrf.mxu0 }
 0x107   :  { %3663 = vmatmul.mubr.msk.f32.vlgmr.msra.gmra.mxu1 %vm689_vm10, %v685_v56 }
 0x108   :  { %3665 = vmatprep.mubr.msk.f32.mxu1 %vm3844_vm1, %v6727_v12 }
 0x131   :  { %v676_v18 = vpop.f32.mrf.mxu0 }
 0x132   :  { %v686_v46 = vmax.f32 %v676_v18, 0.0 }
 0x133   :  { %v3656_v0 = vpop.f32.mrf.mxu0 }
 0x134   :  { %3666 = vmatmul.mubr.msk.f32.gmra.mxu1 %vm689_vm10, %v686_v46 }
 0x135   :  { %3668 = vmatprep.mubr.msk.f32.mxu1 %vm3844_vm1, %v6727_v12  ;;  %vm1677_vm1 = vcmask 326912  }
 0x147   :  { %v681_v19 = vpop.f32.mrf.mxu0 }
 0x148   :  { %v687_v11 = vmax.f32 %v681_v19, 0.0 }
 0x149   :  { %v3659_v1 = vpop.f32.mrf.mxu0 }
 0x14a   :  { %3669 = vmatmul.mubr.msk.f32.gmra.mxu1 %vm689_vm10, %v687_v11  ;;  %vm6675_vm10 = vcmask 392512  }
 0x1c7   :  { %v765_v60 = vpop.f32.mrf.mxu1 }
 0x1c9   :  { %v3664_v47 = vpop.f32.mrf.mxu1 }
 0x1f4   :  { %v770_v52 = vpop.f32.mrf.mxu1 }
 0x1f5   :  { %v782_v14 = vrot.slane %v770_v52, 2 }
 0x1f6   :  { %v3667_v49 = vpop.f32.mrf.mxu1 }
 0x20a   :  { %v775_v20 = vpop.f32.mrf.mxu1 }
 0x20b   :  { %v783_v44 = vrot.slane %v775_v20, 2 }
 0x20c   :  { %v3670_v5 = vpop.f32.mrf.mxu1 }
 0x20d   :  { %v784_v61 = vsel %vm781_vm11, %v782_v14, %v783_v44  ;;  %v788_v58 = vadd.f32 %v783_v44, %v770_v52  ;;  %v3758_v5 = vld [vmem:[%s6529_s0 + $0x8] sm:$0xff]  ;;  %vm1691_vm11 = vcmask 458112  }
 0x20e   :  { %v787_v24 = vadd.f32 %v784_v61, %v765_v60 }
 0x20f   :  { %v3592_v15 = vmul.f32 -1.442695, %v788_v58 }
 0x210   :  { %v3591_v25 = vmul.f32 -1.442695, %v787_v24 }
 0x211   :  { %3731 = vpow2.f32 %v3592_v15 }
 0x212   :  { %3733 = vpow2.f32 %v3591_v25  ;;  %v3759_v25 = vld [vmem:[%s6529_s0 + $0x10] sm:$0xff] }
 0x21e   :  { %v3732_v26 = vpop.eup %3731 }
 0x21f   :  { %v3734_v16 = vpop.eup %3733  ;;  %v796_v33 = vadd.f32 1.0, %v3732_v26 }
 0x220   :  { %v795_v28 = vadd.f32 1.0, %v3734_v16 }
 0x221   :  { %3735 = vrcp.f32 %v796_v33 }
 0x222   :  { %3737 = vrcp.f32 %v795_v28 }
 0x22e   :  { %v3736_v29 = vpop.eup %3735 }
 0x22f   :  { %v3738_v38 = vpop.eup %3737  ;;  %v4683_v7 = vrot.slane %v3736_v29, %v4680_v10  ;;  %v3761_v29 = vld [vmem:[%s6529_s0 + $0x20] sm:$0xff] }
 0x230   :  { %v803_v37 = vcombine.high %v3738_v38, %v3738_v38  ;;  %v810_v3 = vrot.slane %v3738_v38, %v4680_v10 }
 0x231   :  { %v866_v4 = vrot.slane %v4683_v7, %v4680_v10 }
 0x232   :  { %v817_v43 = vrot.slane %v803_v37, %v4680_v10  ;;  %v818_v35 = vcombine.high %v810_v3, %v810_v3  ;;  %v859_v37 = vcombine.high %v4683_v7, %v4683_v7 }
 0x233   :  { %v909_v32 = vrot.slane %v866_v4, %v4686_v39 }
 0x234   :  { %v819_v40 = vcombine.high %v817_v43, %v817_v43  ;;  %v4694_v9 = vrot.slane %v817_v43, %v4680_v10  ;;  %v4697_v62 = vrot.slane %v818_v35, %v4680_v10  ;;  %v873_v43 = vrot.slane %v859_v37, %v4680_v10 }
 0x235   :  { %v4700_v48 = vmul.f32 %v909_v32, %v6753_v42  ;;  %v4703_v13 = vmul.f32 %v909_v32, %v4370_v21  ;;  %v4713_v18 = vmul.f32 %v909_v32, %v6754_v6  ;;  %v4716_v42 = vmul.f32 %v909_v32, %v6756_v36 }
 0x236   :  { %v4706_v45 = vrot.slane %v819_v40, %v4680_v10  ;;  %v4725_v19 = vmul.f32 %v909_v32, %v6758_v8  ;;  %v4730_v36 = vrot.slane %v810_v3, %v4680_v10  ;;  %v4735_v1 = vmul.f32 %v909_v32, %v6763_v54  ;;  %v3763_v10 = vld [vmem:[%s6529_s0 + $0x38] sm:$0xff] }
 0x237   :  { %6769 = vst [vmem:[#allocation7_spill] sm:$0xff] %v4700_v48  ;;  %6770 = vst [vmem:[#allocation9_spill] sm:$0xff] %v4703_v13  ;;  %v1199_v56 = vsel %vm6685_vm0, %v4700_v48, 0.0  ;;  %v1196_v53 = vsel %vm6685_vm0, %v4703_v13, 0.0  ;;  %v1202_v21 = vsel %vm6685_vm0, %v4713_v18, 0.0  ;;  %v1205_v46 = vsel %vm6685_vm0, %v4716_v42, 0.0 }
 0x238   :  { %1200 = vadd.xlane.f32.xlu0 %v1199_v56  ;;  %1197 = vadd.xlane.f32.xlu1 %v1196_v53  ;;  %6771 = vst [vmem:[#allocation10_spill] sm:$0xff] %v4713_v18  ;;  %6772 = vst [vmem:[#allocation11_spill] sm:$0xff] %v4716_v42  ;;  %v1520_v0 = vsel %vm6685_vm0, %v4700_v48, -inf  ;;  %v1517_v6 = vsel %vm6685_vm0, %v4703_v13, -inf  ;;  %v1208_v11 = vsel %vm6685_vm0, %v4725_v19, 0.0  ;;  %v1523_v60 = vsel %vm6685_vm0, %v4713_v18, -inf }
 0x239   :  { %6773 = vst [vmem:[#allocation12_spill] sm:$0xff] %v4725_v19  ;;  %6774 = vst [vmem:[#allocation13_spill] sm:$0xff] %v4735_v1  ;;  %v4740_v8 = vmul.f32 %v909_v32, %v6759_v27  ;;  %v877_v47 = vrot.slane %v4730_v36, %v4686_v39  ;;  %v1214_v52 = vsel %vm6685_vm0, %v4735_v1, 0.0  ;;  %v1535_v54 = vsel %vm6685_vm0, %v4735_v1, -inf  ;;  %v3757_v27 = vld [vmem:[%s6529_s0] sm:$0xff]  ;;  %v2574_v18 = vld [vmem:[%s6533_s4 + $0x78] sm:$0xff] }
 0x23a   :  { %v1526_v14 = vsel %vm6685_vm0, %v4716_v42, -inf  ;;  %v1529_v58 = vsel %vm6685_vm0, %v4725_v19, -inf  ;;  %v4767_v24 = vmul.f32 %v909_v32, %v6765_v41  ;;  %v3760_v41 = vld [vmem:[%s6529_s0 + $0x18] sm:$0xff]  ;;  %v3762_v32 = vld [vmem:[%s6529_s0 + $0x28] sm:$0xff]  ;;  %v913_v56 = vrot.slane %v873_v43, %v4686_v39  ;;  %3671 = vmatprep.subr.mxu1 %v2574_v18 }
 0x23b   :  { %6775 = vst [vmem:[#allocation14_spill] sm:$0xff] %v4740_v8  ;;  %v1211_v49 = vsel %vm6685_vm0, %v4740_v8, 0.0  ;;  %v4753_v20 = vmul.f32 %v3757_v27, %v877_v47  ;;  %v4762_v61 = vmul.f32 %v3758_v5, %v877_v47  ;;  %v4774_v26 = vmul.f32 %v3759_v25, %v877_v47  ;;  %3672 = vmatpush3.msra.mxu1 %v2574_v18  ;;  %v2572_v13 = vld [vmem:[%s6533_s4 + $0x68] sm:$0xff] }
 0x23c   :  { %1203 = vadd.xlane.f32.xlu0 %v1202_v21  ;;  %1206 = vadd.xlane.f32.xlu1 %v1205_v46  ;;  %6778 = vst [vmem:[#allocation16_spill] sm:$0xff] %v4767_v24  ;;  %v1217_v16 = vsel %vm6685_vm0, %v4767_v24, 0.0  ;;  %v4783_v28 = vmul.f32 %v3760_v41, %v877_v47  ;;  %v1532_v63 = vsel %vm6685_vm0, %v4740_v8, -inf  ;;  %v4794_v38 = vmul.f32 %v3761_v29, %v877_v47 }
 0x23d   :  { %6776 = vst [vmem:[#allocation15_spill] sm:$0xff] %v4753_v20  ;;  %v1004_v44 = vsel %vm6685_vm0, %v4753_v20, 0.0  ;;  %6777 = vst [vmem:[#allocation17_spill] sm:$0xff] %v4762_v61  ;;  %v1007_v15 = vsel %vm6685_vm0, %v4762_v61, 0.0  ;;  %v1010_v33 = vsel %vm6685_vm0, %v4774_v26, 0.0  ;;  %v1325_v17 = vsel %vm6685_vm0, %v4753_v20, -inf }
 0x23e   :  { %6779 = vst [vmem:[#allocation18_spill] sm:$0xff] %v4774_v26  ;;  %6780 = vst [vmem:[#allocation19_spill] sm:$0xff] %v4783_v28  ;;  %v1013_v2 = vsel %vm6685_vm0, %v4783_v28, 0.0  ;;  %v1328_v3 = vsel %vm6685_vm0, %v4762_v61, -inf  ;;  %v1016_v4 = vsel %vm6685_vm0, %v4794_v38, 0.0  ;;  %v1334_v35 = vsel %vm6685_vm0, %v4783_v28, -inf }
 0x23f   :  { %6781 = vst [vmem:[#allocation20_spill] sm:$0xff] %v4794_v38  ;;  %v4808_v40 = vmul.f32 %v3762_v32, %v877_v47  ;;  %v1331_v7 = vsel %vm6685_vm0, %v4774_v26, -inf  ;;  %v4818_v21 = vmul.f32 %v3763_v10, %v877_v47  ;;  %v4853_v5 = vmul.f32 %v913_v56, %v6760_v31 }
 0x240   :  { %1521 = vmax.xlane.f32.xlu0 %v1520_v0  ;;  %1518 = vmax.xlane.f32.xlu1 %v1517_v6  ;;  %v3764_v0 = vld [vmem:[%s6529_s0 + $0x30] sm:$0xff]  ;;  %v848_v41 = vcombine.high %v4730_v36, %v4730_v36  ;;  %v4892_v37 = vrot.slane %v4697_v62, %v4686_v39 }
 0x241   :  { %6782 = vst [vmem:[#allocation21_spill] sm:$0xff] %v4808_v40  ;;  %v1340_v53 = vsel %vm6685_vm0, %v4808_v40, -inf  ;;  %6783 = vst [vmem:[#allocation22_spill] sm:$0xff] %v4818_v21  ;;  %v1019_v46 = vsel %vm6685_vm0, %v4808_v40, 0.0  ;;  %v4825_v6 = vmul.f32 %v3764_v0, %v877_v47  ;;  %v1337_v47 = vsel %vm6685_vm0, %v4794_v38, -inf }
 0x242   :  { %v1025_v27 = vsel %vm6685_vm0, %v4818_v21, 0.0  ;;  %6788 = vst [vmem:[#allocation28_spill] sm:$0xff] %v4853_v5  ;;  %v1220_v25 = vsel %vm6685_vm0, %v4853_v5, 0.0  ;;  %v4886_v29 = vrot.slane %v848_v41, %v4686_v39 }
 0x243   :  { %6784 = vst [vmem:[#allocation23_spill] sm:$0xff] %v4825_v6 }
 0x244   :  { %1209 = vadd.xlane.f32.xlu0 %v1208_v11  ;;  %1524 = vmax.xlane.f32.xlu1 %v1523_v60  ;;  %v1346_v11 = vsel %vm6685_vm0, %v4818_v21, -inf  ;;  %v4830_v60 = vmul.f32 %v913_v56, %v6761_v59 }
 0x246   :  { %6785 = vst [vmem:[#allocation24_spill] sm:$0xff] %v4830_v60 }
 0x248   :  { %1215 = vadd.xlane.f32.xlu0 %v1214_v52  ;;  %1212 = vadd.xlane.f32.xlu1 %v1211_v49  ;;  %v1022_v52 = vsel %vm6685_vm0, %v4825_v6, 0.0  ;;  %v1223_v49 = vsel %vm6685_vm0, %v4830_v60, 0.0 }
 0x24c   :  { %1536 = vmax.xlane.f32.xlu0 %v1535_v54  ;;  %1527 = vmax.xlane.f32.xlu1 %v1526_v14  ;;  %v4837_v54 = vmul.f32 %v913_v56, %v6764_v30  ;;  %v1544_v14 = vsel %vm6685_vm0, %v4830_v60, -inf  ;;  %v1343_v30 = vsel %vm6685_vm0, %v4825_v6, -inf }
 0x24e   :  { %6786 = vst [vmem:[#allocation25_spill] sm:$0xff] %v4837_v54  ;;  %v1229_v59 = vsel %vm6685_vm0, %v4837_v54, 0.0  ;;  %v1550_v31 = vsel %vm6685_vm0, %v4837_v54, -inf }
 0x250   :  { %1005 = vadd.xlane.f32.xlu0 %v1004_v44  ;;  %1530 = vmax.xlane.f32.xlu1 %v1529_v58  ;;  %v4848_v44 = vmul.f32 %v913_v56, %v6762_v34 }
 0x252   :  { %6787 = vst [vmem:[#allocation26_spill] sm:$0xff] %v4848_v44  ;;  %v1547_v58 = vsel %vm6685_vm0, %v4848_v44, -inf }
 0x254   :  { %1008 = vadd.xlane.f32.xlu0 %v1007_v15  ;;  %1218 = vadd.xlane.f32.xlu1 %v1217_v16  ;;  %v4858_v15 = vmul.f32 %v913_v56, %v4465_v23  ;;  %v1226_v16 = vsel %vm6685_vm0, %v4848_v44, 0.0  ;;  %v1541_v23 = vsel %vm6685_vm0, %v4853_v5, -inf  ;;  %v3820_v44 = vld [vmem:[%s6529_s0 + $0x1f8] sm:$0xff] }
 0x256   :  { %6789 = vst [vmem:[#allocation29_spill] sm:$0xff] %v4858_v15  ;;  %v1235_v34 = vsel %vm6685_vm0, %v4858_v15, 0.0 }
 0x258   :  { %1011 = vadd.xlane.f32.xlu0 %v1010_v33  ;;  %1533 = vmax.xlane.f32.xlu1 %v1532_v63  ;;  %v4869_v33 = vmul.f32 %v913_v56, %v6766_v57  ;;  %v4883_v57 = vmul.f32 %v913_v56, %v4472_v22  ;;  %v1556_v22 = vsel %vm6685_vm0, %v4858_v15, -inf }
 0x25a   :  { %6790 = vst [vmem:[#allocation27_spill] sm:$0xff] %v4869_v33  ;;  %v1553_v63 = vsel %vm6685_vm0, %v4869_v33, -inf  ;;  %6792 = vst [vmem:[#allocation33_spill] sm:$0xff] %v4883_v57  ;;  %v1559_v43 = vsel %vm6685_vm0, %v4883_v57, -inf }
 0x25c   :  { %1014 = vadd.xlane.f32.xlu0 %v1013_v2  ;;  %1326 = vmax.xlane.f32.xlu1 %v1325_v17  ;;  %v4878_v2 = vmul.f32 %v913_v56, %v4483_v50  ;;  %v1232_v17 = vsel %vm6685_vm0, %v4869_v33, 0.0  ;;  %v1238_v50 = vsel %vm6685_vm0, %v4883_v57, 0.0  ;;  %v3767_v56 = vld [vmem:[%s6529_s0 + $0x90] sm:$0xff] }
 0x25e   :  { %6791 = vst [vmem:[#allocation30_spill] sm:$0xff] %v4878_v2  ;;  %v1241_v36 = vsel %vm6685_vm0, %v4878_v2, 0.0 }
 0x260   :  { %1329 = vmax.xlane.f32.xlu0 %v1328_v3  ;;  %1017 = vadd.xlane.f32.xlu1 %v1016_v4  ;;  %v3765_v3 = vld [vmem:[%s6529_s0 + $0x80] sm:$0xff] }
 0x261   :  { %v4902_v4 = vmul.f32 %v3765_v3, %v4886_v29 }
 0x263   :  { %6793 = vst [vmem:[#allocation34_spill] sm:$0xff] %v4902_v4 }
 0x264   :  { %1335 = vmax.xlane.f32.xlu0 %v1334_v35  ;;  %1332 = vmax.xlane.f32.xlu1 %v1331_v7  ;;  %v3766_v35 = vld [vmem:[%s6529_s0 + $0x40] sm:$0xff]  ;;  %v1052_v7 = vsel %vm6685_vm0, %v4902_v4, 0.0 }
 0x265   :  { %v4910_v32 = vmul.f32 %v3766_v35, %v4892_v37 }
 0x267   :  { %6794 = vst [vmem:[#allocation31_spill] sm:$0xff] %v4910_v32  ;;  %v1028_v10 = vsel %vm6685_vm0, %v4910_v32, 0.0  ;;  %v1349_v3 = vsel %vm6685_vm0, %v4910_v32, -inf }
 0x268   :  { %1341 = vmax.xlane.f32.xlu0 %v1340_v53  ;;  %1020 = vadd.xlane.f32.xlu1 %v1019_v46  ;;  %v4918_v53 = vmul.f32 %v3767_v56, %v4886_v29  ;;  %v3768_v46 = vld [vmem:[%s6529_s0 + $0x48] sm:$0xff] }
 0x269   :  { %v4926_v0 = vmul.f32 %v3768_v46, %v4892_v37  ;;  %v3775_v56 = vld [vmem:[%s6529_s0 + $0x68] sm:$0xff] }
 0x26a   :  { %6795 = vst [vmem:[#allocation35_spill] sm:$0xff] %v4918_v53 }
 0x26b   :  { %6796 = vst [vmem:[#allocation32_spill] sm:$0xff] %v4926_v0 }
 0x26c   :  { %1347 = vmax.xlane.f32.xlu0 %v1346_v11  ;;  %1023 = vadd.xlane.f32.xlu1 %v1022_v52  ;;  %v1058_v11 = vsel %vm6685_vm0, %v4918_v53, 0.0  ;;  %v1031_v52 = vsel %vm6685_vm0, %v4926_v0, 0.0 }
 0x270   :  { %1224 = vadd.xlane.f32.xlu0 %v1223_v49  ;;  %1338 = vmax.xlane.f32.xlu1 %v1337_v47  ;;  %v3769_v49 = vld [vmem:[%s6529_s0 + $0x50] sm:$0xff] }
 0x271   :  { %v4936_v47 = vmul.f32 %v3769_v49, %v4892_v37 }
 0x273   :  { %6797 = vst [vmem:[#allocation36_spill] sm:$0xff] %v4936_v47 }
 0x274   :  { %1230 = vadd.xlane.f32.xlu0 %v1229_v59  ;;  %1026 = vadd.xlane.f32.xlu1 %v1025_v27  ;;  %v4940_v59 = vrot.slane %v4694_v9, %v4686_v39  ;;  %v1352_v27 = vsel %vm6685_vm0, %v4926_v0, -inf  ;;  %v3790_v0 = vld [vmem:[%s6529_s0 + $0xd8] sm:$0xff] }
 0x278   :  { %1545 = vmax.xlane.f32.xlu0 %v1544_v14  ;;  %1344 = vmax.xlane.f32.xlu1 %v1343_v30  ;;  %v3770_v14 = vld [vmem:[%s6529_s0 + $0x60] sm:$0xff] }
 0x279   :  { %v4948_v30 = vmul.f32 %v3770_v14, %v4892_v37  ;;  %v1379_v14 = vsel %vm6685_vm0, %v4918_v53, -inf }
 0x27b   :  { %6798 = vst [vmem:[#allocation37_spill] sm:$0xff] %v4948_v30 }
 0x27c   :  { %1548 = vmax.xlane.f32.xlu0 %v1547_v58  ;;  %1221 = vadd.xlane.f32.xlu1 %v1220_v25  ;;  %v1034_v58 = vsel %vm6685_vm0, %v4936_v47, 0.0  ;;  %v3771_v25 = vld [vmem:[%s6529_s0 + $0x88] sm:$0xff] }
 0x280   :  { %1236 = vadd.xlane.f32.xlu0 %v1235_v34  ;;  %1227 = vadd.xlane.f32.xlu1 %v1226_v16  ;;  %v4956_v34 = vmul.f32 %v3771_v25, %v4886_v29  ;;  %v1040_v16 = vsel %vm6685_vm0, %v4948_v30, 0.0 }
 0x282   :  { %6799 = vst [vmem:[#allocation38_spill] sm:$0xff] %v4956_v34  ;;  %v1055_v41 = vsel %vm6685_vm0, %v4956_v34, 0.0 }
 0x284   :  { %1551 = vmax.xlane.f32.xlu0 %v1550_v31  ;;  %1542 = vmax.xlane.f32.xlu1 %v1541_v23  ;;  %v3772_v31 = vld [vmem:[%s6529_s0 + $0x108] sm:$0xff] }
 0x285   :  { %v4964_v23 = vmul.f32 %v3772_v31, %v4940_v59  ;;  %v3778_v31 = vld [vmem:[%s6529_s0 + $0xa0] sm:$0xff] }
 0x287   :  { %6800 = vst [vmem:[#allocation39_spill] sm:$0xff] %v4964_v23 }
 0x288   :  { %1554 = vmax.xlane.f32.xlu0 %v1553_v63  ;;  %1233 = vadd.xlane.f32.xlu1 %v1232_v17  ;;  %v3773_v63 = vld [vmem:[%s6529_s0 + $0x58] sm:$0xff] }
 0x289   :  { %v4972_v17 = vmul.f32 %v3773_v63, %v4892_v37 }
 0x28b   :  { %6801 = vst [vmem:[#allocation40_spill] sm:$0xff] %v4972_v17 }
 0x28c   :  { %1242 = vadd.xlane.f32.xlu0 %v1241_v36  ;;  %1239 = vadd.xlane.f32.xlu1 %v1238_v50  ;;  %v1103_v36 = vsel %vm6685_vm0, %v4964_v23, 0.0  ;;  %v1037_v50 = vsel %vm6685_vm0, %v4972_v17, 0.0 }
 0x290   :  { %1557 = vmax.xlane.f32.xlu0 %v1556_v22  ;;  %1560 = vmax.xlane.f32.xlu1 %v1559_v43  ;;  %v1355_v22 = vsel %vm6685_vm0, %v4936_v47, -inf  ;;  %v3774_v43 = vld [vmem:[%s6529_s0 + $0x98] sm:$0xff] }
 0x291   :  { %v4986_v35 = vmul.f32 %v3774_v43, %v4886_v29  ;;  %v1361_v43 = vsel %vm6685_vm0, %v4948_v30, -inf }
 0x293   :  { %6802 = vst [vmem:[#allocation41_spill] sm:$0xff] %v4986_v35  ;;  %v1061_v46 = vsel %vm6685_vm0, %v4986_v35, 0.0 }
 0x294   :  { %1053 = vadd.xlane.f32.xlu0 %v1052_v7  ;;  %1029 = vadd.xlane.f32.xlu1 %v1028_v10  ;;  %v1376_v7 = vsel %vm6685_vm0, %v4956_v34, -inf  ;;  %v4994_v10 = vmul.f32 %v3775_v56, %v4892_v37 }
 0x296   :  { %6803 = vst [vmem:[#allocation43_spill] sm:$0xff] %v4994_v10  ;;  %v1043_v49 = vsel %vm6685_vm0, %v4994_v10, 0.0 }
 0x298   :  { %1059 = vadd.xlane.f32.xlu0 %v1058_v11  ;;  %1032 = vadd.xlane.f32.xlu1 %v1031_v52  ;;  %v3776_v11 = vld [vmem:[%s6529_s0 + $0x100] sm:$0xff] }
 0x299   :  { %v5002_v52 = vmul.f32 %v3776_v11, %v4940_v59  ;;  %v3780_v11 = vld [vmem:[%s6529_s0 + $0x78] sm:$0xff] }
 0x29b   :  { %6804 = vst [vmem:[#allocation42_spill] sm:$0xff] %v5002_v52 }
 0x29c   :  { %1353 = vmax.xlane.f32.xlu0 %v1352_v27  ;;  %1035 = vadd.xlane.f32.xlu1 %v1034_v58  ;;  %v1100_v27 = vsel %vm6685_vm0, %v5002_v52, 0.0  ;;  %v3777_v58 = vld [vmem:[%s6529_s0 + $0x70] sm:$0xff] }
 0x29d   :  { %v5014_v25 = vmul.f32 %v3777_v58, %v4892_v37 }
 0x29f   :  { %6805 = vst [vmem:[#allocation44_spill] sm:$0xff] %v5014_v25  ;;  %v1046_v63 = vsel %vm6685_vm0, %v5014_v25, 0.0 }
 0x2a0   :  { %1041 = vadd.xlane.f32.xlu0 %v1040_v16  ;;  %1056 = vadd.xlane.f32.xlu1 %v1055_v41  ;;  %v1373_v16 = vsel %vm6685_vm0, %v4902_v4, -inf  ;;  %v5022_v41 = vmul.f32 %v3778_v31, %v4886_v29 }
 0x2a2   :  { %6806 = vst [vmem:[#allocation45_spill] sm:$0xff] %v5022_v41 }
 0x2a4   :  { %1104 = vadd.xlane.f32.xlu0 %v1103_v36  ;;  %1038 = vadd.xlane.f32.xlu1 %v1037_v50  ;;  %v1064_v36 = vsel %vm6685_vm0, %v5022_v41, 0.0  ;;  %v3779_v50 = vld [vmem:[%s6529_s0 + $0x110] sm:$0xff] }
 0x2a8   :  { %1356 = vmax.xlane.f32.xlu0 %v1355_v22  ;;  %1350 = vmax.xlane.f32.xlu1 %v1349_v3  ;;  %v5032_v22 = vmul.f32 %v3779_v50, %v4940_v59  ;;  %v5035_v3 = vand.u32 127, %v807_v51  ;;  %v5048_v51 = vmul.f32 %v3780_v11, %v4892_v37 }
 0x2aa   :  { %6807 = vst [vmem:[#allocation46_spill] sm:$0xff] %v5032_v22  ;;  %6808 = vst [vmem:[#allocation47_spill] sm:$0xff] %v5035_v3  ;;  %v1651_v56 = vadd.s32 4294967288, %v5035_v3  ;;  %v5064_v37 = vsub.s32 %v5035_v3, %v4677_v55 }
 0x2ab   :  { %6809 = vst [vmem:[#allocation48_spill] sm:$0xff] %v5048_v51 }
 0x2ac   :  { %1377 = vmax.xlane.f32.xlu0 %v1376_v7  ;;  %1062 = vadd.xlane.f32.xlu1 %v1061_v46  ;;  %v1106_v7 = vsel %vm6685_vm0, %v5032_v22, 0.0  ;;  %v1424_v46 = vsel %vm6685_vm0, %v4964_v23, -inf }
 0x2b0   :  { %1044 = vadd.xlane.f32.xlu0 %v1043_v49  ;;  %1101 = vadd.xlane.f32.xlu1 %v1100_v27  ;;  %v1358_v49 = vsel %vm6685_vm0, %v4972_v17, -inf  ;;  %v5053_v27 = vsub.s32 %v1651_v56, %v4677_v55  ;;  %v1049_v56 = vsel %vm6685_vm0, %v5048_v51, 0.0 }
 0x2b4   :  { %1380 = vmax.xlane.f32.xlu0 %v1379_v14  ;;  %1374 = vmax.xlane.f32.xlu1 %v1373_v16  ;;  %v3781_v14 = vld [vmem:[%s6529_s0 + $0xa8] sm:$0xff]  ;;  %v1658_v16 = vadd.s32 4294967280, %v5035_v3 }
 0x2b5   :  { %v5059_v58 = vmul.f32 %v3781_v14, %v4886_v29 }
 0x2b6   :  { %v5075_v14 = vsub.s32 %v1658_v16, %v4677_v55  ;;  %v1385_v16 = vsel %vm6685_vm0, %v5022_v41, -inf }
 0x2b7   :  { %6810 = vst [vmem:[#allocation49_spill] sm:$0xff] %v5059_v58 }
 0x2b8   :  { %1047 = vadd.xlane.f32.xlu0 %v1046_v63  ;;  %1065 = vadd.xlane.f32.xlu1 %v1064_v36  ;;  %v1665_v63 = vadd.s32 4294967272, %v5035_v3 }
 0x2bc   :  { %1362 = vmax.xlane.f32.xlu0 %v1361_v43  ;;  %1107 = vadd.xlane.f32.xlu1 %v1106_v7  ;;  %v2146_v43 = vadd.s32 4294967224, %v5035_v3 }
 0x2be   :  { %v5090_v40 = vsub.s32 %v2146_v43, %v4677_v55 }
 0x2c0   :  { %1425 = vmax.xlane.f32.xlu0 %v1424_v46  ;;  %1359 = vmax.xlane.f32.xlu1 %v1358_v49  ;;  %v2141_v46 = vadd.s32 4294967232, %v5035_v3  ;;  %v1067_v49 = vsel %vm6685_vm0, %v5059_v58, 0.0 }
 0x2c1   :  { %v1201_v31 = vpop.xlane.xlu0 %1200  ;;  %v1198_v50 = vpop.xlane.xlu1 %1197 }
 0x2c2   :  { %v1310_v36 = vmul.f32 0.03125, %v1201_v31  ;;  %v1309_v7 = vmul.f32 0.03125, %v1198_v50  ;;  %v3782_v31 = vld [vmem:[%s6529_s0 + $0x118] sm:$0xff]  ;;  %v5094_v38 = vsub.s32 %v2141_v46, %v4677_v55 }
 0x2c3   :  { %v5081_v50 = vmul.f32 %v3782_v31, %v4940_v59 }
 0x2c4   :  { %v1980_v11 = vrot.slane %v1310_v36, %v5053_v27  ;;  %1050 = vadd.xlane.f32.xlu0 %v1049_v56  ;;  %v1976_v12 = vrot.slane %v1309_v7, %v5064_v37  ;;  %1068 = vadd.xlane.f32.xlu1 %v1067_v49  ;;  %v5085_v36 = vsub.s32 %v1665_v63, %v4677_v55  ;;  %v2153_v7 = vadd.s32 4294967216, %v5035_v3 }
 0x2c5   :  { %6811 = vst [vmem:[#allocation50_spill] sm:$0xff] %v5081_v50  ;;  %v1204_v21 = vpop.xlane.xlu0 %1203  ;;  %v1207_v6 = vpop.xlane.xlu1 %1206  ;;  %v1672_v49 = vadd.s32 4294967264, %v5035_v3 }
 0x2c6   :  { %v1311_v56 = vmul.f32 0.03125, %v1204_v21  ;;  %v1981_v30 = vsel %vm1656_vm12, %v1980_v11, %v1976_v12  ;;  %v1312_v31 = vmul.f32 0.03125, %v1207_v6  ;;  %v1109_v21 = vsel %vm6685_vm0, %v5081_v50, 0.0 }
 0x2c7   :  { %v5109_v28 = vsub.s32 %v2153_v7, %v4677_v55 }
 0x2c8   :  { %v1985_v63 = vrot.slane %v1311_v56, %v5075_v14  ;;  %1386 = vmax.xlane.f32.xlu0 %v1385_v16  ;;  %v1990_v43 = vrot.slane %v1312_v31, %v5085_v36  ;;  %1110 = vadd.xlane.f32.xlu1 %v1109_v21  ;;  %v1427_v16 = vsel %vm6685_vm0, %v5032_v22, -inf  ;;  %v1382_v31 = vsel %vm6685_vm0, %v4986_v35, -inf }
 0x2c9   :  { %v1522_v41 = vpop.xlane.xlu0 %1521  ;;  %v1519_v46 = vpop.xlane.xlu1 %1518 }
 0x2ca   :  { %v1986_v12 = vsel %vm1663_vm13, %v1985_v63, %v1981_v30  ;;  %v2475_v6 = vrot.slane %v1522_v41, %v5090_v40  ;;  %v2471_v56 = vrot.slane %v1519_v46, %v5094_v38  ;;  %v5114_v30 = vsub.s32 %v1672_v49, %v4677_v55  ;;  %v3783_v49 = vld [vmem:[%s6529_s0 + $0x130] sm:$0xff] }
 0x2cb   :  { %v1991_v11 = vsel %vm1670_vm14, %v1990_v43, %v1986_v12  ;;  %v1686_v41 = vadd.s32 4294967248, %v5035_v3  ;;  %v1679_v43 = vadd.s32 4294967256, %v5035_v3  ;;  %v5126_v22 = vmul.f32 %v3783_v49, %v4940_v59 }
 0x2cc   :  { %1428 = vmax.xlane.f32.xlu0 %v1427_v16  ;;  %v2476_v63 = vsel %vm2151_vm15, %v2475_v6, %v2471_v56  ;;  %1383 = vmax.xlane.f32.xlu1 %v1382_v31  ;;  %v1367_v16 = vsel %vm6685_vm0, %v5014_v25, -inf  ;;  %v2160_v6 = vadd.s32 4294967208, %v5035_v3  ;;  %v1421_v31 = vsel %vm6685_vm0, %v5002_v52, -inf }
 0x2cd   :  { %v1210_v21 = vpop.xlane.xlu0 %1209  ;;  %v1525_v7 = vpop.xlane.xlu1 %1524  ;;  %6812 = vst [vmem:[#allocation51_spill] sm:$0xff] %v5126_v22  ;;  %v1118_v53 = vsel %vm6685_vm0, %v5126_v22, 0.0 }
 0x2ce   :  { %v1313_v12 = vmul.f32 0.03125, %v1210_v21  ;;  %v2480_v46 = vrot.slane %v1525_v7, %v5109_v28  ;;  %v5133_v21 = vsub.s32 %v1686_v41, %v4677_v55  ;;  %v3784_v7 = vld [vmem:[%s6529_s0 + $0xb0] sm:$0xff] }
 0x2cf   :  { %v5139_v25 = vmul.f32 %v3784_v7, %v4886_v29  ;;  %v5151_v7 = vsub.s32 %v2160_v6, %v4677_v55 }
 0x2d0   :  { %v1995_v56 = vrot.slane %v1313_v12, %v5114_v30  ;;  %1368 = vmax.xlane.f32.xlu0 %v1367_v16  ;;  %v2481_v49 = vsel %vm2158_vm9, %v2480_v46, %v2476_v63  ;;  %1422 = vmax.xlane.f32.xlu1 %v1421_v31  ;;  %v5143_v12 = vsub.s32 %v1679_v43, %v4677_v55  ;;  %v2167_v63 = vadd.s32 4294967200, %v5035_v3 }
 0x2d1   :  { %6813 = vst [vmem:[#allocation52_spill] sm:$0xff] %v5139_v25  ;;  %v1216_v35 = vpop.xlane.xlu0 %1215  ;;  %v850_v16 = vcombine.high %v4697_v62, %v4697_v62  ;;  %v1213_v52 = vpop.xlane.xlu1 %1212  ;;  %v1070_v62 = vsel %vm6685_vm0, %v5139_v25, 0.0  ;;  %v1391_v31 = vsel %vm6685_vm0, %v5139_v25, -inf }
 0x2d2   :  { %v1996_v41 = vsel %vm1677_vm1, %v1995_v56, %v1991_v11  ;;  %v1315_v17 = vmul.f32 0.03125, %v1216_v35  ;;  %v1314_v23 = vmul.f32 0.03125, %v1213_v52  ;;  %v3785_v35 = vld [vmem:[%s6529_s0 + $0x120] sm:$0xff] }
 0x2d3   :  { %v5161_v52 = vmul.f32 %v3785_v35, %v4940_v59  ;;  %v5174_v35 = vsub.s32 %v2167_v63, %v4677_v55 }
 0x2d4   :  { %v2005_v46 = vrot.slane %v1315_v17, %v5133_v21  ;;  %1119 = vadd.xlane.f32.xlu0 %v1118_v53  ;;  %v2000_v11 = vrot.slane %v1314_v23, %v5143_v12  ;;  %1071 = vadd.xlane.f32.xlu1 %v1070_v62  ;;  %v5167_v17 = vrot.slane %v850_v16, %v4686_v39 }
 0x2d5   :  { %6814 = vst [vmem:[#allocation53_spill] sm:$0xff] %v5161_v52  ;;  %v5164_v43 = vpop.xlane.xlu0 %1536  ;;  %v1528_v53 = vpop.xlane.xlu1 %1527  ;;  %v1112_v23 = vsel %vm6685_vm0, %v5161_v52, 0.0  ;;  %v1433_v63 = vsel %vm6685_vm0, %v5161_v52, -inf }
 0x2d6   :  { %v2001_v6 = vsel %vm6675_vm10, %v2000_v11, %v1996_v41  ;;  %v2485_v56 = vrot.slane %v1528_v53, %v5151_v7  ;;  %v1693_v41 = vadd.s32 4294967240, %v5035_v3  ;;  %v2181_v11 = vadd.s32 4294967184, %v5035_v3 }
 0x2d7   :  { %v2006_v62 = vsel %vm1691_vm11, %v2005_v46, %v2001_v6 }
 0x2d8   :  { %1392 = vmax.xlane.f32.xlu0 %v1391_v31  ;;  %v2486_v16 = vsel %vm2165_vm8, %v2485_v56, %v2481_v49  ;;  %1113 = vadd.xlane.f32.xlu1 %v1112_v23  ;;  %v3786_v31 = vld [vmem:[%s6529_s0 + $0xc8] sm:$0xff]  ;;  %v2174_v49 = vadd.s32 4294967192, %v5035_v3  ;;  %v1364_v56 = vsel %vm6685_vm0, %v4994_v10, -inf  ;;  %v3787_v23 = vld [vmem:[%s6529_s0 + $0xb8] sm:$0xff] }
 0x2d9   :  { %v1006_v47 = vpop.xlane.xlu0 %1005  ;;  %v1531_v53 = vpop.xlane.xlu1 %1530  ;;  %v5189_v46 = vmul.f32 %v3786_v31, %v5167_v17  ;;  %v5202_v31 = vsub.s32 %v1693_v41, %v4677_v55 }
 0x2da   :  { %v2490_v25 = vrot.slane %v1531_v53, %v5174_v35  ;;  %v1245_v6 = vmul.f32 0.03125, %v1006_v47  ;;  %v5198_v53 = vmul.f32 %v3787_v23, %v4886_v29  ;;  %v5205_v47 = vsub.s32 %v2181_v11, %v4677_v55 }
 0x2db   :  { %6815 = vst [vmem:[#allocation54_spill] sm:$0xff] %v5189_v46  ;;  %6817 = vst [vmem:[#allocation56_spill] sm:$0xff] %v5202_v31  ;;  %v1079_v26 = vsel %vm6685_vm0, %v5189_v46, 0.0  ;;  %v5210_v29 = vsub.s32 %v2174_v49, %v4677_v55  ;;  %v3789_v49 = vld [vmem:[%s6529_s0 + $0x128] sm:$0xff]  ;;  %v5230_v23 = vrot.slane %v4706_v45, %v4686_v39 }
 0x2dc   :  { %1434 = vmax.xlane.f32.xlu0 %v1433_v63  ;;  %6816 = vst [vmem:[#allocation55_spill] sm:$0xff] %v5198_v53  ;;  %v2491_v52 = vsel %vm2172_vm7, %v2490_v25, %v2486_v16  ;;  %1365 = vmax.xlane.f32.xlu1 %v1364_v56  ;;  %v3788_v25 = vld [vmem:[%s6529_s0 + $0xd0] sm:$0xff]  ;;  %v1650_v41 = vrot.slane %v1245_v6, %v5064_v37 }
 0x2dd   :  { %v1009_v34 = vpop.xlane.xlu0 %1008  ;;  %v1219_v63 = vpop.xlane.xlu1 %1218  ;;  %v5216_v16 = vmul.f32 %v3788_v25, %v5167_v17  ;;  %v5226_v56 = vmul.f32 %v3789_v49, %v4940_v59  ;;  %v5238_v49 = vmul.f32 %v3790_v0, %v5167_v17 }
 0x2de   :  { %v1246_v10 = vmul.f32 0.03125, %v1009_v34  ;;  %v1316_v4 = vmul.f32 0.03125, %v1219_v63  ;;  %v1073_v34 = vsel %vm6685_vm0, %v5198_v53, 0.0 }
 0x2df   :  { %6818 = vst [vmem:[#allocation57_spill] sm:$0xff] %v5216_v16  ;;  %6819 = vst [vmem:[#allocation58_spill] sm:$0xff] %v5226_v56 }
 0x2e0   :  { %v1655_v11 = vrot.slane %v1246_v10, %v5053_v27  ;;  %1080 = vadd.xlane.f32.xlu0 %v1079_v26  ;;  %v2010_v63 = vrot.slane %v1316_v4, %v5202_v31  ;;  %1074 = vadd.xlane.f32.xlu1 %v1073_v34  ;;  %6820 = vst [vmem:[#allocation59_spill] sm:$0xff] %v5238_v49  ;;  %v1082_v4 = vsel %vm6685_vm0, %v5216_v16, 0.0  ;;  %v1115_v34 = vsel %vm6685_vm0, %v5226_v56, 0.0 }
 0x2e1   :  { %v1012_v6 = vpop.xlane.xlu0 %1011  ;;  %v1534_v10 = vpop.xlane.xlu1 %1533 }
 0x2e2   :  { %v1657_v26 = vsel %vm1656_vm12, %v1655_v11, %v1650_v41  ;;  %v1247_v25 = vmul.f32 0.03125, %v1012_v6  ;;  %v5241_v32 = vsel %vm1698_vm6, %v2010_v63, %v2006_v62  ;;  %v2495_v20 = vrot.slane %v1534_v10, %v5210_v29 }
 0x2e3   :  { %v2500_v41 = vrot.slane %v5164_v43, %v5205_v47  ;;  %v1085_v43 = vsel %vm6685_vm0, %v5238_v49, 0.0 }
 0x2e4   :  { %v1662_v11 = vrot.slane %v1247_v25, %v5075_v14  ;;  %1083 = vadd.xlane.f32.xlu0 %v1082_v4  ;;  %v2496_v0 = vsel %vm2179_vm5, %v2495_v20, %v2491_v52  ;;  %1116 = vadd.xlane.f32.xlu1 %v1115_v34  ;;  %v3791_v25 = vld [vmem:[%s6529_s0 + $0x140] sm:$0xff]  ;;  %v1388_v52 = vsel %vm6685_vm0, %v5059_v58, -inf }
 0x2e5   :  { %v1015_v62 = vpop.xlane.xlu0 %1014  ;;  %v1327_v6 = vpop.xlane.xlu1 %1326  ;;  %v5254_v61 = vsel %vm2186_vm4, %v2500_v41, %v2496_v0  ;;  %v5262_v4 = vmul.f32 %v3791_v25, %v5230_v23 }
 0x2e6   :  { %v1664_v63 = vsel %vm1663_vm13, %v1662_v11, %v1657_v26  ;;  %v1248_v10 = vmul.f32 0.03125, %v1015_v62  ;;  %6821 = vst [vmem:[#allocation60_spill] sm:$0xff] %v5254_v61  ;;  %v2145_v41 = vrot.slane %v1327_v6, %v5094_v38 }
 0x2e7   :  { %6822 = vst [vmem:[#allocation61_spill] sm:$0xff] %v5262_v4  ;;  %v1124_v25 = vsel %vm6685_vm0, %v5262_v4, 0.0 }
 0x2e8   :  { %v1669_v20 = vrot.slane %v1248_v10, %v5085_v36  ;;  %1086 = vadd.xlane.f32.xlu0 %v1085_v43  ;;  %1389 = vmax.xlane.f32.xlu1 %v1388_v52  ;;  %v1430_v10 = vsel %vm6685_vm0, %v5081_v50, -inf }
 0x2e9   :  { %v1330_v26 = vpop.xlane.xlu0 %1329  ;;  %v1018_v34 = vpop.xlane.xlu1 %1017 }
 0x2ea   :  { %v1671_v11 = vsel %vm1670_vm14, %v1669_v20, %v1664_v63  ;;  %v2150_v0 = vrot.slane %v1330_v26, %v5090_v40  ;;  %v1249_v62 = vmul.f32 0.03125, %v1018_v34  ;;  %v849_v63 = vcombine.high %v4694_v9, %v4694_v9 }
 0x2eb   :  { %v1370_v9 = vsel %vm6685_vm0, %v5048_v51, -inf  ;;  %v3794_v51 = vld [vmem:[%s6529_s0 + $0x150] sm:$0xff] }
 0x2ec   :  { %v2152_v1 = vsel %vm2151_vm15, %v2150_v0, %v2145_v41  ;;  %1125 = vadd.xlane.f32.xlu0 %v1124_v25  ;;  %v1676_v43 = vrot.slane %v1249_v62, %v5114_v30  ;;  %1431 = vmax.xlane.f32.xlu1 %v1430_v10  ;;  %v1400_v41 = vsel %vm6685_vm0, %v5189_v46, -inf  ;;  %v3792_v0 = vld [vmem:[%s6529_s0 + $0xe0] sm:$0xff] }
 0x2ed   :  { %v1336_v52 = vpop.xlane.xlu0 %1335  ;;  %v1333_v6 = vpop.xlane.xlu1 %1332  ;;  %v5287_v62 = vmul.f32 %v3792_v0, %v5167_v17  ;;  %v5300_v0 = vrot.slane %v849_v63, %v4686_v39 }
 0x2ee   :  { %v2164_v20 = vrot.slane %v1336_v52, %v5151_v7  ;;  %v1678_v26 = vsel %vm1677_vm1, %v1676_v43, %v1671_v11  ;;  %v2157_v34 = vrot.slane %v1333_v6, %v5109_v28  ;;  %v3793_v11 = vld [vmem:[%s6529_s0 + $0x138] sm:$0xff] }
 0x2ef   :  { %6823 = vst [vmem:[#allocation62_spill] sm:$0xff] %v5287_v62  ;;  %v5295_v25 = vmul.f32 %v3793_v11, %v4940_v59  ;;  %v5308_v59 = vmul.f32 %v3794_v51, %v5230_v23  ;;  %v3795_v51 = vld [vmem:[%s6529_s0 + $0x188] sm:$0xff] }
 0x2f0   :  { %1401 = vmax.xlane.f32.xlu0 %v1400_v41  ;;  %v2159_v10 = vsel %vm2158_vm9, %v2157_v34, %v2152_v1  ;;  %1371 = vmax.xlane.f32.xlu1 %v1370_v9  ;;  %v1088_v41 = vsel %vm6685_vm0, %v5287_v62, 0.0 }
 0x2f1   :  { %6824 = vst [vmem:[#allocation63_spill] sm:$0xff] %v5295_v25  ;;  %v1342_v43 = vpop.xlane.xlu0 %1341  ;;  %v2166_v52 = vsel %vm2165_vm8, %v2164_v20, %v2159_v10  ;;  %v1021_v6 = vpop.xlane.xlu1 %1020  ;;  %6825 = vst [vmem:[#allocation64_spill] sm:$0xff] %v5308_v59  ;;  %v1121_v1 = vsel %vm6685_vm0, %v5295_v25, 0.0  ;;  %v1130_v10 = vsel %vm6685_vm0, %v5308_v59, 0.0 }
 0x2f2   :  { %v1250_v50 = vmul.f32 0.03125, %v1021_v6  ;;  %v5320_v6 = vmul.f32 %v3795_v51, %v5300_v0  ;;  %v2178_v46 = vrot.slane %v1342_v43, %v5210_v29  ;;  %v2188_v51 = vadd.s32 4294967176, %v5035_v3  ;;  %v3796_v43 = vld [vmem:[%s6529_s0 + $0xe8] sm:$0xff] }
 0x2f3   :  { %v5341_v3 = vmul.f32 %v3796_v43, %v5167_v17 }
 0x2f4   :  { %1089 = vadd.xlane.f32.xlu0 %v1088_v41  ;;  %v1683_v20 = vrot.slane %v1250_v50, %v5143_v12  ;;  %1122 = vadd.xlane.f32.xlu1 %v1121_v1  ;;  %6826 = vst [vmem:[#allocation65_spill] sm:$0xff] %v5320_v6  ;;  %v1394_v41 = vsel %vm6685_vm0, %v5198_v53, -inf  ;;  %v1151_v58 = vsel %vm6685_vm0, %v5320_v6, 0.0  ;;  %v1436_v53 = vsel %vm6685_vm0, %v5226_v56, -inf }
 0x2f5   :  { %v1348_v63 = vpop.xlane.xlu0 %1347  ;;  %v1024_v34 = vpop.xlane.xlu1 %1023  ;;  %6827 = vst [vmem:[#allocation66_spill] sm:$0xff] %v5341_v3 }
 0x2f6   :  { %v1685_v9 = vsel %vm6675_vm10, %v1683_v20, %v1678_v26  ;;  %v1251_v11 = vmul.f32 0.03125, %v1024_v34 }
 0x2f8   :  { %1131 = vadd.xlane.f32.xlu0 %v1130_v10  ;;  %v1690_v50 = vrot.slane %v1251_v11, %v5133_v21  ;;  %1395 = vmax.xlane.f32.xlu1 %v1394_v41 }
 0x2f9   :  { %v1225_v1 = vpop.xlane.xlu0 %1224  ;;  %v1339_v26 = vpop.xlane.xlu1 %1338 }
 0x2fa   :  { %v1692_v20 = vsel %vm1691_vm11, %v1690_v50, %v1685_v9  ;;  %v2171_v34 = vrot.slane %v1339_v26, %v5174_v35  ;;  %v1403_v26 = vsel %vm6685_vm0, %v5216_v16, -inf }
 0x2fc   :  { %1152 = vadd.xlane.f32.xlu0 %v1151_v58  ;;  %v2173_v11 = vsel %vm2172_vm7, %v2171_v34, %v2166_v52  ;;  %1437 = vmax.xlane.f32.xlu1 %v1436_v53  ;;  %v5344_v58 = vsub.s32 %v2188_v51, %v4677_v55  ;;  %v1439_v53 = vsel %vm6685_vm0, %v5126_v22, -inf }
 0x2fd   :  { %v1231_v10 = vpop.xlane.xlu0 %1230  ;;  %v1027_v41 = vpop.xlane.xlu1 %1026  ;;  %v2180_v9 = vsel %vm2179_vm5, %v2178_v46, %v2173_v11  ;;  %v3797_v11 = vld [vmem:[%s6529_s0 + $0x158] sm:$0xff] }
 0x2fe   :  { %v1252_v50 = vmul.f32 0.03125, %v1027_v41  ;;  %v5353_v41 = vmul.f32 %v3797_v11, %v5230_v23  ;;  %v3798_v11 = vld [vmem:[%s6529_s0 + $0xc0] sm:$0xff] }
 0x2ff   :  { %v5368_v22 = vmul.f32 %v3798_v11, %v5167_v17 }
 0x300   :  { %1404 = vmax.xlane.f32.xlu0 %v1403_v26  ;;  %v1697_v46 = vrot.slane %v1252_v50, %v5202_v31  ;;  %1440 = vmax.xlane.f32.xlu1 %v1439_v53  ;;  %6828 = vst [vmem:[#allocation67_spill] sm:$0xff] %v5353_v41  ;;  %v1091_v26 = vsel %vm6685_vm0, %v5341_v3, 0.0  ;;  %v2192_v50 = vrot.slane %v1348_v63, %v5344_v58  ;;  %v1442_v53 = vsel %vm6685_vm0, %v5295_v25, -inf  ;;  %v3799_v25 = vld [vmem:[%s6529_s0 + $0x148] sm:$0xff] }
 0x301   :  { %v1546_v52 = vpop.xlane.xlu0 %1545  ;;  %v1345_v34 = vpop.xlane.xlu1 %1344  ;;  %6829 = vst [vmem:[#allocation68_spill] sm:$0xff] %v5368_v22  ;;  %v5380_v11 = vmul.f32 %v3799_v25, %v5230_v23  ;;  %v3800_v25 = vld [vmem:[%s6529_s0 + $0xf0] sm:$0xff] }
 0x302   :  { %v5356_v43 = vsel %vm1698_vm6, %v1697_v46, %v1692_v20  ;;  %v2185_v51 = vrot.slane %v1345_v34, %v5205_v47  ;;  %v1318_v20 = vmul.f32 0.03125, %v1225_v1  ;;  %v1076_v1 = vsel %vm6685_vm0, %v5368_v22, 0.0 }
 0x303   :  { %6830 = vst [vmem:[#allocation69_spill] sm:$0xff] %v5380_v11  ;;  %v1448_v15 = vsel %vm6685_vm0, %v5380_v11, -inf }
 0x304   :  { %1092 = vadd.xlane.f32.xlu0 %v1091_v26  ;;  %v2187_v46 = vsel %vm2186_vm4, %v2185_v51, %v2180_v9  ;;  %1443 = vmax.xlane.f32.xlu1 %v1442_v53  ;;  %v1133_v26 = vsel %vm6685_vm0, %v5353_v41, 0.0  ;;  %v2019_v9 = vrot.slane %v1318_v20, %v5053_v27  ;;  %v1320_v53 = vmul.f32 0.03125, %v1231_v10 }
 0x305   :  { %v1549_v34 = vpop.xlane.xlu0 %1548  ;;  %v5372_v56 = vsel %vm2193_vm3, %v2192_v50, %v2187_v46  ;;  %v1222_v63 = vpop.xlane.xlu1 %1221 }
 0x306   :  { %v1317_v16 = vmul.f32 0.03125, %v1222_v63 }
 0x308   :  { %1134 = vadd.xlane.f32.xlu0 %v1133_v26  ;;  %v2015_v51 = vrot.slane %v1317_v16, %v5064_v37  ;;  %1077 = vadd.xlane.f32.xlu1 %v1076_v1  ;;  %v5393_v26 = vmul.f32 %v3800_v25, %v5167_v17  ;;  %v1127_v16 = vsel %vm6685_vm0, %v5380_v11, 0.0  ;;  %v2029_v1 = vrot.slane %v1320_v53, %v5085_v36 }
 0x309   :  { %v1237_v50 = vpop.xlane.xlu0 %1236  ;;  %v1228_v46 = vpop.xlane.xlu1 %1227  ;;  %v2514_v25 = vrot.slane %v1546_v52, %v5090_v40  ;;  %v1397_v53 = vsel %vm6685_vm0, %v5368_v22, -inf }
 0x30a   :  { %v2020_v63 = vsel %vm1656_vm12, %v2019_v9, %v2015_v51  ;;  %v1319_v57 = vmul.f32 0.03125, %v1228_v46  ;;  %6831 = vst [vmem:[#allocation70_spill] sm:$0xff] %v5393_v26  ;;  %v3801_v51 = vld [vmem:[%s6529_s0 + $0x160] sm:$0xff] }
 0x30b   :  { %v5403_v46 = vmul.f32 %v3801_v51, %v5230_v23  ;;  %v3802_v51 = vld [vmem:[%s6529_s0 + $0x180] sm:$0xff] }
 0x30c   :  { %1449 = vmax.xlane.f32.xlu0 %v1448_v15  ;;  %v2024_v10 = vrot.slane %v1319_v57, %v5075_v14  ;;  %1128 = vadd.xlane.f32.xlu1 %v1127_v16  ;;  %v1094_v57 = vsel %vm6685_vm0, %v5393_v26, 0.0  ;;  %v2519_v16 = vrot.slane %v1549_v34, %v5109_v28  ;;  %v5418_v52 = vmul.f32 %v3802_v51, %v5300_v0 }
 0x30d   :  { %v1552_v20 = vpop.xlane.xlu0 %1551  ;;  %v1543_v9 = vpop.xlane.xlu1 %1542  ;;  %6832 = vst [vmem:[#allocation71_spill] sm:$0xff] %v5403_v46  ;;  %v1322_v34 = vmul.f32 0.03125, %v1237_v50  ;;  %v1136_v33 = vsel %vm6685_vm0, %v5403_v46, 0.0  ;;  %v3803_v50 = vld [vmem:[%s6529_s0 + $0x190] sm:$0xff] }
 0x30e   :  { %v2025_v8 = vsel %vm1663_vm13, %v2024_v10, %v2020_v63  ;;  %v2510_v15 = vrot.slane %v1543_v9, %v5094_v38  ;;  %6833 = vst [vmem:[#allocation72_spill] sm:$0xff] %v5418_v52  ;;  %v2524_v10 = vrot.slane %v1552_v20, %v5151_v7  ;;  %v5434_v20 = vmul.f32 %v3803_v50, %v5300_v0 }
 0x30f   :  { %v2030_v11 = vsel %vm1670_vm14, %v2029_v1, %v2025_v8 }
 0x310   :  { %1095 = vadd.xlane.f32.xlu0 %v1094_v57  ;;  %v2515_v63 = vsel %vm2151_vm15, %v2514_v25, %v2510_v15  ;;  %1398 = vmax.xlane.f32.xlu1 %v1397_v53  ;;  %v1148_v25 = vsel %vm6685_vm0, %v5418_v52, 0.0  ;;  %6834 = vst [vmem:[#allocation73_spill] sm:$0xff] %v5434_v20 }
 0x311   :  { %v1555_v9 = vpop.xlane.xlu0 %1554  ;;  %v2520_v19 = vsel %vm2158_vm9, %v2519_v16, %v2515_v63  ;;  %v1234_v22 = vpop.xlane.xlu1 %1233 }
 0x312   :  { %v2529_v57 = vrot.slane %v1555_v9, %v5174_v35  ;;  %v2525_v8 = vsel %vm2165_vm8, %v2524_v10, %v2520_v19  ;;  %v1321_v1 = vmul.f32 0.03125, %v1234_v22  ;;  %v2039_v22 = vrot.slane %v1322_v34, %v5143_v12 }
 0x314   :  { %v2530_v51 = vsel %vm2172_vm7, %v2529_v57, %v2525_v8  ;;  %1137 = vadd.xlane.f32.xlu0 %v1136_v33  ;;  %v2034_v15 = vrot.slane %v1321_v1, %v5114_v30  ;;  %1149 = vadd.xlane.f32.xlu1 %v1148_v25  ;;  %v1409_v33 = vsel %vm6685_vm0, %v5287_v62, -inf  ;;  %v1154_v8 = vsel %vm6685_vm0, %v5434_v20, 0.0 }
 0x315   :  { %v1243_v19 = vpop.xlane.xlu0 %1242  ;;  %v1240_v16 = vpop.xlane.xlu1 %1239 }
 0x316   :  { %v1324_v53 = vmul.f32 0.03125, %v1243_v19  ;;  %v2035_v63 = vsel %vm1677_vm1, %v2034_v15, %v2030_v11  ;;  %v1323_v10 = vmul.f32 0.03125, %v1240_v16  ;;  %v1451_v19 = vsel %vm6685_vm0, %v5308_v59, -inf }
 0x317   :  { %v2040_v9 = vsel %vm6675_vm10, %v2039_v22, %v2035_v63 }
 0x318   :  { %v2049_v57 = vrot.slane %v1324_v53, %v5202_v31  ;;  %1410 = vmax.xlane.f32.xlu0 %v1409_v33  ;;  %v2044_v1 = vrot.slane %v1323_v10, %v5133_v21  ;;  %1155 = vadd.xlane.f32.xlu1 %v1154_v8  ;;  %v1406_v53 = vsel %vm6685_vm0, %v5238_v49, -inf  ;;  %v1472_v8 = vsel %vm6685_vm0, %v5320_v6, -inf }
 0x319   :  { %v1558_v34 = vpop.xlane.xlu0 %1557  ;;  %v1561_v25 = vpop.xlane.xlu1 %1560  ;;  %v1415_v6 = vsel %vm6685_vm0, %v5393_v26, -inf }
 0x31a   :  { %v2534_v50 = vrot.slane %v1558_v34, %v5210_v29  ;;  %v2045_v11 = vsel %vm1691_vm11, %v2044_v1, %v2040_v9  ;;  %v2539_v15 = vrot.slane %v1561_v25, %v5205_v47  ;;  %v1445_v1 = vsel %vm6685_vm0, %v5262_v4, -inf }
 0x31b   :  { %v2050_v22 = vsel %vm1698_vm6, %v2049_v57, %v2045_v11 }
 0x31c   :  { %v2535_v16 = vsel %vm2179_vm5, %v2534_v50, %v2530_v51  ;;  %1452 = vmax.xlane.f32.xlu0 %v1451_v19  ;;  %1407 = vmax.xlane.f32.xlu1 %v1406_v53  ;;  %v5460_v33 = vsel %vm557_vm2, %v2050_v22, %v5241_v32  ;;  %v3804_v51 = vld [vmem:[%s6529_s0 + $0x1a0] sm:$0xff]  ;;  %v3805_v32 = vld [vmem:[%s6529_s0 + $0x198] sm:$0xff] }
 0x31d   :  { %v1054_v63 = vpop.xlane.xlu0 %1053  ;;  %v5456_v10 = vsel %vm2186_vm4, %v2539_v15, %v2535_v16  ;;  %6836 = vst [vmem:[#allocation75_spill] sm:$0xff] %v5460_v33  ;;  %v1030_v9 = vpop.xlane.xlu1 %1029  ;;  %v5468_v57 = vmul.f32 %v3804_v51, %v5300_v0  ;;  %v5476_v34 = vmul.f32 %v3805_v32, %v5300_v0  ;;  %v1475_v32 = vsel %vm6685_vm0, %v5434_v20, -inf }
 0x31e   :  { %6835 = vst [vmem:[#allocation74_spill] sm:$0xff] %v5456_v10  ;;  %v1253_v25 = vmul.f32 0.03125, %v1030_v9 }
 0x31f   :  { %6837 = vst [vmem:[#allocation76_spill] sm:$0xff] %v5468_v57  ;;  %6838 = vst [vmem:[#allocation77_spill] sm:$0xff] %v5476_v34  ;;  %v1160_v19 = vsel %vm6685_vm0, %v5468_v57, 0.0  ;;  %v1157_v22 = vsel %vm6685_vm0, %v5476_v34, 0.0 }
 0x320   :  { %1473 = vmax.xlane.f32.xlu0 %v1472_v8  ;;  %1446 = vmax.xlane.f32.xlu1 %v1445_v1  ;;  %v1703_v16 = vrot.slane %v1253_v25, %v5064_v37  ;;  %v1469_v25 = vsel %vm6685_vm0, %v5418_v52, -inf }
 0x321   :  { %v1060_v50 = vpop.xlane.xlu0 %1059  ;;  %v1033_v11 = vpop.xlane.xlu1 %1032 }
 0x322   :  { %v1254_v15 = vmul.f32 0.03125, %v1033_v11  ;;  %v3806_v11 = vld [vmem:[%s6529_s0 + $0x170] sm:$0xff] }
 0x323   :  { %v5491_v62 = vmul.f32 %v3806_v11, %v5230_v23 }
 0x324   :  { %1161 = vadd.xlane.f32.xlu0 %v1160_v19  ;;  %v1707_v53 = vrot.slane %v1254_v15, %v5053_v27  ;;  %1158 = vadd.xlane.f32.xlu1 %v1157_v22  ;;  %v3807_v15 = vld [vmem:[%s6529_s0 + $0xf8] sm:$0xff]  ;;  %v1261_v22 = vmul.f32 0.03125, %v1054_v63 }
 0x325   :  { %v1354_v8 = vpop.xlane.xlu0 %1353  ;;  %v1036_v51 = vpop.xlane.xlu1 %1035  ;;  %6839 = vst [vmem:[#allocation78_spill] sm:$0xff] %v5491_v62  ;;  %v5499_v19 = vmul.f32 %v3807_v15, %v5167_v17  ;;  %v3808_v17 = vld [vmem:[%s6529_s0 + $0x168] sm:$0xff] }
 0x326   :  { %v1708_v9 = vsel %vm1656_vm12, %v1707_v53, %v1703_v16  ;;  %v1255_v1 = vmul.f32 0.03125, %v1036_v51  ;;  %v1263_v51 = vmul.f32 0.03125, %v1060_v50  ;;  %v5511_v63 = vmul.f32 %v3808_v17, %v5230_v23 }
 0x327   :  { %6840 = vst [vmem:[#allocation79_spill] sm:$0xff] %v5499_v19  ;;  %v1097_v49 = vsel %vm6685_vm0, %v5499_v19, 0.0  ;;  %v1742_v50 = vrot.slane %v1261_v22, %v5064_v37 }
 0x328   :  { %1476 = vmax.xlane.f32.xlu0 %v1475_v32  ;;  %v1712_v16 = vrot.slane %v1255_v1, %v5075_v14  ;;  %1470 = vmax.xlane.f32.xlu1 %v1469_v25  ;;  %v1142_v32 = vsel %vm6685_vm0, %v5491_v62, 0.0  ;;  %6841 = vst [vmem:[#allocation80_spill] sm:$0xff] %v5511_v63  ;;  %v1139_v17 = vsel %vm6685_vm0, %v5511_v63, 0.0 }
 0x329   :  { %v1042_v53 = vpop.xlane.xlu0 %1041  ;;  %v1057_v20 = vpop.xlane.xlu1 %1056 }
 0x32a   :  { %v1713_v11 = vsel %vm1663_vm13, %v1712_v16, %v1708_v9  ;;  %v1262_v59 = vmul.f32 0.03125, %v1057_v20  ;;  %v1751_v9 = vrot.slane %v1263_v51, %v5075_v14  ;;  %v1257_v25 = vmul.f32 0.03125, %v1042_v53 }
 0x32c   :  { %1143 = vadd.xlane.f32.xlu0 %v1142_v32  ;;  %v1746_v1 = vrot.slane %v1262_v59, %v5053_v27  ;;  %1098 = vadd.xlane.f32.xlu1 %v1097_v49  ;;  %v1722_v51 = vrot.slane %v1257_v25, %v5114_v30  ;;  %v1412_v25 = vsel %vm6685_vm0, %v5341_v3, -inf }
 0x32d   :  { %v1105_v20 = vpop.xlane.xlu0 %1104  ;;  %v1039_v15 = vpop.xlane.xlu1 %1038 }
 0x32e   :  { %v1747_v16 = vsel %vm1656_vm12, %v1746_v1, %v1742_v50  ;;  %v1256_v32 = vmul.f32 0.03125, %v1039_v15  ;;  %v1457_v50 = vsel %vm6685_vm0, %v5403_v46, -inf  ;;  %v2202_v1 = vrot.slane %v1354_v8, %v5090_v40  ;;  %v3815_v46 = vld [vmem:[%s6529_s0 + $0x1c8] sm:$0xff] }
 0x32f   :  { %v1752_v22 = vsel %vm1663_vm13, %v1751_v9, %v1747_v16  ;;  %v3809_v9 = vld [vmem:[%s6529_s0 + $0x1b0] sm:$0xff] }
 0x330   :  { %1416 = vmax.xlane.f32.xlu0 %v1415_v6  ;;  %v1717_v59 = vrot.slane %v1256_v32, %v5085_v36  ;;  %1140 = vadd.xlane.f32.xlu1 %v1139_v17  ;;  %v5534_v16 = vmul.f32 %v3809_v9, %v5300_v0  ;;  %v1454_v9 = vsel %vm6685_vm0, %v5353_v41, -inf }
 0x331   :  { %v1357_v49 = vpop.xlane.xlu0 %1356  ;;  %v1351_v53 = vpop.xlane.xlu1 %1350 }
 0x332   :  { %v2207_v52 = vrot.slane %v1357_v49, %v5109_v28  ;;  %v1718_v15 = vsel %vm1670_vm14, %v1717_v59, %v1713_v11  ;;  %v2198_v6 = vrot.slane %v1351_v53, %v5094_v38  ;;  %6842 = vst [vmem:[#allocation81_spill] sm:$0xff] %v5534_v16  ;;  %v1166_v53 = vsel %vm6685_vm0, %v5534_v16, 0.0 }
 0x333   :  { %v1723_v32 = vsel %vm1677_vm1, %v1722_v51, %v1718_v15  ;;  %v3810_v51 = vld [vmem:[%s6529_s0 + $0x1a8] sm:$0xff] }
 0x334   :  { %1458 = vmax.xlane.f32.xlu0 %v1457_v50  ;;  %v2203_v17 = vsel %vm2151_vm15, %v2202_v1, %v2198_v6  ;;  %1413 = vmax.xlane.f32.xlu1 %v1412_v25  ;;  %v5553_v50 = vmul.f32 %v3810_v51, %v5300_v0  ;;  %v1278_v1 = vmul.f32 0.03125, %v1105_v20 }
 0x335   :  { %v5540_v8 = vpop.xlane.xlu0 %1377  ;;  %v5543_v11 = vsel %vm2158_vm9, %v2207_v52, %v2203_v17  ;;  %v1063_v59 = vpop.xlane.xlu1 %1062 }
 0x336   :  { %v1264_v49 = vmul.f32 0.03125, %v1063_v59  ;;  %6843 = vst [vmem:[#allocation82_spill] sm:$0xff] %v5553_v50  ;;  %v1163_v51 = vsel %vm6685_vm0, %v5553_v50, 0.0  ;;  %v1824_v20 = vrot.slane %v1278_v1, %v5053_v27  ;;  %v1478_v1 = vsel %vm6685_vm0, %v5476_v34, -inf }
 0x338   :  { %1167 = vadd.xlane.f32.xlu0 %v1166_v53  ;;  %v1756_v52 = vrot.slane %v1264_v49, %v5085_v36  ;;  %1455 = vmax.xlane.f32.xlu1 %v1454_v9  ;;  %v1418_v53 = vsel %vm6685_vm0, %v5499_v19, -inf }
 0x339   :  { %v1045_v15 = vpop.xlane.xlu0 %1044  ;;  %v1102_v25 = vpop.xlane.xlu1 %1101 }
 0x33a   :  { %v1258_v6 = vmul.f32 0.03125, %v1045_v15  ;;  %v5557_v17 = vsel %vm1670_vm14, %v1756_v52, %v1752_v22  ;;  %v1277_v59 = vmul.f32 0.03125, %v1102_v25  ;;  %v851_v15 = vcombine.high %v4706_v45, %v4706_v45 }
 0x33b   :  { %v1460_v25 = vsel %vm6685_vm0, %v5511_v63, -inf }
 0x33c   :  { %v1727_v26 = vrot.slane %v1258_v6, %v5143_v12  ;;  %1419 = vmax.xlane.f32.xlu0 %v1418_v53  ;;  %v1820_v49 = vrot.slane %v1277_v59, %v5064_v37  ;;  %1164 = vadd.xlane.f32.xlu1 %v1163_v51  ;;  %v3811_v59 = vld [vmem:[%s6529_s0 + $0x178] sm:$0xff]  ;;  %v5589_v53 = vrot.slane %v851_v15, %v4686_v39  ;;  %v1463_v51 = vsel %vm6685_vm0, %v5491_v62, -inf  ;;  %v3812_v15 = vld [vmem:[%s6529_s0 + $0x1c0] sm:$0xff] }
 0x33d   :  { %v5566_v9 = vpop.xlane.xlu0 %1380  ;;  %v5569_v52 = vpop.xlane.xlu1 %1374 }
 0x33e   :  { %v1728_v22 = vsel %vm6675_vm10, %v1727_v26, %v1723_v32  ;;  %v5574_v6 = vsel %vm1656_vm12, %v1824_v20, %v1820_v49  ;;  %v5584_v26 = vmul.f32 %v3811_v59, %v5230_v23  ;;  %v1481_v59 = vsel %vm6685_vm0, %v5468_v57, -inf }
 0x33f   :  { %v5729_v5 = vmul.f32 %v3820_v44, %v5589_v53  ;;  %v2571_v44 = vld [vmem:[%s6533_s4 + $0x60] sm:$0xff] }
 0x340   :  { %1461 = vmax.xlane.f32.xlu0 %v1460_v25  ;;  %6844 = vst [vmem:[#allocation83_spill] sm:$0xff] %v5584_v26  ;;  %1479 = vmax.xlane.f32.xlu1 %v1478_v1  ;;  %v1145_v20 = vsel %vm6685_vm0, %v5584_v26, 0.0  ;;  %v1466_v23 = vsel %vm6685_vm0, %v5584_v26, -inf  ;;  %v5605_v1 = vmul.f32 %v3812_v15, %v5589_v53 }
 0x341   :  { %v1048_v32 = vpop.xlane.xlu0 %1047  ;;  %v5586_v45 = vpop.xlane.xlu1 %1065  ;;  %6853 = vst [vmem:[#allocation92_spill] sm:$0xff] %v5729_v5 }
 0x342   :  { %6845 = vst [vmem:[#allocation84_spill] sm:$0xff] %v5605_v1  ;;  %v1259_v19 = vmul.f32 0.03125, %v1048_v32  ;;  %v1172_v15 = vsel %vm6685_vm0, %v5605_v1, 0.0  ;;  %v1265_v42 = vmul.f32 0.03125, %v5586_v45  ;;  %v1493_v54 = vsel %vm6685_vm0, %v5605_v1, -inf  ;;  %v2573_v45 = vld [vmem:[%s6533_s4 + $0x70] sm:$0xff] }
 0x343   :  { %3673 = vmatprep.subr.mxu1 %v2573_v45 }
 0x344   :  { %1464 = vmax.xlane.f32.xlu0 %v1463_v51  ;;  %1146 = vadd.xlane.f32.xlu1 %v1145_v20  ;;  %v3813_v51 = vld [vmem:[%s6529_s0 + $0x1b8] sm:$0xff]  ;;  %v1732_v32 = vrot.slane %v1259_v19, %v5133_v21 }
 0x345   :  { %v5595_v49 = vpop.xlane.xlu0 %1362  ;;  %v5597_v25 = vpop.xlane.xlu1 %1107  ;;  %v5613_v20 = vmul.f32 %v3813_v51, %v5300_v0  ;;  %3674 = vmatpush3.msra.mxu1 %v2573_v45 }
 0x346   :  { %v1733_v19 = vsel %vm1691_vm11, %v1732_v32, %v1728_v22  ;;  %v1487_v32 = vsel %vm6685_vm0, %v5534_v16, -inf  ;;  %3675 = vmatprep.subr.mxu1 %v2572_v13  ;;  %v1279_v10 = vmul.f32 0.03125, %v5597_v25 }
 0x347   :  { %6846 = vst [vmem:[#allocation85_spill] sm:$0xff] %v5613_v20  ;;  %v1169_v0 = vsel %vm6685_vm0, %v5613_v20, 0.0  ;;  %3676 = vmatpush3.msra.mxu1 %v2572_v13 }
 0x348   :  { %1467 = vmax.xlane.f32.xlu0 %v1466_v23  ;;  %1482 = vmax.xlane.f32.xlu1 %v1481_v59  ;;  %v3814_v23 = vld [vmem:[%s6529_s0 + $0x1d0] sm:$0xff]  ;;  %v1829_v25 = vrot.slane %v1279_v10, %v5075_v14 }
 0x349   :  { %v5615_v26 = vpop.xlane.xlu0 %1425  ;;  %v5617_v62 = vpop.xlane.xlu1 %1359  ;;  %v5625_v63 = vmul.f32 %v3814_v23, %v5589_v53  ;;  %v5636_v23 = vmul.f32 %v3815_v46, %v5589_v53  ;;  %3677 = vmatprep.subr.mxu1 %v2571_v44 }
 0x34a   :  { %3678 = vmatpush3.msra.mxu1 %v2571_v44 }
 0x34b   :  { %6847 = vst [vmem:[#allocation86_spill] sm:$0xff] %v5625_v63  ;;  %v1178_v3 = vsel %vm6685_vm0, %v5625_v63, 0.0  ;;  %6848 = vst [vmem:[#allocation87_spill] sm:$0xff] %v5636_v23  ;;  %v1496_v46 = vsel %vm6685_vm0, %v5636_v23, -inf  ;;  %v1175_v16 = vsel %vm6685_vm0, %v5636_v23, 0.0 }
 0x34c   :  { %1173 = vadd.xlane.f32.xlu0 %v1172_v15  ;;  %1170 = vadd.xlane.f32.xlu1 %v1169_v0  ;;  %v1484_v15 = vsel %vm6685_vm0, %v5553_v50, -inf  ;;  %v3818_v50 = vld [vmem:[%s6529_s0 + $0x1f0] sm:$0xff] }
 0x34d   :  { %v1051_v59 = vpop.xlane.xlu0 %1050  ;;  %v1069_v57 = vpop.xlane.xlu1 %1068 }
 0x34e   :  { %v1260_v51 = vmul.f32 0.03125, %v1051_v59 }
 0x350   :  { %v1737_v34 = vrot.slane %v1260_v51, %v5202_v31  ;;  %1179 = vadd.xlane.f32.xlu0 %v1178_v3  ;;  %1485 = vmax.xlane.f32.xlu1 %v1484_v15  ;;  %v3816_v3 = vld [vmem:[%s6529_s0 + $0x1e0] sm:$0xff]  ;;  %v1490_v15 = vsel %vm6685_vm0, %v5613_v20, -inf }
 0x351   :  { %v5642_v0 = vpop.xlane.xlu0 %1386  ;;  %v5645_v41 = vpop.xlane.xlu1 %1110  ;;  %v5657_v22 = vmul.f32 %v3816_v3, %v5589_v53  ;;  %v3817_v3 = vld [vmem:[%s6529_s0 + $0x1d8] sm:$0xff] }
 0x352   :  { %v1738_v59 = vsel %vm1698_vm6, %v1737_v34, %v1733_v19 }
 0x353   :  { %v5649_v4 = vsel %vm557_vm2, %v1738_v59, %v5356_v43  ;;  %6849 = vst [vmem:[#allocation88_spill] sm:$0xff] %v5657_v22  ;;  %v1184_v43 = vsel %vm6685_vm0, %v5657_v22, 0.0 }
 0x354   :  { %1497 = vmax.xlane.f32.xlu0 %v1496_v46  ;;  %1488 = vmax.xlane.f32.xlu1 %v1487_v32  ;;  %v1499_v46 = vsel %vm6685_vm0, %v5625_v63, -inf  ;;  %v5679_v32 = vmul.f32 %v3817_v3, %v5589_v53  ;;  %v5691_v63 = vmul.f32 %v3818_v50, %v5589_v53  ;;  %v3819_v50 = vld [vmem:[%s6529_s0 + $0x1e8] sm:$0xff] }
 0x355   :  { %v5661_v34 = vpop.xlane.xlu0 %1428  ;;  %v5663_v51 = vpop.xlane.xlu1 %1383 }
 0x356   :  { %6850 = vst [vmem:[#allocation89_spill] sm:$0xff] %v5679_v32  ;;  %v1502_v20 = vsel %vm6685_vm0, %v5679_v32, -inf  ;;  %6851 = vst [vmem:[#allocation90_spill] sm:$0xff] %v5691_v63  ;;  %v1181_v3 = vsel %vm6685_vm0, %v5679_v32, 0.0  ;;  %v1190_v23 = vsel %vm6685_vm0, %v5691_v63, 0.0 }
 0x358   :  { %1185 = vadd.xlane.f32.xlu0 %v1184_v43  ;;  %1491 = vmax.xlane.f32.xlu1 %v1490_v15 }
 0x359   :  { %v5669_v19 = vpop.xlane.xlu0 %1368  ;;  %v5671_v59 = vpop.xlane.xlu1 %1422 }
 0x35c   :  { %1500 = vmax.xlane.f32.xlu0 %v1499_v46  ;;  %1176 = vadd.xlane.f32.xlu1 %v1175_v16 }
 0x35d   :  { %v5683_v43 = vpop.xlane.xlu0 %1119  ;;  %v1072_v15 = vpop.xlane.xlu1 %1071 }
 0x360   :  { %1503 = vmax.xlane.f32.xlu0 %v1502_v20  ;;  %1182 = vadd.xlane.f32.xlu1 %v1181_v3  ;;  %v5708_v20 = vmul.f32 %v3819_v50, %v5589_v53  ;;  %v1266_v3 = vmul.f32 0.03125, %v1069_v57  ;;  %v1505_v50 = vsel %vm6685_vm0, %v5657_v22, -inf }
 0x361   :  { %v5695_v46 = vpop.xlane.xlu0 %1392  ;;  %v5697_v16 = vpop.xlane.xlu1 %1113 }
 0x362   :  { %6852 = vst [vmem:[#allocation91_spill] sm:$0xff] %v5708_v20  ;;  %v1187_v57 = vsel %vm6685_vm0, %v5708_v20, 0.0 }
 0x364   :  { %1191 = vadd.xlane.f32.xlu0 %v1190_v23  ;;  %1494 = vmax.xlane.f32.xlu1 %v1493_v54  ;;  %v1267_v23 = vmul.f32 0.03125, %v1072_v15  ;;  %v1761_v54 = vrot.slane %v1265_v42, %v5114_v30  ;;  %v1766_v15 = vrot.slane %v1266_v3, %v5143_v12  ;;  %v1193_v3 = vsel %vm6685_vm0, %v5729_v5, 0.0 }
 0x365   :  { %v5710_v32 = vpop.xlane.xlu0 %1434  ;;  %v5718_v1 = vpop.xlane.xlu1 %1365 }
 0x366   :  { %v1771_v18 = vrot.slane %v1267_v23, %v5133_v21  ;;  %v1762_v53 = vsel %vm1677_vm1, %v1761_v54, %v5557_v17  ;;  %v1511_v54 = vsel %vm6685_vm0, %v5691_v63, -inf }
 0x367   :  { %v1767_v45 = vsel %vm6675_vm10, %v1766_v15, %v1762_v53  ;;  %v2570_v15 = vld [vmem:[%s6533_s4 + $0x58] sm:$0xff]  ;;  %vm6854_vm10 = vcmask 1042434  }
 0x368   :  { %1506 = vmax.xlane.f32.xlu0 %v1505_v50  ;;  %1188 = vadd.xlane.f32.xlu1 %v1187_v57  ;;  %v1508_v50 = vsel %vm6685_vm0, %v5708_v20, -inf }
 0x369   :  { %v5732_v60 = vpop.xlane.xlu0 %1080  ;;  %v1075_v42 = vpop.xlane.xlu1 %1074  ;;  %3679 = vmatprep.subr.mxu1 %v2570_v15 }
 0x36a   :  { %v1268_v22 = vmul.f32 0.03125, %v1075_v42  ;;  %v1772_v42 = vsel %vm1691_vm11, %v1771_v18, %v1767_v45  ;;  %v1514_v18 = vsel %vm6685_vm0, %v5729_v5, -inf  ;;  %3680 = vmatpush3.msra.mxu1 %v2570_v15  ;;  %v2567_v45 = vld [vmem:[%s6533_s4 + $0x40] sm:$0xff]  ;;  %v2217_v15 = vrot.slane %v5595_v49, %v5174_v35 }
 0x36c   :  { %1509 = vmax.xlane.f32.xlu0 %v1508_v50  ;;  %v1776_v23 = vrot.slane %v1268_v22, %v5202_v31  ;;  %1194 = vadd.xlane.f32.xlu1 %v1193_v3  ;;  %v2569_v22 = vld [vmem:[%s6533_s4 + $0x50] sm:$0xff]  ;;  %v2212_v50 = vrot.slane %v5617_v62, %v5151_v7  ;;  %v2568_v3 = vld [vmem:[%s6533_s4 + $0x48] sm:$0xff]  ;;  %v1562_v62 = vsel %vm6685_vm0, %v4878_v2, -inf }
 0x36d   :  { %v5749_v57 = vpop.xlane.xlu0 %1083  ;;  %v5752_v20 = vpop.xlane.xlu1 %1116  ;;  %3681 = vmatprep.subr.mxu1 %v2569_v22 }
 0x36e   :  { %v1777_v17 = vsel %vm1698_vm6, %v1776_v23, %v1772_v42  ;;  %3682 = vmatpush3.msra.mxu1 %v2569_v22  ;;  %v2237_v23 = vrot.slane %v5569_v52, %v5094_v38  ;;  %v2213_v42 = vsel %vm2165_vm8, %v2212_v50, %v5543_v11  ;;  %v2566_v11 = vld [vmem:[%s6533_s4 + $0x38] sm:$0xff]  ;;  %v2565_v52 = vld [vmem:[%s6533_s4 + $0x30] sm:$0xff]  ;;  %v1271_v39 = vmul.f32 0.03125, %v5749_v57 }
 0x36f   :  { %v5765_v13 = vsel %vm6854_vm10, %v1777_v17, %v5649_v4  ;;  %v1538_v4 = vsel %vm6685_vm0, %v4767_v24, -inf  ;;  %3683 = vmatprep.subr.mxu1 %v2568_v3  ;;  %v2222_v17 = vrot.slane %v5718_v1, %v5210_v29  ;;  %v2246_v1 = vrot.slane %v5566_v9, %v5109_v28 }
 0x370   :  { %1512 = vmax.xlane.f32.xlu0 %v1511_v54  ;;  %1515 = vmax.xlane.f32.xlu1 %v1514_v18  ;;  %v2241_v18 = vrot.slane %v5540_v8, %v5090_v40  ;;  %v2218_v49 = vsel %vm2172_vm7, %v2217_v15, %v2213_v42  ;;  %v2251_v8 = vrot.slane %v5663_v51, %v5151_v7  ;;  %v2563_v51 = vld [vmem:[%s6533_s4 + $0x20] sm:$0xff]  ;;  %v1270_v24 = vmul.f32 0.03125, %v5732_v60 }
 0x371   :  { %v5771_v44 = vpop.xlane.xlu0 %1086  ;;  %v1390_v53 = vpop.xlane.xlu1 %1389  ;;  %3684 = vmatpush3.msra.mxu1 %v2568_v3  ;;  %v2223_v3 = vsel %vm2179_vm5, %v2222_v17, %v2218_v49  ;;  %v2227_v9 = vrot.slane %v5669_v19, %v5205_v47  ;;  %v2256_v49 = vrot.slane %v5642_v0, %v5174_v35  ;;  %v2266_v0 = vrot.slane %v5695_v46, %v5205_v47 }
 0x372   :  { %3685 = vmatprep.subr.mxu1 %v2567_v45  ;;  %v2242_v50 = vsel %vm2151_vm15, %v2241_v18, %v2237_v23  ;;  %v2261_v18 = vrot.slane %v1390_v53, %v5210_v29  ;;  %v2561_v53 = vld [vmem:[%s6533_s4 + $0x10] sm:$0xff]  ;;  %v1785_v33 = vrot.slane %v1270_v24, %v5053_v27  ;;  %v1280_v60 = vmul.f32 0.03125, %v5645_v41 }
 0x373   :  { %3686 = vmatpush3.msra.mxu1 %v2567_v45  ;;  %v2564_v45 = vld [vmem:[%s6533_s4 + $0x28] sm:$0xff]  ;;  %v2247_v23 = vsel %vm2158_vm9, %v2246_v1, %v2242_v50  ;;  %v2228_v17 = vsel %vm2186_vm4, %v2227_v9, %v2223_v3  ;;  %v1281_v57 = vmul.f32 0.03125, %v5697_v16 }
 0x374   :  { %1539 = vmax.xlane.f32.xlu0 %v1538_v4  ;;  %1563 = vmax.xlane.f32.xlu1 %v1562_v62  ;;  %v2252_v15 = vsel %vm2165_vm8, %v2251_v8, %v2247_v23  ;;  %v2560_v9 = vld [vmem:[%s6533_s4 + $0x8] sm:$0xff] }
 0x375   :  { %v5789_v54 = vpop.xlane.xlu0 %1125  ;;  %v5793_v22 = vpop.xlane.xlu1 %1431  ;;  %3687 = vmatprep.subr.mxu1 %v2566_v11  ;;  %v2257_v8 = vsel %vm2172_vm7, %v2256_v49, %v2252_v15 }
 0x376   :  { %3688 = vmatpush3.msra.mxu1 %v2566_v11  ;;  %v2262_v3 = vsel %vm2179_vm5, %v2261_v18, %v2257_v8 }
 0x377   :  { %3689 = vmatprep.subr.mxu1 %v2565_v52 }
 0x378   :  { %3690 = vmatpush3.msra.mxu1 %v2565_v52  ;;  %v2562_v52 = vld [vmem:[%s6533_s4 + $0x18] sm:$0xff] }
 0x379   :  { %v5810_v4 = vpop.xlane.xlu0 %1401  ;;  %v1372_v62 = vpop.xlane.xlu1 %1371  ;;  %3691 = vmatprep.subr.mxu1 %v2564_v45 }
 0x37a   :  { %v2232_v42 = vrot.slane %v1372_v62, %v5344_v58  ;;  %3692 = vmatpush3.msra.mxu1 %v2564_v45 }
 0x37b   :  { %3693 = vmatprep.subr.mxu1 %v2563_v51 }
 0x37c   :  { %v2233_v19 = vsel %vm2193_vm3, %v2232_v42, %v2228_v17  ;;  %3694 = vmatpush3.msra.mxu1 %v2563_v51  ;;  %v2559_v42 = vld [vmem:[%s6533_s4] sm:$0xff]  ;;  %v2267_v51 = vsel %vm2186_vm4, %v2266_v0, %v2262_v3 }
 0x37d   :  { %v1090_v11 = vpop.xlane.xlu0 %1089  ;;  %v2546_v1 = vsel %vm557_vm2, %v2233_v19, %v5372_v56  ;;  %v5833_v50 = vpop.xlane.xlu1 %1122  ;;  %3695 = vmatprep.subr.mxu1 %v2562_v52 }
 0x37e   :  { %3696 = vmatpush3.msra.mxu1 %v2562_v52 }
 0x37f   :  { %3697 = vmatprep.subr.mxu1 %v2561_v53 }
 0x380   :  { %3698 = vmatpush3.msra.mxu1 %v2561_v53 }
 0x381   :  { %v5840_v45 = vpop.xlane.xlu0 %1131  ;;  %v1396_v56 = vpop.xlane.xlu1 %1395  ;;  %3699 = vmatprep.subr.mxu1 %v2560_v9 }
 0x382   :  { %v2271_v62 = vrot.slane %v1396_v56, %v5344_v58  ;;  %3700 = vmatpush3.msra.mxu1 %v2560_v9 }
 0x383   :  { %3701 = vmatprep.subr.mxu1 %v2559_v42 }
 0x384   :  { %v2272_v23 = vsel %vm2193_vm3, %v2271_v62, %v2267_v51  ;;  %3702 = vmatpush3.msra.mxu1 %v2559_v42 }
 0x385   :  { %v5853_v17 = vpop.xlane.xlu0 %1152  ;;  %v5856_v46 = vsel %vm6854_vm10, %v2272_v23, %v2546_v1  ;;  %v5858_v15 = vpop.xlane.xlu1 %1437  ;;  %vm6861_vm10 = vcmask 392512  }
 0x386   :  { %6855 = vst [vmem:[#allocation93_spill] sm:$0xff] %v5856_v46  ;;  %vm6862_vm0 = vmmov %vm6861_vm10 }
 0x389   :  { %v5860_v18 = vpop.xlane.xlu0 %1404  ;;  %v5862_v19 = vpop.xlane.xlu1 %1440 }
 0x38d   :  { %v1093_v52 = vpop.xlane.xlu0 %1092  ;;  %v5864_v49 = vpop.xlane.xlu1 %1443 }
 0x391   :  { %v5866_v53 = vpop.xlane.xlu0 %1134  ;;  %v1078_v8 = vpop.xlane.xlu1 %1077 }
 0x392   :  { %v1269_v23 = vmul.f32 0.03125, %v1078_v8  ;;  %v1272_v8 = vmul.f32 0.03125, %v5771_v44 }
 0x394   :  { %v1781_v63 = vrot.slane %v1269_v23, %v5064_v37  ;;  %v1790_v23 = vrot.slane %v1271_v39, %v5075_v14  ;;  %v1795_v44 = vrot.slane %v1272_v8, %v5085_v36  ;;  %v1839_v39 = vrot.slane %v1281_v57, %v5114_v30 }
 0x395   :  { %v5868_v3 = vpop.xlane.xlu0 %1449  ;;  %v5870_v0 = vpop.xlane.xlu1 %1128  ;;  %v1283_v8 = vmul.f32 0.03125, %v5683_v43 }
 0x396   :  { %6856 = vst [vmem:[#allocation94_spill] sm:$0xff] %v5868_v3  ;;  %v1786_v61 = vsel %vm1656_vm12, %v1785_v33, %v1781_v63  ;;  %v1834_v63 = vrot.slane %v1280_v60, %v5085_v36 }
 0x397   :  { %v1791_v24 = vsel %vm1663_vm13, %v1790_v23, %v1786_v61  ;;  %v1284_v61 = vmul.f32 0.03125, %v5833_v50  ;;  %v1849_v43 = vrot.slane %v1283_v8, %v5133_v21 }
 0x398   :  { %v1796_v16 = vsel %vm1670_vm14, %v1795_v44, %v1791_v24 }
 0x399   :  { %v1096_v1 = vpop.xlane.xlu0 %1095  ;;  %v5872_v56 = vpop.xlane.xlu1 %1398 }
 0x39a   :  { %v1275_v41 = vmul.f32 0.03125, %v1096_v1 }
 0x39d   :  { %v5874_v9 = vpop.xlane.xlu0 %1137  ;;  %v5876_v62 = vpop.xlane.xlu1 %1149 }
 0x3a1   :  { %v5878_v42 = vpop.xlane.xlu0 %1410  ;;  %v5880_v51 = vpop.xlane.xlu1 %1155 }
 0x3a2   :  { %6857 = vst [vmem:[#allocation95_spill] sm:$0xff] %v5878_v42  ;;  %v1273_v42 = vmul.f32 0.03125, %v1090_v11  ;;  %v1830_v11 = vsel %vm1663_vm13, %v1829_v25, %v5574_v6  ;;  %v1854_v6 = vrot.slane %v1284_v61, %v5202_v31 }
 0x3a3   :  { %v1835_v1 = vsel %vm1670_vm14, %v1834_v63, %v1830_v11 }
 0x3a4   :  { %v1800_v10 = vrot.slane %v1273_v42, %v5114_v30 }
 0x3a5   :  { %v5882_v2 = vpop.xlane.xlu0 %1452  ;;  %v5884_v5 = vpop.xlane.xlu1 %1407 }
 0x3a6   :  { %6858 = vst [vmem:[#allocation96_spill] sm:$0xff] %v5882_v2  ;;  %v1801_v23 = vsel %vm1677_vm1, %v1800_v10, %v1796_v16 }
 0x3a9   :  { %v5888_v48 = vpop.xlane.xlu0 %1473  ;;  %v5891_v55 = vpop.xlane.xlu1 %1446 }
 0x3aa   :  { %6859 = vst [vmem:[#allocation97_spill] sm:$0xff] %v5888_v48  ;;  %6860 = vst [vmem:[#allocation98_spill] sm:$0xff] %v5891_v55  ;;  %v1282_v48 = vmul.f32 0.03125, %v5752_v20  ;;  %v1274_v55 = vmul.f32 0.03125, %v1093_v52  ;;  %v1810_v52 = vrot.slane %v1275_v41, %v5133_v21 }
 0x3ac   :  { %v1844_v20 = vrot.slane %v1282_v48, %v5143_v12  ;;  %v1840_v48 = vsel %vm1677_vm1, %v1839_v39, %v1835_v1  ;;  %v1805_v50 = vrot.slane %v1274_v55, %v5143_v12 }
 0x3ad   :  { %v5897_v46 = vpop.xlane.xlu0 %1161  ;;  %v5901_v2 = vpop.xlane.xlu1 %1158 }
 0x3ae   :  { %v1845_v42 = vsel %vm6861_vm10, %v1844_v20, %v1840_v48  ;;  %v1806_v25 = vsel %vm6862_vm0, %v1805_v50, %v1801_v23  ;;  %vm6863_vm10 = vcmask 1043459   ;;  %vm6864_vm0 = vcmask 1044484  }
 0x3af   :  { %v1811_v41 = vsel %vm1691_vm11, %v1810_v52, %v1806_v25  ;;  %v1850_v39 = vsel %vm1691_vm11, %v1849_v43, %v1845_v42  ;;  %v2319_v25 = vrot.slane %v5615_v26, %v5090_v40 }
 0x3b0   :  { %v1855_v20 = vsel %vm1698_vm6, %v1854_v6, %v1850_v39  ;;  %v2315_v6 = vrot.slane %v5671_v59, %v5094_v38  ;;  %v2329_v39 = vrot.slane %v5793_v22, %v5151_v7  ;;  %v1285_v59 = vmul.f32 0.03125, %v5789_v54 }
 0x3b1   :  { %v5908_v33 = vpop.xlane.xlu0 %1476  ;;  %v5911_v3 = vpop.xlane.xlu1 %1470  ;;  %v2339_v22 = vrot.slane %v5858_v15, %v5210_v29  ;;  %v2344_v54 = vrot.slane %v5862_v19, %v5205_v47  ;;  %v1295_v15 = vmul.f32 0.03125, %v5880_v51  ;;  %v1288_v19 = vmul.f32 0.03125, %v5866_v53 }
 0x3b5   :  { %v5921_v60 = vpop.xlane.xlu0 %1143  ;;  %v1099_v57 = vpop.xlane.xlu1 %1098 }
 0x3b6   :  { %v1276_v24 = vmul.f32 0.03125, %v1099_v57 }
 0x3b8   :  { %v1815_v44 = vrot.slane %v1276_v24, %v5202_v31 }
 0x3b9   :  { %v5933_v63 = vpop.xlane.xlu0 %1416  ;;  %v5936_v16 = vpop.xlane.xlu1 %1140 }
 0x3ba   :  { %v1816_v55 = vsel %vm1698_vm6, %v1815_v44, %v1811_v41  ;;  %v2320_v41 = vsel %vm2151_vm15, %v2319_v25, %v2315_v6  ;;  %v1287_v6 = vmul.f32 0.03125, %v5840_v45  ;;  %v1294_v25 = vmul.f32 0.03125, %v5853_v17 }
 0x3bb   :  { %v2053_v61 = vsel %vm6863_vm10, %v1816_v55, %v5765_v13  ;;  %v2280_v45 = vrot.slane %v5810_v4, %v5090_v40  ;;  %v2276_v17 = vrot.slane %v5872_v56, %v5094_v38  ;;  %v2285_v56 = vrot.slane %v5860_v18, %v5109_v28 }
 0x3bc   :  { %v5946_v11 = vsel %vm6864_vm0, %v1855_v20, %v2053_v61  ;;  %v2324_v20 = vrot.slane %v5661_v34, %v5109_v28  ;;  %v1286_v61 = vmul.f32 0.03125, %v5870_v0  ;;  %v2334_v34 = vrot.slane %v5710_v32, %v5174_v35 }
 0x3bd   :  { %v5943_v10 = vpop.xlane.xlu0 %1458  ;;  %6865 = vst [vmem:[#allocation99_spill] sm:$0xff] %v5946_v11  ;;  %v5948_v8 = vpop.xlane.xlu1 %1413  ;;  %v2349_v32 = vrot.slane %v5864_v49, %v5344_v58  ;;  %vm6872_vm10 = vcmask 392512  }
 0x3be   :  { %v2325_v11 = vsel %vm2158_vm9, %v2324_v20, %v2320_v41  ;;  %v1863_v0 = vrot.slane %v1286_v61, %v5053_v27  ;;  %v1293_v41 = vmul.f32 0.03125, %v5876_v62  ;;  %v1296_v20 = vmul.f32 0.03125, %v5901_v2  ;;  %vm6873_vm0 = vmmov %vm6872_vm10 }
 0x3bf   :  { %v2330_v26 = vsel %vm2165_vm8, %v2329_v39, %v2325_v11  ;;  %v1859_v11 = vrot.slane %v1285_v59, %v5064_v37  ;;  %v1868_v61 = vrot.slane %v1287_v6, %v5075_v14  ;;  %v1902_v59 = vrot.slane %v1294_v25, %v5053_v27 }
 0x3c0   :  { %v2335_v39 = vsel %vm2172_vm7, %v2334_v34, %v2330_v26  ;;  %v1898_v53 = vrot.slane %v1293_v41, %v5064_v37  ;;  %v1289_v2 = vmul.f32 0.03125, %v5874_v9  ;;  %v2281_v34 = vsel %vm2151_vm15, %v2280_v45, %v2276_v17  ;;  %v6868_v17 = vld [vmem:[#allocation94_spill] sm:$0xff] }
 0x3c1   :  { %v5950_v1 = vpop.xlane.xlu0 %1167  ;;  %v5952_v23 = vpop.xlane.xlu1 %1455  ;;  %v2340_v4 = vsel %vm2179_vm5, %v2339_v22, %v2335_v39  ;;  %v1864_v49 = vsel %vm1656_vm12, %v1863_v0, %v1859_v11  ;;  %v1907_v6 = vrot.slane %v1295_v15, %v5075_v14  ;;  %v2290_v22 = vrot.slane %v5884_v5, %v5151_v7  ;;  %v6867_v0 = vld [vmem:[#allocation98_spill] sm:$0xff] }
 0x3c2   :  { %v2345_v26 = vsel %vm2186_vm4, %v2344_v54, %v2340_v4  ;;  %v1297_v25 = vmul.f32 0.03125, %v5897_v46  ;;  %v1873_v54 = vrot.slane %v1288_v19, %v5085_v36  ;;  %v2354_v11 = vrot.slane %v6867_v0, %v5094_v38  ;;  %v6870_v0 = vld [vmem:[#allocation97_spill] sm:$0xff] }
 0x3c3   :  { %v6031_v18 = vsel %vm2193_vm3, %v2349_v32, %v2345_v26  ;;  %v1912_v41 = vrot.slane %v1296_v20, %v5085_v36  ;;  %v1869_v45 = vsel %vm1663_vm13, %v1868_v61, %v1864_v49  ;;  %v2358_v15 = vrot.slane %v6868_v17, %v5090_v40  ;;  %v6869_v20 = vld [vmem:[#allocation95_spill] sm:$0xff] }
 0x3c4   :  { %v2393_v5 = vrot.slane %v5911_v3, %v5094_v38  ;;  %v1290_v46 = vmul.f32 0.03125, %v5936_v16  ;;  %v1903_v32 = vsel %vm1656_vm12, %v1902_v59, %v1898_v53  ;;  %v1878_v19 = vrot.slane %v1289_v2, %v5114_v30 }
 0x3c5   :  { %v5954_v52 = vpop.xlane.xlu0 %1419  ;;  %v5956_v57 = vpop.xlane.xlu1 %1164  ;;  %v2295_v4 = vrot.slane %v6869_v20, %v5174_v35  ;;  %v2286_v26 = vsel %vm2158_vm9, %v2285_v56, %v2281_v34  ;;  %v1908_v61 = vsel %vm1663_vm13, %v1907_v6, %v1903_v32  ;;  %v2397_v3 = vrot.slane %v6870_v0, %v5090_v40  ;;  %v6871_v34 = vld [vmem:[#allocation96_spill] sm:$0xff] }
 0x3c6   :  { %v2291_v49 = vsel %vm2165_vm8, %v2290_v22, %v2286_v26  ;;  %v1917_v16 = vrot.slane %v1297_v25, %v5114_v30  ;;  %v2359_v17 = vsel %vm2151_vm15, %v2358_v15, %v2354_v11  ;;  %v1913_v59 = vsel %vm1670_vm14, %v1912_v41, %v1908_v61 }
 0x3c7   :  { %v2402_v53 = vrot.slane %v5908_v33, %v5109_v28  ;;  %v2300_v2 = vrot.slane %v5948_v8, %v5210_v29  ;;  %v2363_v6 = vrot.slane %v6871_v34, %v5109_v28  ;;  %v2398_v22 = vsel %vm2151_vm15, %v2397_v3, %v2393_v5 }
 0x3c8   :  { %v1883_v32 = vrot.slane %v1290_v46, %v5143_v12  ;;  %v1298_v25 = vmul.f32 0.03125, %v5956_v57  ;;  %v1874_v41 = vsel %vm1670_vm14, %v1873_v54, %v1869_v45  ;;  %v1291_v15 = vmul.f32 0.03125, %v5921_v60 }
 0x3c9   :  { %v5958_v48 = vpop.xlane.xlu0 %1461  ;;  %v5960_v50 = vpop.xlane.xlu1 %1479  ;;  %v2368_v33 = vrot.slane %v5952_v23, %v5151_v7  ;;  %v1879_v20 = vsel %vm1677_vm1, %v1878_v19, %v1874_v41  ;;  %v1918_v26 = vsel %vm1677_vm1, %v1917_v16, %v1913_v59  ;;  %v2296_v61 = vsel %vm2172_vm7, %v2295_v4, %v2291_v49 }
 0x3ca   :  { %v2364_v5 = vsel %vm2158_vm9, %v2363_v6, %v2359_v17  ;;  %v2403_v46 = vsel %vm2158_vm9, %v2402_v53, %v2398_v22  ;;  %v2301_v57 = vsel %vm2179_vm5, %v2300_v2, %v2296_v61  ;;  %v2310_v54 = vrot.slane %v5954_v52, %v5344_v58 }
 0x3cb   :  { %v1884_v23 = vsel %vm6872_vm10, %v1883_v32, %v1879_v20  ;;  %v2305_v19 = vrot.slane %v5933_v63, %v5205_v47  ;;  %v1299_v4 = vmul.f32 0.03125, %v5950_v1  ;;  %v1922_v49 = vrot.slane %v1298_v25, %v5143_v12 }
 0x3cc   :  { %v1888_v3 = vrot.slane %v1291_v15, %v5133_v21  ;;  %v2369_v16 = vsel %vm2165_vm8, %v2368_v33, %v2364_v5  ;;  %v2378_v63 = vrot.slane %v5958_v48, %v5210_v29  ;;  %v2407_v2 = vrot.slane %v5960_v50, %v5151_v7 }
 0x3cd   :  { %v5962_v13 = vpop.xlane.xlu0 %1464  ;;  %v5964_v24 = vpop.xlane.xlu1 %1146  ;;  %v2306_v59 = vsel %vm2186_vm4, %v2305_v19, %v2301_v57  ;;  %v1927_v22 = vrot.slane %v1299_v4, %v5133_v21  ;;  %vm6875_vm10 = vcmask 1043459  }
 0x3ce   :  { %v2311_v53 = vsel %vm2193_vm3, %v2310_v54, %v2306_v59  ;;  %v1889_v34 = vsel %vm1691_vm11, %v1888_v3, %v1884_v23  ;;  %v1292_v48 = vmul.f32 0.03125, %v5964_v24  ;;  %v2408_v24 = vsel %vm2165_vm8, %v2407_v2, %v2403_v46  ;;  %v6876_v46 = vld [vmem:[#allocation56_spill] sm:$0xff] }
 0x3d0   :  { %v1893_v57 = vrot.slane %v1292_v48, %v6876_v46 }
 0x3d1   :  { %v5966_v42 = vpop.xlane.xlu0 %1467  ;;  %v5970_v43 = vpop.xlane.xlu1 %1482 }
 0x3d2   :  { %6866 = vst [vmem:[#allocation100_spill] sm:$0xff] %v5966_v42  ;;  %v2412_v61 = vrot.slane %v5970_v43, %v5174_v35 }
 0x3d5   :  { %v5974_v44 = vpop.xlane.xlu0 %1173  ;;  %v5979_v55 = vpop.xlane.xlu1 %1170 }
 0x3d6   :  { %v1301_v60 = vmul.f32 0.03125, %v5974_v44  ;;  %v2373_v44 = vrot.slane %v5943_v10, %v5174_v35  ;;  %v1923_v10 = vsel %vm6873_vm0, %v1922_v49, %v1918_v26  ;;  %v1300_v26 = vmul.f32 0.03125, %v5979_v55 }
 0x3d8   :  { %v2374_v32 = vsel %vm2172_vm7, %v2373_v44, %v2369_v16  ;;  %v2413_v16 = vsel %vm2172_vm7, %v2412_v61, %v2408_v24 }
 0x3d9   :  { %v5986_v42 = vpop.xlane.xlu0 %1179  ;;  %v5993_v31 = vpop.xlane.xlu1 %1485  ;;  %v2379_v33 = vsel %vm2179_vm5, %v2378_v63, %v2374_v32  ;;  %v6877_v55 = vld [vmem:[#allocation100_spill] sm:$0xff] }
 0x3da   :  { %v1303_v1 = vmul.f32 0.03125, %v5986_v42  ;;  %v2388_v54 = vrot.slane %v6877_v55, %v5344_v58 }
 0x3dd   :  { %v6012_v62 = vpop.xlane.xlu0 %1497  ;;  %v6019_v51 = vpop.xlane.xlu1 %1488 }
 0x3de   :  { %v2436_v42 = vrot.slane %v6012_v62, %v5090_v40  ;;  %v1928_v40 = vsel %vm1691_vm11, %v1927_v22, %v1923_v10 }
 0x3e1   :  { %v6037_v9 = vpop.xlane.xlu0 %1185  ;;  %v6045_v39 = vpop.xlane.xlu1 %1491 }
 0x3e2   :  { %v1305_v20 = vmul.f32 0.03125, %v6037_v9 }
 0x3e4   :  { %v1956_v19 = vrot.slane %v1305_v20, %v5114_v30 }
 0x3e5   :  { %v6063_v56 = vpop.xlane.xlu0 %1500  ;;  %v1177_v11 = vpop.xlane.xlu1 %1176 }
 0x3e6   :  { %v1302_v8 = vmul.f32 0.03125, %v1177_v11 }
 0x3e8   :  { %v1941_v52 = vrot.slane %v1302_v8, %v5053_v27  ;;  %v1937_v27 = vrot.slane %v1301_v60, %v5064_v37  ;;  %v6874_v37 = vld [vmem:[#allocation93_spill] sm:$0xff]  ;;  %v1946_v8 = vrot.slane %v1303_v1, %v5075_v14  ;;  %v2441_v14 = vrot.slane %v6063_v56, %v5109_v28 }
 0x3e9   :  { %v6083_v45 = vpop.xlane.xlu0 %1503  ;;  %v1183_v0 = vpop.xlane.xlu1 %1182  ;;  %v2548_v15 = vsel %vm6875_vm10, %v2311_v53, %v6874_v37  ;;  %v1932_v28 = vrot.slane %v1300_v26, %v6876_v46  ;;  %v2422_v56 = vrot.slane %v6019_v51, %v5205_v47 }
 0x3ea   :  { %v1304_v17 = vmul.f32 0.03125, %v1183_v0  ;;  %v1942_v11 = vsel %vm1656_vm12, %v1941_v52, %v1937_v27  ;;  %v2446_v49 = vrot.slane %v6083_v45, %v5151_v7  ;;  %vm6878_vm12 = vmmov %vm6873_vm0 }
 0x3eb   :  { %v1947_v9 = vsel %vm1663_vm13, %v1946_v8, %v1942_v11  ;;  %v6880_v11 = vld [vmem:[#allocation99_spill] sm:$0xff]  ;;  %vm6881_vm13 = vcmask 1045509  }
 0x3ec   :  { %v1951_v50 = vrot.slane %v1304_v17, %v5085_v36 }
 0x3ed   :  { %v1192_v6 = vpop.xlane.xlu0 %1191  ;;  %v1495_v25 = vpop.xlane.xlu1 %1494 }
 0x3ee   :  { %v2432_v41 = vrot.slane %v1495_v25, %v5094_v38  ;;  %v2383_v38 = vrot.slane %v5962_v13, %v5205_v47  ;;  %v1952_v60 = vsel %vm1670_vm14, %v1951_v50, %v1947_v9  ;;  %v2417_v13 = vrot.slane %v5993_v31, %v5210_v29  ;;  %v6889_v9 = vld [vmem:[#allocation75_spill] sm:$0xff] }
 0x3ef   :  { %v1307_v4 = vmul.f32 0.03125, %v1192_v6  ;;  %v2427_v31 = vrot.slane %v6045_v39, %v5344_v58  ;;  %v1957_v30 = vsel %vm1677_vm1, %v1956_v19, %v1952_v60  ;;  %vm2556_vm14 = vcmask 523264  }
 0x3f0   :  { %v2437_v62 = vsel %vm2151_vm15, %v2436_v42, %v2432_v41  ;;  %v2384_v45 = vsel %vm2186_vm4, %v2383_v38, %v2379_v33  ;;  %v2418_v63 = vsel %vm2179_vm5, %v2417_v13, %v2413_v16  ;;  %vm6883_vm15 = vcmask 1046534   ;;  %v6888_v38 = vld [vmem:[#allocation74_spill] sm:$0xff] }
 0x3f1   :  { %v1507_v36 = vpop.xlane.xlu0 %1506  ;;  %v1189_v5 = vpop.xlane.xlu1 %1188  ;;  %v2442_v43 = vsel %vm2158_vm9, %v2441_v14, %v2437_v62  ;;  %v1966_v39 = vrot.slane %v1307_v4, %v5133_v21  ;;  %v2389_v1 = vsel %vm2193_vm3, %v2388_v54, %v2384_v45  ;;  %v2423_v53 = vsel %vm2186_vm4, %v2422_v56, %v2418_v63  ;;  %v6887_v62 = vld [vmem:[#allocation60_spill] sm:$0xff]  ;;  %v6890_v13 = vld [vmem:[#allocation6_spill] sm:$0xff] }
 0x3f2   :  { %v1306_v23 = vmul.f32 0.03125, %v1189_v5  ;;  %v2451_v52 = vrot.slane %v1507_v36, %v5174_v35  ;;  %v2447_v51 = vsel %vm2165_vm8, %v2446_v49, %v2442_v43  ;;  %v1933_v35 = vsel %vm1698_vm6, %v1932_v28, %v1928_v40  ;;  %v6891_v43 = vld [vmem:[#allocation8_spill] sm:$0xff] }
 0x3f3   :  { %v2428_v6 = vsel %vm2193_vm3, %v2427_v31, %v2423_v53  ;;  %vm6879_vm8 = vcmask 1044484   ;;  %v2699_v19 = vsub.s32 1, %v6890_v13  ;;  %v2734_v16 = vsub.s32 2, %v6890_v13  ;;  %v6892_v53 = vld [vmem:[#allocation7_spill] sm:$0xff] }
 0x3f4   :  { %v1961_v0 = vrot.slane %v1306_v23, %v5143_v12  ;;  %v1894_v12 = vsel %vm1698_vm6, %v1893_v57, %v1889_v34  ;;  %v2549_v25 = vsel %vm6879_vm8, %v6031_v18, %v2548_v15  ;;  %v2909_v63 = vsub.s32 7, %v6890_v13 }
 0x3f5   :  { %v1510_v3 = vpop.xlane.xlu0 %1509  ;;  %v1195_v17 = vpop.xlane.xlu1 %1194  ;;  %v2055_v50 = vsel %vm6881_vm13, %v1894_v12, %v6880_v11  ;;  %v2874_v12 = vsub.s32 6, %v6890_v13 }
 0x3f6   :  { %v1962_v44 = vsel %vm6878_vm12, %v1961_v0, %v1957_v30  ;;  %v1308_v59 = vmul.f32 0.03125, %v1195_v17  ;;  %v2456_v7 = vrot.slane %v1510_v3, %v5210_v29  ;;  %v2452_v29 = vsel %vm2172_vm7, %v2451_v52, %v2447_v51  ;;  %vm6882_vm7 = vmmov %vm6881_vm13 }
 0x3f7   :  { %v1967_v10 = vsel %vm1691_vm11, %v1966_v39, %v1962_v44  ;;  %v2550_v41 = vsel %vm6882_vm7, %v2389_v1, %v2549_v25  ;;  %v2056_v37 = vsel %vm6883_vm15, %v1933_v35, %v2055_v50  ;;  %v2769_v52 = vsub.s32 3, %v6890_v13  ;;  %v6897_v25 = vld [vmem:[#allocation28_spill] sm:$0xff] }
 0x3f8   :  { %v1971_v2 = vrot.slane %v1308_v59, %v6876_v46  ;;  %v2457_v21 = vsel %vm2179_vm5, %v2456_v7, %v2452_v29  ;;  %vm6884_vm5 = vmmov %vm6883_vm15  ;;  %v2804_v44 = vsub.s32 4, %v6890_v13  ;;  %v2839_v59 = vsub.s32 5, %v6890_v13  ;;  %v6909_v13 = vld [vmem:[#allocation12_spill] sm:$0xff] }
 0x3f9   :  { %v1513_v27 = vpop.xlane.xlu0 %1512  ;;  %v1516_v34 = vpop.xlane.xlu1 %1515  ;;  %v2551_v8 = vsel %vm6884_vm5, %v2428_v6, %v2550_v41 }
 0x3fa   :  { %v2461_v22 = vrot.slane %v1513_v27, %v5205_v47  ;;  %v2466_v32 = vrot.slane %v1516_v34, %v5344_v58  ;;  %v1972_v48 = vsel %vm1698_vm6, %v1971_v2, %v1967_v10  ;;  %vm6885_vm6 = vcmask 1047559   ;;  %v6893_v27 = vld [vmem:[#allocation9_spill] sm:$0xff] }
 0x3fb   :  { %v2057_v18 = vsel %vm6885_vm6, %v1972_v48, %v2056_v37  ;;  %vm6886_vm1 = vmmov %vm6885_vm6 }
 0x3fc   :  { %v2462_v42 = vsel %vm2186_vm4, %v2461_v22, %v2457_v21 }
 0x3fd   :  { %v1540_v47 = vpop.xlane.xlu0 %1539  ;;  %v2467_v33 = vsel %vm2193_vm3, %v2466_v32, %v2462_v42  ;;  %v1564_v20 = vpop.xlane.xlu1 %1563  ;;  %v6896_v32 = vld [vmem:[#allocation24_spill] sm:$0xff] }
 0x3fe   :  { %v2505_v24 = vrot.slane %v1540_v47, %v5344_v58  ;;  %v2552_v15 = vsel %vm6886_vm1, %v2467_v33, %v2551_v8  ;;  %v2544_v26 = vrot.slane %v1564_v20, %v5344_v58  ;;  %v6900_v33 = vld [vmem:[#allocation26_spill] sm:$0xff] }
 0x3ff   :  { %v2557_v40 = vsel %vm2556_vm14, %v2057_v18, %v2552_v15  ;;  %v6901_v20 = vld [vmem:[#allocation10_spill] sm:$0xff] }
 0x400   :  { %v2506_v36 = vsel %vm2193_vm3, %v2505_v24, %v6887_v62  ;;  %3703 = vmatprep.mubr.f32.mxu1 %v2557_v40  ;;  %v2545_v61 = vsel %vm2193_vm3, %v2544_v26, %v6888_v38  ;;  %vm6894_vm3 = vcmask 261120   ;;  %v6904_v38 = vld [vmem:[#allocation25_spill] sm:$0xff] }
 0x401   :  { %v2553_v14 = vsel %vm557_vm2, %v2545_v61, %v2506_v36  ;;  %vm6895_vm4 = vmmov %vm6894_vm3 }
 0x402   :  { %v2558_v5 = vsel %vm2556_vm14, %v6889_v9, %v2553_v14  ;;  %vm6898_vm9 = vmmov %vm6894_vm3  ;;  %v6905_v14 = vld [vmem:[#allocation11_spill] sm:$0xff] }
 0x403   :  { %3704 = vmatmul.mubr.f32.vlgmr.msra.gmra.mxu1 %v2558_v5  ;;  %vm6899_vm11 = vmmov %vm6894_vm3 }
 0x404   :  { %vm6902_vm0 = vmmov %vm6894_vm3 }
 0x405   :  { %vm6903_vm10 = vmmov %vm6902_vm0 }
 0x406   :  { %vm6906_vm12 = vmmov %vm6902_vm0 }
 0x407   :  { %vm6907_vm8 = vmmov %vm6902_vm0 }
 0x408   :  { %vm6910_vm13 = vmmov %vm6902_vm0 }
 0x409   :  { %vm6911_vm7 = vmmov %vm6902_vm0 }
 0x40a   :  { %vm6914_vm14 = vmmov %vm6902_vm0 }
 0x40b   :  { %vm6915_vm15 = vmmov %vm6902_vm0 }
 0x40c   :  { %vm6918_vm5 = vmmov %vm6902_vm0 }
 0x40d   :  { %vm6919_vm6 = vmmov %vm6902_vm0 }
 0x40e   :  { %vm6922_vm1 = vmmov %vm6902_vm0 }
 0x4c3   :  { %v3705_v46 = vpop.f32.mrf.mxu1 }
 0x4c4   :  { %v3594_v57 = vmul.f32 -1.442695, %v3705_v46 }
 0x4c5   :  { %v2641_v60 = vpop.f32.mrf.mxu1 }
 0x4c6   :  { %3739 = vpow2.f32 %v3594_v57  ;;  %v3593_v58 = vmul.f32 -1.442695, %v2641_v60 }
 0x4d3   :  { %v3740_v55 = vpop.eup %3739 }
 0x4d4   :  { %v2657_v54 = vadd.f32 1.0, %v3740_v55 }
 0x4d6   :  { %3741 = vrcp.f32 %v2657_v54 }
 0x4d7   :  { %3743 = vpow2.f32 %v3593_v58  ;;  %v6908_v58 = vld [vmem:[#allocation27_spill] sm:$0xff] }
 0x4e3   :  { %v3742_v23 = vpop.eup %3741 }
 0x4e4   :  { %v6187_v4 = vrot.slane %v3742_v23, %v6891_v43  ;;  %v6191_v28 = vrot.slane %v3742_v23, %v2699_v19  ;;  %v3744_v56 = vpop.eup %3743 }
 0x4e5   :  { %v2656_v49 = vadd.f32 1.0, %v3744_v56 }
 0x4e6   :  { %2951 = vbcast.lane.b32.xlu0 %v6187_v4, 264  ;;  %2947 = vbcast.lane.b32.xlu1 %v6187_v4, 256 }
 0x4e7   :  { %3745 = vrcp.f32 %v2656_v49 }
 0x4ea   :  { %2986 = vbcast.lane.b32.xlu0 %v6191_v28, 264  ;;  %2982 = vbcast.lane.b32.xlu1 %v6191_v28, 256 }
 0x4ee   :  { %2990 = vbcast.lane.b32.xlu0 %v6191_v28, 272  ;;  %2955 = vbcast.lane.b32.xlu1 %v6187_v4, 272 }
 0x4f2   :  { %2994 = vbcast.lane.b32.xlu0 %v6191_v28, 280  ;;  %2959 = vbcast.lane.b32.xlu1 %v6187_v4, 280 }
 0x4f4   :  { %v3746_v0 = vpop.eup %3745 }
 0x4f5   :  { %v6206_v3 = vrot.slane %v3746_v0, %v6891_v43  ;;  %v6211_v31 = vrot.slane %v3746_v0, %v2699_v19  ;;  %v6213_v30 = vrot.slane %v3746_v0, %v2734_v16  ;;  %v6220_v17 = vrot.slane %v3746_v0, %v2769_v52  ;;  %v6913_v52 = vld [vmem:[#allocation29_spill] sm:$0xff] }
 0x4f6   :  { %2998 = vbcast.lane.b32.xlu0 %v6191_v28, 288  ;;  %2963 = vbcast.lane.b32.xlu1 %v6187_v4, 288  ;;  %v6227_v51 = vrot.slane %v3746_v0, %v2804_v44  ;;  %v6234_v7 = vrot.slane %v3746_v0, %v2839_v59  ;;  %v6241_v45 = vrot.slane %v3746_v0, %v2874_v12 }
 0x4f7   :  { %v6250_v39 = vrot.slane %v3746_v0, %v2909_v63 }
 0x4fa   :  { %2967 = vbcast.lane.b32.xlu0 %v6187_v4, 296  ;;  %3002 = vbcast.lane.b32.xlu1 %v6191_v28, 296 }
 0x4fe   :  { %3006 = vbcast.lane.b32.xlu0 %v6191_v28, 304  ;;  %2971 = vbcast.lane.b32.xlu1 %v6187_v4, 304 }
 0x502   :  { %2671 = vbcast.lane.b32.xlu1 %v6206_v3, 264  ;;  %2667 = vbcast.lane.b32.xlu0 %v6206_v3, 256 }
 0x506   :  { %2702 = vbcast.lane.b32.xlu1 %v6211_v31, 256  ;;  %2737 = vbcast.lane.b32.xlu0 %v6213_v30, 256 }
 0x50a   :  { %2706 = vbcast.lane.b32.xlu1 %v6211_v31, 264  ;;  %2675 = vbcast.lane.b32.xlu0 %v6206_v3, 272 }
 0x50e   :  { %2741 = vbcast.lane.b32.xlu1 %v6213_v30, 264  ;;  %2772 = vbcast.lane.b32.xlu0 %v6220_v17, 256 }
 0x512   :  { %2710 = vbcast.lane.b32.xlu1 %v6211_v31, 272  ;;  %2745 = vbcast.lane.b32.xlu0 %v6213_v30, 272 }
 0x516   :  { %2776 = vbcast.lane.b32.xlu1 %v6220_v17, 264  ;;  %2811 = vbcast.lane.b32.xlu0 %v6227_v51, 264 }
 0x51a   :  { %2807 = vbcast.lane.b32.xlu1 %v6227_v51, 256  ;;  %2714 = vbcast.lane.b32.xlu0 %v6211_v31, 280 }
 0x51e   :  { %2679 = vbcast.lane.b32.xlu1 %v6206_v3, 280  ;;  %2842 = vbcast.lane.b32.xlu0 %v6234_v7, 256 }
 0x522   :  { %2780 = vbcast.lane.b32.xlu1 %v6220_v17, 272  ;;  %2749 = vbcast.lane.b32.xlu0 %v6213_v30, 280 }
 0x526   :  { %2846 = vbcast.lane.b32.xlu1 %v6234_v7, 264  ;;  %2877 = vbcast.lane.b32.xlu0 %v6241_v45, 256 }
 0x52a   :  { %2815 = vbcast.lane.b32.xlu1 %v6227_v51, 272  ;;  %2683 = vbcast.lane.b32.xlu0 %v6206_v3, 288 }
 0x52e   :  { %2881 = vbcast.lane.b32.xlu1 %v6241_v45, 264  ;;  %2784 = vbcast.lane.b32.xlu0 %v6220_v17, 280 }
 0x532   :  { %2718 = vbcast.lane.b32.xlu1 %v6211_v31, 288  ;;  %2912 = vbcast.lane.b32.xlu0 %v6250_v39, 256 }
 0x536   :  { %2850 = vbcast.lane.b32.xlu1 %v6234_v7, 272  ;;  %2753 = vbcast.lane.b32.xlu0 %v6213_v30, 288 }
 0x53a   :  { %2916 = vbcast.lane.b32.xlu1 %v6250_v39, 264  ;;  %2885 = vbcast.lane.b32.xlu0 %v6241_v45, 272 }
 0x53e   :  { %2819 = vbcast.lane.b32.xlu1 %v6227_v51, 280  ;;  %2722 = vbcast.lane.b32.xlu0 %v6211_v31, 296 }
 0x542   :  { %2687 = vbcast.lane.b32.xlu1 %v6206_v3, 296  ;;  %2854 = vbcast.lane.b32.xlu0 %v6234_v7, 280 }
 0x546   :  { %2788 = vbcast.lane.b32.xlu1 %v6220_v17, 288  ;;  %2757 = vbcast.lane.b32.xlu0 %v6213_v30, 296 }
 0x54a   :  { %2920 = vbcast.lane.b32.xlu1 %v6250_v39, 272  ;;  %2889 = vbcast.lane.b32.xlu0 %v6241_v45, 280 }
 0x54e   :  { %2823 = vbcast.lane.b32.xlu1 %v6227_v51, 288  ;;  %2726 = vbcast.lane.b32.xlu0 %v6211_v31, 304 }
 0x552   :  { %2691 = vbcast.lane.b32.xlu1 %v6206_v3, 304  ;;  %2858 = vbcast.lane.b32.xlu0 %v6234_v7, 288 }
 0x556   :  { %2792 = vbcast.lane.b32.xlu1 %v6220_v17, 296  ;;  %2761 = vbcast.lane.b32.xlu0 %v6213_v30, 304 }
 0x558   :  { %v2952_v1 = vpop.permute.xlu0 %2951  ;;  %v2948_v35 = vpop.permute.xlu1 %2947 }
 0x559   :  { %v3077_v2 = vmul.f32 %v2952_v1, %v6892_v53  ;;  %v3076_v6 = vmul.f32 %v2948_v35, %v6893_v27 }
 0x55a   :  { %2924 = vbcast.lane.b32.xlu1 %v6250_v39, 280  ;;  %2893 = vbcast.lane.b32.xlu0 %v6241_v45, 288 }
 0x55b   :  { %v3261_v29 = vsel %vm6894_vm3, %v3077_v2, 0.0  ;;  %v3260_v34 = vsel %vm6895_vm4, %v3076_v6, 0.0  ;;  %v6916_v2 = vld [vmem:[#allocation33_spill] sm:$0xff]  ;;  %vm6923_vm3 = vmmov %vm6902_vm0 }
 0x55c   :  { %v3262_v22 = vadd.f32 %v3261_v29, %v3260_v34  ;;  %v2987_v10 = vpop.permute.xlu0 %2986  ;;  %v2983_v21 = vpop.permute.xlu1 %2982  ;;  %v6917_v6 = vld [vmem:[#allocation13_spill] sm:$0xff]  ;;  %vm6927_vm4 = vmmov %vm6902_vm0 }
 0x55d   :  { %v3085_v48 = vmul.f32 %v2987_v10, %v6896_v32  ;;  %v3084_v42 = vmul.f32 %v2983_v21, %v6897_v25  ;;  %v6920_v25 = vld [vmem:[#allocation17_spill] sm:$0xff] }
 0x55e   :  { %2827 = vbcast.lane.b32.xlu1 %v6227_v51, 296  ;;  %2730 = vbcast.lane.b32.xlu0 %v6211_v31, 312  ;;  %v6912_v31 = vld [vmem:[#allocation14_spill] sm:$0xff] }
 0x55f   :  { %v3282_v11 = vsel %vm6898_vm9, %v3085_v48, 0.0  ;;  %v3281_v50 = vsel %vm6899_vm11, %v3084_v42, 0.0  ;;  %vm6929_vm9 = vmmov %vm6902_vm0 }
 0x560   :  { %v3283_v41 = vadd.f32 %v3282_v11, %v3281_v50  ;;  %v2991_v47 = vpop.permute.xlu0 %2990  ;;  %v2956_v37 = vpop.permute.xlu1 %2955  ;;  %v6921_v11 = vld [vmem:[#allocation15_spill] sm:$0xff]  ;;  %vm6930_vm11 = vmmov %vm6902_vm0 }
 0x561   :  { %v3086_v8 = vmul.f32 %v2991_v47, %v6900_v33  ;;  %v3078_v24 = vmul.f32 %v2956_v37, %v6901_v20  ;;  %v6924_v33 = vld [vmem:[#allocation31_spill] sm:$0xff] }
 0x562   :  { %2695 = vbcast.lane.b32.xlu1 %v6206_v3, 312  ;;  %2862 = vbcast.lane.b32.xlu0 %v6234_v7, 296 }
 0x563   :  { %v3284_v18 = vsel %vm6902_vm0, %v3086_v8, 0.0  ;;  %v3263_v15 = vsel %vm6903_vm10, %v3078_v24, 0.0  ;;  %vm6932_vm10 = vmmov %vm6902_vm0 }
 0x564   :  { %v3285_v26 = vadd.f32 %v3284_v18, %v3283_v41  ;;  %v3264_v40 = vadd.f32 %v3263_v15, %v3262_v22  ;;  %v2995_v62 = vpop.permute.xlu0 %2994  ;;  %v2960_v36 = vpop.permute.xlu1 %2959  ;;  %v6925_v18 = vld [vmem:[#allocation32_spill] sm:$0xff] }
 0x565   :  { %v3087_v61 = vmul.f32 %v2995_v62, %v6904_v38  ;;  %v3079_v9 = vmul.f32 %v2960_v36, %v6905_v14  ;;  %v6928_v62 = vld [vmem:[#allocation34_spill] sm:$0xff] }
 0x566   :  { %2796 = vbcast.lane.b32.xlu1 %v6220_v17, 304  ;;  %2765 = vbcast.lane.b32.xlu0 %v6213_v30, 312 }
 0x567   :  { %v3286_v5 = vsel %vm6906_vm12, %v3087_v61, 0.0  ;;  %v3265_v46 = vsel %vm6907_vm8, %v3079_v9, 0.0  ;;  %vm6936_vm12 = vmmov %vm6902_vm0 }
 0x568   :  { %v3287_v57 = vadd.f32 %v3286_v5, %v3285_v26  ;;  %v3266_v55 = vadd.f32 %v3265_v46, %v3264_v40  ;;  %v2999_v54 = vpop.permute.xlu0 %2998  ;;  %v2964_v60 = vpop.permute.xlu1 %2963  ;;  %v6926_v26 = vld [vmem:[#allocation18_spill] sm:$0xff]  ;;  %vm6937_vm8 = vmmov %vm6902_vm0 }
 0x569   :  { %v3088_v23 = vmul.f32 %v2999_v54, %v6908_v58  ;;  %v3080_v19 = vmul.f32 %v2964_v60, %v6909_v13  ;;  %v6931_v46 = vld [vmem:[#allocation38_spill] sm:$0xff] }
 0x56a   :  { %2928 = vbcast.lane.b32.xlu1 %v6250_v39, 288  ;;  %2897 = vbcast.lane.b32.xlu0 %v6241_v45, 296 }
 0x56b   :  { %v3288_v43 = vsel %vm6910_vm13, %v3088_v23, 0.0  ;;  %v3267_v56 = vsel %vm6911_vm7, %v3080_v19, 0.0  ;;  %v6933_v23 = vld [vmem:[#allocation36_spill] sm:$0xff]  ;;  %v6934_v19 = vld [vmem:[#allocation35_spill] sm:$0xff]  ;;  %vm6939_vm13 = vmmov %vm6902_vm0 }
 0x56c   :  { %v3289_v49 = vadd.f32 %v3288_v43, %v3287_v57  ;;  %v3268_v0 = vadd.f32 %v3267_v56, %v3266_v55  ;;  %v2968_v3 = vpop.permute.xlu0 %2967  ;;  %v3003_v16 = vpop.permute.xlu1 %3002  ;;  %v6935_v56 = vld [vmem:[#allocation68_spill] sm:$0xff]  ;;  %vm6940_vm7 = vmmov %vm6902_vm0 }
 0x56d   :  { %v3081_v30 = vmul.f32 %v2968_v3, %v6912_v31  ;;  %v3089_v44 = vmul.f32 %v3003_v16, %v6913_v52  ;;  %v6938_v52 = vld [vmem:[#allocation54_spill] sm:$0xff] }
 0x56e   :  { %2831 = vbcast.lane.b32.xlu1 %v6227_v51, 304  ;;  %2866 = vbcast.lane.b32.xlu0 %v6234_v7, 304 }
 0x56f   :  { %v3269_v59 = vsel %vm6914_vm14, %v3081_v30, 0.0  ;;  %v3290_v12 = vsel %vm6915_vm15, %v3089_v44, 0.0  ;;  %vm6944_vm14 = vmmov %vm6902_vm0 }
 0x570   :  { %v3270_v63 = vadd.f32 %v3269_v59, %v3268_v0  ;;  %v3291_v1 = vadd.f32 %v3290_v12, %v3289_v49  ;;  %v3007_v35 = vpop.permute.xlu0 %3006  ;;  %v2972_v53 = vpop.permute.xlu1 %2971  ;;  %v3315_v59 = vld [vmem:[%s6534_s5 + $0x18] sm:$0xff]  ;;  %vm6945_vm15 = vmmov %vm6902_vm0 }
 0x571   :  { %v3090_v27 = vmul.f32 %v3007_v35, %v6916_v2  ;;  %v3082_v29 = vmul.f32 %v2972_v53, %v6917_v6  ;;  %3706 = vmatprep.subr.mxu0 %v3315_v59  ;;  %v3313_v6 = vld [vmem:[%s6534_s5 + $0x8] sm:$0xff] }
 0x572   :  { %2800 = vbcast.lane.b32.xlu1 %v6220_v17, 312  ;;  %2835 = vbcast.lane.b32.xlu0 %v6227_v51, 312 }
 0x573   :  { %v3292_v34 = vsel %vm6918_vm5, %v3090_v27, 0.0  ;;  %v3271_v22 = vsel %vm6919_vm6, %v3082_v29, 0.0  ;;  %3707 = vmatpush3.msra.mxu0 %v3315_v59  ;;  %v6942_v29 = vld [vmem:[#allocation42_spill] sm:$0xff]  ;;  %vm6946_vm5 = vmmov %vm6902_vm0 }
 0x574   :  { %v6314_v10 = vadd.f32 %v3292_v34, %v3291_v1  ;;  %v6316_v21 = vadd.f32 %v3271_v22, %v3270_v63  ;;  %v2672_v32 = vpop.permute.xlu1 %2671  ;;  %v2668_v48 = vpop.permute.xlu0 %2667  ;;  %v6941_v1 = vld [vmem:[#allocation39_spill] sm:$0xff]  ;;  %v6943_v22 = vld [vmem:[#allocation40_spill] sm:$0xff]  ;;  %vm6948_vm6 = vmmov %vm6902_vm0 }
 0x575   :  { %v3013_v42 = vmul.f32 %v2672_v32, %v6920_v25  ;;  %v3012_v50 = vmul.f32 %v2668_v48, %v6921_v11  ;;  %v3312_v48 = vld [vmem:[%s6534_s5] sm:$0xff] }
 0x576   :  { %2932 = vbcast.lane.b32.xlu1 %v6250_v39, 296  ;;  %2870 = vbcast.lane.b32.xlu0 %v6234_v7, 312 }
 0x577   :  { %v3093_v17 = vsel %vm6922_vm1, %v3013_v42, 0.0  ;;  %v3092_v51 = vsel %vm6923_vm3, %v3012_v50, 0.0  ;;  %vm6952_vm1 = vmmov %vm6902_vm0 }
 0x578   :  { %v3094_v41 = vadd.f32 %v3093_v17, %v3092_v51  ;;  %v2703_v47 = vpop.permute.xlu1 %2702  ;;  %v2738_v37 = vpop.permute.xlu0 %2737  ;;  %vm6953_vm3 = vmmov %vm6902_vm0 }
 0x579   :  { %v3020_v8 = vmul.f32 %v2703_v47, %v6924_v33  ;;  %v3028_v36 = vmul.f32 %v2738_v37, %v6928_v62  ;;  %v6947_v47 = vld [vmem:[#allocation19_spill] sm:$0xff] }
 0x57a   :  { %2901 = vbcast.lane.b32.xlu1 %v6241_v45, 304  ;;  %2905 = vbcast.lane.b32.xlu0 %v6241_v45, 312 }
 0x57b   :  { %v3113_v7 = vsel %vm6927_vm4, %v3020_v8, 0.0  ;;  %v3134_v55 = vsel %vm6902_vm0, %v3028_v36, 0.0  ;;  %vm6955_vm4 = vmmov %vm6902_vm0 }
 0x57c   :  { %v2707_v20 = vpop.permute.xlu1 %2706  ;;  %v2676_v24 = vpop.permute.xlu0 %2675 }
 0x57d   :  { %v3021_v15 = vmul.f32 %v2707_v20, %v6925_v18  ;;  %v3014_v40 = vmul.f32 %v2676_v24, %v6926_v26  ;;  %v6949_v18 = vld [vmem:[#allocation57_spill] sm:$0xff] }
 0x57e   :  { %2936 = vbcast.lane.b32.xlu1 %v6250_v39, 304  ;;  %2975 = vbcast.lane.b32.xlu0 %v6187_v4, 312  ;;  %v6950_v26 = vld [vmem:[#allocation41_spill] sm:$0xff] }
 0x57f   :  { %v3114_v38 = vsel %vm6929_vm9, %v3021_v15, 0.0  ;;  %v3095_v45 = vsel %vm6930_vm11, %v3014_v40, 0.0  ;;  %vm6956_vm9 = vmmov %vm6902_vm0 }
 0x580   :  { %v3115_v61 = vadd.f32 %v3114_v38, %v3113_v7  ;;  %v3096_v14 = vadd.f32 %v3095_v45, %v3094_v41  ;;  %v2742_v9 = vpop.permute.xlu1 %2741  ;;  %v2773_v5 = vpop.permute.xlu0 %2772  ;;  %v6951_v7 = vld [vmem:[#allocation61_spill] sm:$0xff]  ;;  %vm6960_vm11 = vmmov %vm6902_vm0 }
 0x581   :  { %v3029_v57 = vmul.f32 %v2742_v9, %v6931_v46  ;;  %v3036_v49 = vmul.f32 %v2773_v5, %v6935_v56  ;;  %v6954_v46 = vld [vmem:[#allocation69_spill] sm:$0xff] }
 0x582   :  { %2940 = vbcast.lane.b32.xlu1 %v6250_v39, 312 }
 0x583   :  { %v3135_v4 = vsel %vm6932_vm10, %v3029_v57, 0.0  ;;  %v3155_v12 = vsel %vm6939_vm13, %v3036_v49, 0.0  ;;  %vm6963_vm10 = vmmov %vm6902_vm0 }
 0x584   :  { %v3136_v54 = vadd.f32 %v3135_v4, %v3134_v55  ;;  %v2711_v60 = vpop.permute.xlu1 %2710  ;;  %v2746_v58 = vpop.permute.xlu0 %2745  ;;  %vm6967_vm13 = vmmov %vm6902_vm0 }
 0x585   :  { %v3022_v13 = vmul.f32 %v2711_v60, %v6933_v23  ;;  %v3030_v43 = vmul.f32 %v2746_v58, %v6934_v19  ;;  %v6957_v58 = vld [vmem:[#allocation46_spill] sm:$0xff] }
 0x586   :  { %3010 = vbcast.lane.b32.xlu1 %v6191_v28, 312  ;;  %v3314_v28 = vld [vmem:[%s6534_s5 + $0x10] sm:$0xff] }
 0x587   :  { %v3116_v0 = vsel %vm6936_vm12, %v3022_v13, 0.0  ;;  %v3137_v3 = vsel %vm6937_vm8, %v3030_v43, 0.0  ;;  %3708 = vmatprep.subr.mxu0 %v3314_v28  ;;  %v6958_v13 = vld [vmem:[#allocation20_spill] sm:$0xff]  ;;  %vm6964_vm12 = vmmov %vm6902_vm0 }
 0x588   :  { %v3117_v39 = vadd.f32 %v3116_v0, %v3115_v61  ;;  %v3138_v16 = vadd.f32 %v3137_v3, %v3136_v54  ;;  %v2777_v31 = vpop.permute.xlu1 %2776  ;;  %v2812_v30 = vpop.permute.xlu0 %2811  ;;  %3709 = vmatpush3.msra.mxu0 %v3314_v28  ;;  %v6959_v43 = vld [vmem:[#allocation72_spill] sm:$0xff]  ;;  %vm6965_vm8 = vmmov %vm6902_vm0 }
 0x589   :  { %v3037_v44 = vmul.f32 %v2777_v31, %v6938_v52  ;;  %v3045_v35 = vmul.f32 %v2812_v30, %v6941_v1  ;;  %3710 = vmatprep.subr.mxu0 %v3313_v6  ;;  %v6961_v30 = vld [vmem:[#allocation65_spill] sm:$0xff] }
 0x58a   :  { %3711 = vmatpush3.msra.mxu0 %v3313_v6 }
 0x58b   :  { %v3156_v63 = vsel %vm6940_vm7, %v3037_v44, 0.0  ;;  %v3177_v25 = vsel %vm6944_vm14, %v3045_v35, 0.0  ;;  %3712 = vmatprep.subr.mxu0 %v3312_v48  ;;  %v6962_v44 = vld [vmem:[#allocation59_spill] sm:$0xff]  ;;  %vm6969_vm7 = vmmov %vm6902_vm0 }
 0x58c   :  { %v3157_v53 = vadd.f32 %v3156_v63, %v3155_v12  ;;  %v2808_v2 = vpop.permute.xlu1 %2807  ;;  %v2715_v27 = vpop.permute.xlu0 %2714  ;;  %3713 = vmatpush3.msra.mxu0 %v3312_v48  ;;  %v6968_v48 = vld [vmem:[#allocation64_spill] sm:$0xff]  ;;  %vm6973_vm14 = vmmov %vm6902_vm0 }
 0x58d   :  { %v3044_v34 = vmul.f32 %v2808_v2, %v6942_v29  ;;  %v3023_v32 = vmul.f32 %v2715_v27, %v6943_v22  ;;  %v6966_v27 = vld [vmem:[#allocation37_spill] sm:$0xff] }
 0x58f   :  { %v3176_v42 = vsel %vm6945_vm15, %v3044_v34, 0.0  ;;  %v3118_v11 = vsel %vm6946_vm5, %v3023_v32, 0.0  ;;  %vm6976_vm15 = vmmov %vm6902_vm0 }
 0x590   :  { %v3178_v50 = vadd.f32 %v3177_v25, %v3176_v42  ;;  %v3119_v17 = vadd.f32 %v3118_v11, %v3117_v39  ;;  %v2680_v51 = vpop.permute.xlu1 %2679  ;;  %v2843_v41 = vpop.permute.xlu0 %2842  ;;  %vm6978_vm5 = vmmov %vm6902_vm0 }
 0x591   :  { %v3015_v37 = vmul.f32 %v2680_v51, %v6947_v47  ;;  %v3052_v62 = vmul.f32 %v2843_v41, %v6951_v7 }
 0x593   :  { %v3097_v33 = vsel %vm6948_vm6, %v3015_v37, 0.0  ;;  %vm6981_vm6 = vmmov %vm6902_vm0 }
 0x594   :  { %v3098_v8 = vadd.f32 %v3097_v33, %v3096_v14  ;;  %v2781_v20 = vpop.permute.xlu1 %2780  ;;  %v2750_v24 = vpop.permute.xlu0 %2749  ;;  %v3197_v14 = vsel %vm6955_vm4, %v3052_v62, 0.0  ;;  %vm6987_vm4 = vmmov %vm6902_vm0 }
 0x595   :  { %v3038_v15 = vmul.f32 %v2781_v20, %v6949_v18  ;;  %v3031_v40 = vmul.f32 %v2750_v24, %v6950_v26 }
 0x597   :  { %v3158_v36 = vsel %vm6952_vm1, %v3038_v15, 0.0  ;;  %v3139_v38 = vsel %vm6953_vm3, %v3031_v40, 0.0  ;;  %vm6984_vm1 = vmmov %vm6902_vm0 }
 0x598   :  { %v3159_v45 = vadd.f32 %v3158_v36, %v3157_v53  ;;  %v6373_v61 = vadd.f32 %v3139_v38, %v3138_v16  ;;  %v2847_v9 = vpop.permute.xlu1 %2846  ;;  %v2878_v5 = vpop.permute.xlu0 %2877  ;;  %v6970_v36 = vld [vmem:[#allocation43_spill] sm:$0xff]  ;;  %vm6985_vm3 = vmmov %vm6902_vm0 }
 0x599   :  { %v3053_v57 = vmul.f32 %v2847_v9, %v6954_v46  ;;  %v3060_v56 = vmul.f32 %v2878_v5, %v6959_v43  ;;  %v6972_v5 = vld [vmem:[#allocation45_spill] sm:$0xff] }
 0x59b   :  { %v3198_v55 = vsel %vm6956_vm9, %v3053_v57, 0.0  ;;  %v3218_v28 = vsel %vm6963_vm10, %v3060_v56, 0.0  ;;  %v6979_v56 = vld [vmem:[#allocation87_spill] sm:$0xff]  ;;  %vm6988_vm9 = vmmov %vm6902_vm0 }
 0x59c   :  { %v3199_v4 = vadd.f32 %v3198_v55, %v3197_v14  ;;  %v2816_v54 = vpop.permute.xlu1 %2815  ;;  %v2684_v60 = vpop.permute.xlu0 %2683  ;;  %vm6996_vm10 = vmmov %vm6902_vm0 }
 0x59d   :  { %v3046_v23 = vmul.f32 %v2816_v54, %v6957_v58  ;;  %v3016_v19 = vmul.f32 %v2684_v60, %v6958_v13  ;;  %v6975_v60 = vld [vmem:[#allocation84_spill] sm:$0xff]  ;;  %v6977_v13 = vld [vmem:[#allocation23_spill] sm:$0xff] }
 0x59f   :  { %v3179_v49 = vsel %vm6960_vm11, %v3046_v23, 0.0  ;;  %v3099_v0 = vsel %vm6902_vm0, %v3016_v19, 0.0  ;;  %vm6989_vm11 = vmmov %vm6902_vm0 }
 0x5a0   :  { %v6383_v3 = vadd.f32 %v3179_v49, %v3178_v50  ;;  %v3100_v39 = vadd.f32 %v3099_v0, %v3098_v8  ;;  %v2882_v16 = vpop.permute.xlu1 %2881  ;;  %v2785_v31 = vpop.permute.xlu0 %2784 }
 0x5a1   :  { %v3061_v52 = vmul.f32 %v2882_v16, %v6961_v30  ;;  %v3039_v59 = vmul.f32 %v2785_v31, %v6962_v44  ;;  %v6980_v30 = vld [vmem:[#allocation73_spill] sm:$0xff] }
 0x5a3   :  { %v3219_v12 = vsel %vm6964_vm12, %v3061_v52, 0.0  ;;  %v3160_v63 = vsel %vm6965_vm8, %v3039_v59, 0.0  ;;  %v6982_v59 = vld [vmem:[#allocation49_spill] sm:$0xff]  ;;  %vm6997_vm12 = vmmov %vm6902_vm0 }
 0x5a4   :  { %v6390_v1 = vadd.f32 %v3219_v12, %v3218_v28  ;;  %v6392_v35 = vadd.f32 %v3160_v63, %v3159_v45  ;;  %v2719_v53 = vpop.permute.xlu1 %2718  ;;  %v2913_v2 = vpop.permute.xlu0 %2912  ;;  %v6971_v45 = vld [vmem:[#allocation44_spill] sm:$0xff]  ;;  %vm6998_vm8 = vmmov %vm6902_vm0 }
 0x5a5   :  { %v3024_v6 = vmul.f32 %v2719_v53, %v6966_v27  ;;  %v3068_v58 = vmul.f32 %v2913_v2, %v6975_v60  ;;  %v6983_v12 = vld [vmem:[#allocation48_spill] sm:$0xff] }
 0x5a7   :  { %v3120_v29 = vsel %vm6967_vm13, %v3024_v6, 0.0  ;;  %v3239_v2 = vsel %vm6984_vm1, %v3068_v58, 0.0  ;;  %v6986_v6 = vld [vmem:[#allocation52_spill] sm:$0xff]  ;;  %vm7001_vm13 = vmmov %vm6902_vm0 }
 0x5a8   :  { %v3121_v34 = vadd.f32 %v3120_v29, %v3119_v17  ;;  %v2851_v22 = vpop.permute.xlu1 %2850  ;;  %v2754_v32 = vpop.permute.xlu0 %2753  ;;  %vm7011_vm1 = vmmov %vm6902_vm0 }
 0x5a9   :  { %v3054_v25 = vmul.f32 %v2851_v22, %v6968_v48  ;;  %v3032_v46 = vmul.f32 %v2754_v32, %v6972_v5  ;;  %v6994_v5 = vld [vmem:[#allocation77_spill] sm:$0xff] }
 0x5ab   :  { %v3200_v42 = vsel %vm6969_vm7, %v3054_v25, 0.0  ;;  %v3141_v43 = vsel %vm6978_vm5, %v3032_v46, 0.0  ;;  %vm7002_vm7 = vmmov %vm6902_vm0 }
 0x5ac   :  { %v6398_v11 = vadd.f32 %v3200_v42, %v3199_v4  ;;  %v2917_v50 = vpop.permute.xlu1 %2916  ;;  %v2886_v51 = vpop.permute.xlu0 %2885  ;;  %v6974_v4 = vld [vmem:[#allocation21_spill] sm:$0xff]  ;;  %vm7005_vm5 = vmmov %vm6902_vm0 }
 0x5ad   :  { %v3069_v49 = vmul.f32 %v2917_v50, %v6979_v56  ;;  %v3062_v52 = vmul.f32 %v2886_v51, %v6980_v30 }
 0x5af   :  { %v3240_v32 = vsel %vm6988_vm9, %v3069_v49, 0.0  ;;  %v3221_v51 = vsel %vm6989_vm11, %v3062_v52, 0.0  ;;  %vm7018_vm9 = vmmov %vm6902_vm0 }
 0x5b0   :  { %v2820_v41 = vpop.permute.xlu1 %2819  ;;  %v2723_v47 = vpop.permute.xlu0 %2722  ;;  %v6436_v60 = vadd.f32 %v3240_v32, %v3239_v2  ;;  %vm7020_vm11 = vmmov %vm6902_vm0 }
 0x5b1   :  { %v3025_v38 = vmul.f32 %v2723_v47, %v6970_v36  ;;  %v6990_v47 = vld [vmem:[#allocation50_spill] sm:$0xff]  ;;  %v6992_v36 = vld [vmem:[#allocation67_spill] sm:$0xff] }
 0x5b3   :  { %v3122_v55 = vsel %vm6973_vm14, %v3025_v38, 0.0  ;;  %v6993_v38 = vld [vmem:[#allocation62_spill] sm:$0xff]  ;;  %vm7003_vm14 = vmmov %vm6902_vm0 }
 0x5b4   :  { %v2688_v37 = vpop.permute.xlu1 %2687  ;;  %v2855_v33 = vpop.permute.xlu0 %2854  ;;  %v3123_v0 = vadd.f32 %v3122_v55, %v3121_v34  ;;  %v3142_v34 = vadd.f32 %v3141_v43, %v6373_v61  ;;  %v6999_v43 = vld [vmem:[#allocation71_spill] sm:$0xff] }
 0x5b5   :  { %v3017_v54 = vmul.f32 %v2688_v37, %v6974_v4  ;;  %v3047_v37 = vmul.f32 %v2820_v41, %v6990_v47 }
 0x5b7   :  { %v3101_v44 = vsel %vm6981_vm6, %v3017_v54, 0.0  ;;  %vm7007_vm6 = vmmov %vm6902_vm0 }
 0x5b8   :  { %v2789_v8 = vpop.permute.xlu1 %2788  ;;  %v2758_v20 = vpop.permute.xlu0 %2757  ;;  %v3102_v48 = vadd.f32 %v3101_v44, %v3100_v39  ;;  %v6995_v39 = vld [vmem:[#allocation53_spill] sm:$0xff] }
 0x5b9   :  { %v3033_v28 = vmul.f32 %v2758_v20, %v6982_v59 }
 0x5bb   :  { %v3143_v20 = vsel %vm6902_vm0, %v3033_v28, 0.0 }
 0x5bc   :  { %v6400_v24 = vpop.permute.xlu1 %2920  ;;  %v2890_v18 = vpop.permute.xlu0 %2889  ;;  %v3144_v41 = vadd.f32 %v3143_v20, %v3142_v34  ;;  %v7008_v34 = vld [vmem:[#allocation58_spill] sm:$0xff] }
 0x5bd   :  { %v3063_v46 = vmul.f32 %v2890_v18, %v6994_v5  ;;  %v7000_v18 = vld [vmem:[#allocation55_spill] sm:$0xff]  ;;  %v7014_v5 = vld [vmem:[#allocation80_spill] sm:$0xff] }
 0x5bf   :  { %v3223_v44 = vsel %vm7003_vm14, %v3063_v46, 0.0  ;;  %vm7031_vm14 = vmmov %vm6902_vm0 }
 0x5c0   :  { %v2824_v17 = vpop.permute.xlu1 %2823  ;;  %v2727_v15 = vpop.permute.xlu0 %2726 }
 0x5c1   :  { %v3026_v9 = vmul.f32 %v2727_v15, %v6971_v45  ;;  %v6991_v15 = vld [vmem:[#allocation22_spill] sm:$0xff]  ;;  %v3040_v45 = vmul.f32 %v2789_v8, %v6993_v38  ;;  %v3048_v55 = vmul.f32 %v2824_v17, %v6995_v39  ;;  %v3181_v8 = vsel %vm6998_vm8, %v3047_v37, 0.0  ;;  %vm7026_vm8 = vmmov %vm6902_vm0 }
 0x5c2   :  { %v7010_v37 = vld [vmem:[#allocation86_spill] sm:$0xff] }
 0x5c3   :  { %v3124_v23 = vsel %vm6976_vm15, %v3026_v9, 0.0  ;;  %v3162_v52 = vsel %vm7002_vm7, %v3040_v45, 0.0  ;;  %vm7004_vm15 = vmmov %vm6902_vm0  ;;  %v3070_v20 = vmul.f32 %v6400_v24, %v7010_v37 }
 0x5c4   :  { %v2692_v26 = vpop.permute.xlu1 %2691  ;;  %v2859_v40 = vpop.permute.xlu0 %2858  ;;  %v3125_v53 = vadd.f32 %v3124_v23, %v3123_v0  ;;  %v3183_v59 = vsel %vm7004_vm15, %v3048_v55, 0.0  ;;  %vm7028_vm7 = vmmov %vm6902_vm0 }
 0x5c5   :  { %v3018_v19 = vmul.f32 %v2692_v26, %v6977_v13  ;;  %v3056_v56 = vmul.f32 %v2859_v40, %v6999_v43  ;;  %vm7032_vm15 = vmmov %vm6902_vm0 }
 0x5c7   :  { %v3103_v27 = vsel %vm6985_vm3, %v3018_v19, 0.0  ;;  %vm7013_vm3 = vmmov %vm6902_vm0 }
 0x5c8   :  { %v2793_v7 = vpop.permute.xlu1 %2792  ;;  %v2762_v62 = vpop.permute.xlu0 %2761  ;;  %v3104_v9 = vadd.f32 %v3103_v27, %v3102_v48 }
 0x5c9   :  { %v3034_v29 = vmul.f32 %v2762_v62, %v6986_v6  ;;  %v3055_v62 = vmul.f32 %v2855_v33, %v6992_v36  ;;  %v3222_v33 = vadd.f32 %v3221_v51, %v6390_v1  ;;  %v7006_v1 = vld [vmem:[#allocation66_spill] sm:$0xff]  ;;  %v3182_v6 = vadd.f32 %v3181_v8, %v6383_v3  ;;  %v7012_v36 = vld [vmem:[#allocation76_spill] sm:$0xff] }
 0x5cb   :  { %v3145_v4 = vsel %vm6996_vm10, %v3034_v29, 0.0  ;;  %v3202_v17 = vsel %vm7001_vm13, %v3055_v62, 0.0  ;;  %vm7024_vm10 = vmmov %vm6902_vm0 }
 0x5cc   :  { %v6405_v57 = vpop.permute.xlu1 %2924  ;;  %v6407_v14 = vpop.permute.xlu0 %2893  ;;  %v3146_v0 = vadd.f32 %v3145_v4, %v3144_v41  ;;  %v3203_v29 = vadd.f32 %v3202_v17, %v6398_v11  ;;  %vm7027_vm13 = vmmov %vm6902_vm0 }
 0x5cd   :  { %v3064_v11 = vmul.f32 %v6407_v14, %v7012_v36  ;;  %v7030_v36 = vld [vmem:[#allocation88_spill] sm:$0xff] }
 0x5d0   :  { %v2828_v16 = vpop.permute.xlu1 %2827  ;;  %v2731_v31 = vpop.permute.xlu0 %2730 }
 0x5d1   :  { %v3027_v63 = vmul.f32 %v2731_v31, %v6983_v12  ;;  %v3041_v12 = vmul.f32 %v2793_v7, %v7006_v1  ;;  %v3049_v32 = vmul.f32 %v2828_v16, %v7008_v34  ;;  %v3163_v7 = vadd.f32 %v3162_v52, %v6392_v35  ;;  %v7015_v35 = vld [vmem:[#allocation51_spill] sm:$0xff]  ;;  %v7023_v1 = vld [vmem:[#allocation82_spill] sm:$0xff] }
 0x5d3   :  { %v3126_v22 = vsel %vm6987_vm4, %v3027_v63, 0.0  ;;  %v3164_v3 = vsel %vm7011_vm1, %v3041_v12, 0.0  ;;  %vm7016_vm4 = vmmov %vm6902_vm0 }
 0x5d4   :  { %v3127_v25 = vadd.f32 %v3126_v22, %v3125_v53  ;;  %v2696_v42 = vpop.permute.xlu1 %2695  ;;  %v2863_v50 = vpop.permute.xlu0 %2862  ;;  %v3204_v22 = vsel %vm7007_vm6, %v3056_v56, 0.0  ;;  %v3165_v41 = vadd.f32 %v3164_v3, %v3163_v7  ;;  %vm7037_vm6 = vmmov %vm6902_vm0 }
 0x5d5   :  { %v3019_v26 = vmul.f32 %v2696_v42, %v6991_v15  ;;  %v7009_v42 = vld [vmem:[#allocation70_spill] sm:$0xff]  ;;  %v3224_v15 = vadd.f32 %v3223_v44, %v3222_v33  ;;  %v3057_v46 = vmul.f32 %v2863_v50, %v7014_v5  ;;  %v3225_v33 = vsel %vm7020_vm11, %v3064_v11, 0.0  ;;  %v7034_v5 = vld [vmem:[#allocation91_spill] sm:$0xff]  ;;  %vm7038_vm1 = vmmov %vm6902_vm0 }
 0x5d6   :  { %v3128_v61 = vrot.slane %v3127_v25, 4  ;;  %vm7044_vm11 = vmmov %vm6902_vm0 }
 0x5d7   :  { %v3105_v54 = vsel %vm6997_vm12, %v3019_v26, 0.0  ;;  %v3184_v26 = vadd.f32 %v3183_v59, %v3182_v6  ;;  %vm7025_vm12 = vmmov %vm6902_vm0  ;;  %v3226_v7 = vadd.f32 %v3225_v33, %v3224_v15 }
 0x5d8   :  { %v3129_v58 = vadd.f32 %v3128_v61, %v3127_v25  ;;  %v3106_v23 = vadd.f32 %v3105_v54, %v3104_v9  ;;  %v2797_v13 = vpop.permute.xlu1 %2796  ;;  %v2766_v19 = vpop.permute.xlu0 %2765  ;;  %v3205_v9 = vadd.f32 %v3204_v22, %v3203_v29  ;;  %v3185_v61 = vsel %vm7013_vm3, %v3049_v32, 0.0  ;;  %vm7039_vm3 = vmmov %vm6902_vm0 }
 0x5d9   :  { %v3035_v49 = vmul.f32 %v2766_v19, %v7000_v18  ;;  %v3042_v51 = vmul.f32 %v2797_v13, %v7009_v42  ;;  %v7019_v13 = vld [vmem:[#allocation78_spill] sm:$0xff]  ;;  %v3186_v8 = vadd.f32 %v3185_v61, %v3184_v26 }
 0x5da   :  { %v3130_v31 = vrot.slane %v3129_v58, 2  ;;  %v3107_v30 = vrot.slane %v3106_v23, 4 }
 0x5db   :  { %v3147_v28 = vsel %vm7005_vm5, %v3035_v49, 0.0  ;;  %v3166_v4 = vsel %vm7016_vm4, %v3042_v51, 0.0  ;;  %v3206_v49 = vsel %vm6902_vm0, %v3057_v46, 0.0  ;;  %vm7033_vm5 = vcmask 1042434   ;;  %vm7040_vm4 = vmmov %vm6902_vm0 }
 0x5dc   :  { %v3131_v63 = vadd.f32 %v3130_v31, %v3129_v58  ;;  %v3108_v53 = vadd.f32 %v3107_v30, %v3106_v23  ;;  %v3148_v40 = vadd.f32 %v3147_v28, %v3146_v0  ;;  %v6448_v2 = vpop.permute.xlu1 %2928  ;;  %v2898_v27 = vpop.permute.xlu0 %2897  ;;  %v7017_v58 = vld [vmem:[#allocation89_spill] sm:$0xff]  ;;  %v3167_v17 = vadd.f32 %v3166_v4, %v3165_v41  ;;  %v7021_v0 = vld [vmem:[#allocation79_spill] sm:$0xff] }
 0x5dd   :  { %v3071_v14 = vmul.f32 %v6405_v57, %v7017_v58  ;;  %v7022_v30 = vld [vmem:[#allocation63_spill] sm:$0xff]  ;;  %v3065_v12 = vmul.f32 %v2898_v27, %v7023_v1  ;;  %v3207_v51 = vadd.f32 %v3206_v49, %v3205_v9  ;;  %v3072_v11 = vmul.f32 %v6448_v2, %v7030_v36  ;;  %v7036_v4 = vld [vmem:[#allocation85_spill] sm:$0xff] }
 0x5de   :  { %v3132_v48 = vrot.slane %v3131_v63, 1  ;;  %v3109_v25 = vrot.slane %v3108_v53, 2  ;;  %v3149_v47 = vrot.slane %v3148_v40, 4 }
 0x5df   :  { %v3244_v42 = vsel %vm7028_vm7, %v3071_v14, 0.0  ;;  %vm7051_vm7 = vcmask 1046534  }
 0x5e0   :  { %v3110_v62 = vadd.f32 %v3109_v25, %v3108_v53  ;;  %v3150_v38 = vadd.f32 %v3149_v47, %v3148_v40  ;;  %v2832_v16 = vpop.permute.xlu1 %2831  ;;  %v2867_v45 = vpop.permute.xlu0 %2866  ;;  %v3133_v55 = vadd.f32 %v3132_v48, %v3131_v63  ;;  %v3242_v25 = vsel %vm7027_vm13, %v3070_v20, 0.0  ;;  %v7029_v47 = vld [vmem:[#allocation83_spill] sm:$0xff] }
 0x5e1   :  { %v3050_v39 = vmul.f32 %v2832_v16, %v7015_v35  ;;  %v3058_v19 = vmul.f32 %v2867_v45, %v7019_v13  ;;  %v3243_v15 = vadd.f32 %v3242_v25, %v6436_v60  ;;  %vm7050_vm13 = vcmask 1045509  }
 0x5e2   :  { %v3111_v24 = vrot.slane %v3110_v62, 1  ;;  %v3151_v54 = vrot.slane %v3150_v38, 2  ;;  %v3303_v44 = vmul.f32 0.015625, %v3133_v55  ;;  %v7035_v55 = vld [vmem:[#allocation81_spill] sm:$0xff] }
 0x5e3   :  { %v3187_v23 = vsel %vm7018_vm9, %v3050_v39, 0.0  ;;  %v3208_v63 = vsel %vm7024_vm10, %v3058_v19, 0.0  ;;  %v3245_v14 = vadd.f32 %v3244_v42, %v3243_v15  ;;  %vm7043_vm9 = vmmov %vm6902_vm0  ;;  %vm7046_vm10 = vcmask 1043459  }
 0x5e4   :  { %v3112_v43 = vadd.f32 %v3111_v24, %v3110_v62  ;;  %v3152_v50 = vadd.f32 %v3151_v54, %v3150_v38  ;;  %v2801_v56 = vpop.permute.xlu1 %2800  ;;  %v2836_v18 = vpop.permute.xlu0 %2835  ;;  %v3188_v28 = vadd.f32 %v3187_v23, %v3186_v8  ;;  %v3227_v62 = vsel %vm7031_vm14, %v3065_v12, 0.0 }
 0x5e5   :  { %v3043_v31 = vmul.f32 %v2801_v56, %v7021_v0  ;;  %v3051_v52 = vmul.f32 %v2836_v18, %v7022_v30  ;;  %v3209_v38 = vadd.f32 %v3208_v63, %v3207_v51  ;;  %v3228_v54 = vadd.f32 %v3227_v62, %v3226_v7 }
 0x5e6   :  { %v3302_v57 = vmul.f32 0.015625, %v3112_v43  ;;  %v3153_v59 = vrot.slane %v3152_v50, 1  ;;  %v3246_v23 = vsel %vm7037_vm6, %v3072_v11, 0.0  ;;  %vm7052_vm14 = vcmask 1047559  }
 0x5e7   :  { %v3168_v53 = vsel %vm7025_vm12, %v3043_v31, 0.0  ;;  %v3189_v40 = vsel %vm7026_vm8, %v3051_v52, 0.0  ;;  %v7042_v31 = vld [vmem:[#allocation16_spill] sm:$0xff]  ;;  %v3247_v52 = vadd.f32 %v3246_v23, %v3245_v14  ;;  %vm7048_vm12 = vcmask 1044484   ;;  %vm7049_vm8 = vmmov %vm6902_vm0 }
 0x5e8   :  { %v3333_v6 = vsel %vm557_vm2, %v3303_v44, %v3302_v57  ;;  %v3154_v29 = vadd.f32 %v3153_v59, %v3152_v50  ;;  %v3169_v22 = vadd.f32 %v3168_v53, %v3167_v17  ;;  %v3190_v34 = vadd.f32 %v3189_v40, %v3188_v28  ;;  %v2933_v32 = vpop.permute.xlu1 %2932  ;;  %v2871_v48 = vpop.permute.xlu0 %2870  ;;  %v7041_v17 = vld [vmem:[#allocation90_spill] sm:$0xff] }
 0x5e9   :  { %v3059_v27 = vmul.f32 %v2871_v48, %v7029_v47  ;;  %v3073_v9 = vmul.f32 %v2933_v32, %v7034_v5  ;;  %v7045_v32 = vld [vmem:[#allocation92_spill] sm:$0xff] }
 0x5ea   :  { %v3304_v37 = vmul.f32 0.015625, %v3154_v29  ;;  %v3170_v26 = vrot.slane %v3169_v22, 4  ;;  %v3191_v3 = vrot.slane %v3190_v34, 4 }
 0x5eb   :  { %v3210_v16 = vsel %vm7032_vm15, %v3059_v27, 0.0  ;;  %v3248_v43 = vsel %vm7039_vm3, %v3073_v9, 0.0  ;;  %vm7053_vm15 = vmmov %vm6902_vm0  ;;  %vm3567_vm3 = vcmask 23558  }
 0x5ec   :  { %v3334_v45 = vsel %vm7033_vm5, %v3304_v37, %v3333_v6  ;;  %v3171_v20 = vadd.f32 %v3170_v26, %v3169_v22  ;;  %v3192_v61 = vadd.f32 %v3191_v3, %v3190_v34  ;;  %v2902_v46 = vpop.permute.xlu1 %2901  ;;  %v2906_v35 = vpop.permute.xlu0 %2905  ;;  %v3211_v39 = vadd.f32 %v3210_v16, %v3209_v38  ;;  %v7047_v16 = vld [vmem:[#allocation30_spill] sm:$0xff]  ;;  %vm7054_vm5 = vmmov %vm6902_vm0 }
 0x5ed   :  { %v3066_v24 = vmul.f32 %v2902_v46, %v7035_v55  ;;  %v3067_v2 = vmul.f32 %v2906_v35, %v7036_v4  ;;  %v3249_v40 = vadd.f32 %v3248_v43, %v3247_v52  ;;  %v3595_v52 = vld [vmem:[%s6535_s6] ss:$0 sm:$0xff] }
 0x5ee   :  { %v3172_v41 = vrot.slane %v3171_v20, 2  ;;  %v3193_v58 = vrot.slane %v3192_v61, 2  ;;  %v3212_v13 = vrot.slane %v3211_v39, 4 }
 0x5ef   :  { %v3229_v19 = vsel %vm7038_vm1, %v3066_v24, 0.0  ;;  %v3231_v49 = vsel %vm7040_vm4, %v3067_v2, 0.0  ;;  %vm3532_vm1 = vcmask 21504   ;;  %vm3569_vm4 = vcmask 17408  }
 0x5f0   :  { %v3173_v33 = vadd.f32 %v3172_v41, %v3171_v20  ;;  %v3194_v8 = vadd.f32 %v3193_v58, %v3192_v61  ;;  %v3230_v50 = vadd.f32 %v3229_v19, %v3228_v54  ;;  %v2937_v60 = vpop.permute.xlu1 %2936  ;;  %v2976_v56 = vpop.permute.xlu0 %2975  ;;  %v3213_v18 = vadd.f32 %v3212_v13, %v3211_v39 }
 0x5f1   :  { %v3074_v0 = vmul.f32 %v2937_v60, %v7041_v17  ;;  %v3083_v30 = vmul.f32 %v2976_v56, %v7042_v31  ;;  %v3423_v31 = vld [vmem:[%s6536_s7 + $0x8] sm:$0xff] }
 0x5f2   :  { %v3174_v44 = vrot.slane %v3173_v33, 1  ;;  %v3195_v57 = vrot.slane %v3194_v8, 1  ;;  %v3232_v59 = vadd.f32 %v3231_v49, %v3230_v50  ;;  %v3214_v28 = vrot.slane %v3213_v18, 2  ;;  %3717 = vmatprep.subr.mxu0 %v3423_v31 }
 0x5f3   :  { %v3250_v1 = vsel %vm7043_vm9, %v3074_v0, 0.0  ;;  %v3273_v12 = vsel %vm7044_vm11, %v3083_v30, 0.0  ;;  %v3422_v30 = vld [vmem:[%s6536_s7] sm:$0xff] }
 0x5f4   :  { %v3175_v63 = vadd.f32 %v3174_v44, %v3173_v33  ;;  %v3196_v53 = vadd.f32 %v3195_v57, %v3194_v8  ;;  %v3233_v6 = vrot.slane %v3232_v59, 4  ;;  %v2941_v29 = vpop.permute.xlu1 %2940  ;;  %v3215_v22 = vadd.f32 %v3214_v28, %v3213_v18 }
 0x5f5   :  { %v3274_v34 = vadd.f32 %v3273_v12, %v6316_v21  ;;  %v3075_v48 = vmul.f32 %v2941_v29, %v7045_v32  ;;  %v3251_v47 = vadd.f32 %v3250_v1, %v3249_v40  ;;  %v3598_v40 = vld [vmem:[#allocation2] ss:$0 sm:$0xff] }
 0x5f6   :  { %v3305_v25 = vmul.f32 0.015625, %v3175_v63  ;;  %v3306_v42 = vmul.f32 0.015625, %v3196_v53  ;;  %v3234_v51 = vadd.f32 %v3233_v6, %v3232_v59  ;;  %v3216_v27 = vrot.slane %v3215_v22, 1  ;;  %v3525_v63 = vld [vmem:[%s6530_s1] sm:$0x3f]  ;;  %s3847_s1 = smov [#allocation3]  }
 0x5f7   :  { %v3275_v7 = vrot.slane %v3274_v34, 4  ;;  %v3252_v37 = vsel %vm6902_vm0, %v3075_v48, 0.0  ;;  %v3846_v53 = vmov 0   ;;  %s3577_s6 = sshll.u32 %s3847_s1, 4  ;;  %s3578_s6 = int_to_ptr.vmem [resolvable:$true] %s3577_s6 }
 0x5f8   :  { %v3235_v26 = vrot.slane %v3234_v51, 2  ;;  %v3253_v3 = vadd.f32 %v3252_v37, %v3251_v47  ;;  %v3011_v36 = vpop.permute.xlu1 %3010  ;;  %v3335_v11 = vsel %vm7046_vm10, %v3305_v25, %v3334_v45  ;;  %v3217_v62 = vadd.f32 %v3216_v27, %v3215_v22  ;;  %3729 = vset.pattern.permute.xlu0 %v3846_v53  ;;  %3730 = vset.pattern.permute.xlu1 %v3846_v53  ;;  %s3821_s7 = scalar_lea.vmem %s3578_s6, 64  ;;  %p3826_p1 = scmp.lt.s32.totalorder %s3578_s6, %s3578_s6 }
 0x5f9   :  { %v3276_v38 = vadd.f32 %v3275_v7, %v3274_v34  ;;  %v3091_v20 = vmul.f32 %v3011_v36, %v7047_v16  ;;  %v3336_v21 = vsel %vm7048_vm12, %v3306_v42, %v3335_v11  ;;  %3527 = vperm.xlu0 %3729, %v3525_v63   ;;  %p3822_p0 = scmp.ne.s32.totalorder %s3578_s6, %s3821_s7  ;;  %p3827_p2 = scmp.lt.s32.totalorder %s3821_s7, %s3821_s7 }
 0x5fa   :  { %v3236_v61 = vadd.f32 %v3235_v26, %v3234_v51  ;;  %v3254_v5 = vrot.slane %v3253_v3, 4  ;;  %v3307_v9 = vmul.f32 0.015625, %v3217_v62  ;;  %v7055_v26 = vld [vmem:[#allocation47_spill] sm:$0xff] }
 0x5fb   :  { %v3277_v46 = vrot.slane %v3276_v38, 2  ;;  %v3294_v35 = vsel %vm7049_vm8, %v3091_v20, 0.0  ;;  %p3828_p3 = por %p3827_p2, %p3826_p1 }
 0x5fc   :  { %v3237_v15 = vrot.slane %v3236_v61, 1  ;;  %v3255_v39 = vadd.f32 %v3254_v5, %v3253_v3  ;;  %v3295_v55 = vadd.f32 %v3294_v35, %v6314_v10  ;;  %v3337_v24 = vsel %vm7050_vm13, %v3307_v9, %v3336_v21 }
 0x5fd   :  { %v3278_v45 = vadd.f32 %v3277_v46, %v3276_v38  ;;  %v7056_v3 = vmov 0.0   ;;  %p3829_p4 = pnand %p3828_p3, %p3822_p0 }
 0x5fe   :  { %v3238_v4 = vadd.f32 %v3237_v15, %v3236_v61  ;;  %v3256_v2 = vrot.slane %v3255_v39, 2  ;;  %v3296_v54 = vrot.slane %v3295_v55, 4 }
 0x5ff   :  { %v3279_v23 = vrot.slane %v3278_v45, 1 }
 0x600   :  { %v3308_v41 = vmul.f32 0.015625, %v3238_v4  ;;  %v3257_v58 = vadd.f32 %v3256_v2, %v3255_v39  ;;  %v3297_v14 = vadd.f32 %v3296_v54, %v3295_v55 }
 0x601   :  { %v3280_v50 = vadd.f32 %v3279_v23, %v3278_v45 }
 0x602   :  { %v3258_v13 = vrot.slane %v3257_v58, 1  ;;  %v3298_v19 = vrot.slane %v3297_v14, 2  ;;  %v3338_v33 = vsel %vm7051_vm7, %v3308_v41, %v3337_v24 }
 0x603   :  { %v3310_v49 = vmul.f32 0.015625, %v3280_v50 }
 0x604   :  { %v3299_v8 = vadd.f32 %v3298_v19, %v3297_v14  ;;  %v3259_v43 = vadd.f32 %v3258_v13, %v3257_v58 }
 0x606   :  { %v3300_v60 = vrot.slane %v3299_v8, 1  ;;  %v3309_v56 = vmul.f32 0.015625, %v3259_v43 }
 0x608   :  { %v3301_v10 = vadd.f32 %v3300_v60, %v3299_v8  ;;  %v3339_v18 = vsel %vm7052_vm14, %v3309_v56, %v3338_v33 }
 0x609   :  { %3714 = vmatprep.mubr.msk.f32.mxu0 %vm7053_vm15, %v3339_v18 }
 0x60a   :  { %v3311_v17 = vmul.f32 0.015625, %v3301_v10 }
 0x60c   :  { %v3340_v0 = vsel %vm557_vm2, %v3311_v17, %v3310_v49  ;;  %vm3431_vm2 = vcmask 130048  }
 0x60d   :  { %3715 = vmatmul.mubr.msk.f32.vlgmr.msra.gmra.mxu0 %vm7054_vm5, %v3340_v0 }
 0x60e   :  { %3718 = vmatpush3.msra.mxu0 %v3423_v31 }
 0x60f   :  { %3719 = vmatprep.subr.mxu0 %v3422_v30 }
 0x610   :  { %3720 = vmatpush3.msra.mxu0 %v3422_v30 }
 0x674   :  { %v3528_v37 = vpop.permute.xlu0 %3527 }
 0x675   :  { %vm3529_vm6 = vcmp.eq.s32.totalorder %v3528_v37, %v7055_v26 }
 0x676   :  { %v3603_v36 = vsel %vm3529_vm6, 1.0, %v7056_v3 }
 0x677   :  { %v3533_v11 = vsel %vm3532_vm1, %v3603_v36, 0.0 }
 0x678   :  { %v3534_v62 = vrot.slane %v3533_v11, 4 }
 0x67a   :  { %v3535_v38 = vadd.f32 %v3534_v62, %v3533_v11 }
 0x67c   :  { %v3536_v16 = vrot.slane %v3535_v38, 2 }
 0x67e   :  { %v3537_v20 = vadd.f32 %v3536_v16, %v3535_v38 }
 0x680   :  { %v3538_v21 = vrot.slane %v3537_v20, 1 }
 0x682   :  { %v3539_v61 = vadd.f32 %v3538_v21, %v3537_v20 }
 0x684   :  { %v3540_v5 = vmax.f32 %v3539_v61, 1.0 }
 0x6cd   :  { %v3716_v44 = vpop.f32.mrf.mxu0 }
 0x6ce   :  { %v3417_v57 = vadd.f32 %v3716_v44, %v3595_v52 }
 0x6cf   :  { %v3411_v59 = vpop.f32.mrf.mxu0 }
 0x6d0   :  { %v3412_v28 = vadd.f32 %v3595_v52, %v3411_v59  ;;  %v3421_v12 = vmax.f32 %v3417_v57, 0.0 }
 0x6d2   :  { %v3420_v1 = vmax.f32 %v3412_v28, 0.0 }
 0x6d4   :  { %3721 = vmatprep.mubr.msk.f32.mxu0 %vm3431_vm2, %v3420_v1 }
 0x6d5   :  { %3722 = vmatmul.mubr.msk.f32.vlgmr.msra.gmra.mxu0 %vm3431_vm2, %v3421_v12 }
 0x795   :  { %v3723_v6 = vpop.f32.mrf.mxu0 }
 0x796   :  { %v3510_v29 = vadd.f32 %v3723_v6, %v3598_v40 }
 0x797   :  { %v3504_v22 = vpop.f32.mrf.mxu0 }
 0x798   :  { %v3602_v34 = vmul.f32 -1.442695, %v3510_v29  ;;  %v3505_v32 = vadd.f32 %v3598_v40, %v3504_v22 }
 0x79a   :  { %v3601_v48 = vmul.f32 -1.442695, %v3505_v32  ;;  %3747 = vpow2.f32 %v3602_v34 }
 0x79c   :  { %3749 = vpow2.f32 %v3601_v48 }
 0x7a7   :  { %v3748_v25 = vpop.eup %3747 }
 0x7a8   :  { %v3520_v47 = vadd.f32 1.0, %v3748_v25 }
 0x7a9   :  { %v3750_v42 = vpop.eup %3749 }
 0x7aa   :  { %v3519_v51 = vadd.f32 1.0, %v3750_v42 }
 0x7ac   :  { %3751 = vrcp.f32 %v3519_v51 }
 0x7ad   :  { %3753 = vrcp.f32 %v3520_v47 }
 0x7ae   :  { %3755 = vrcp.f32 %v3540_v5 }
 0x7b9   :  { %v3752_v27 = vpop.eup %3751 }
 0x7ba   :  { %3543 = vperm.xlu1 %3730, %v3752_v27   ;;  %v3754_v7 = vpop.eup %3753 }
 0x7bb   :  { %v3756_v2 = vpop.eup %3755 }
 0x7be   :  { %3558 = vperm.xlu1 %3730, %v3754_v7  }
 0x835   :  { %v3544_v9 = vpop.permute.xlu1 %3543 }
 0x836   :  { %v3546_v46 = vmul.f32 %v3603_v36, %v3544_v9 }
 0x838   :  { %v3547_v35 = vsel %vm3532_vm1, %v3546_v46, 0.0 }
 0x839   :  { %v3548_v15 = vrot.slane %v3547_v35, 4  ;;  %v3559_v41 = vpop.permute.xlu1 %3558 }
 0x83b   :  { %v3549_v39 = vadd.f32 %v3548_v15, %v3547_v35 }
 0x83d   :  { %v3550_v55 = vrot.slane %v3549_v39, 2 }
 0x83f   :  { %v3551_v24 = vadd.f32 %v3550_v55, %v3549_v39 }
 0x841   :  { %v3552_v4 = vrot.slane %v3551_v24, 1 }
 0x843   :  { %v3553_v45 = vadd.f32 %v3552_v4, %v3551_v24 }
 0x845   :  { %v3555_v54 = vmul.f32 %v3756_v2, %v3553_v45 }
 0x847   :  { %v3561_v58 = vsub.f32 %v3544_v9, %v3555_v54  ;;  %v3562_v14 = vsub.f32 %v3559_v41, %v3555_v54 }
 0x849   :  { %v3563_v23 = vand.u32 2147483647, %v3561_v58  ;;  %v3564_v13 = vand.u32 2147483647, %v3562_v14 }
 0x84b   :  { %v3565_v19 = vsub.f32 0.0, %v3563_v23  ;;  %v3566_v33 = vsub.f32 0.0, %v3564_v13 }
 0x84d   :  { %3568 = vst.msk [vmem:[#allocation3 - $0x6] sm:$0xc0] %vm3567_vm3, %v3565_v19 }
 0x84e   :  { %3570 = vst.msk [vmem:[#allocation3 + $0x2] sm:$0x3] %vm3569_vm4, %v3566_v33 }
 0x84f   :  { %3832 = shalt.err (!%p3829_p4)
}
 0x850   :  { %3580 = dma.vmem_to_hbm [thread:$0]  %s3578_s6, 64, %s6538_s9, [#allocation4]  }
 0x851   :  { %3841 = dma.done.wait [#allocation4], 64  }
 0x852   :  { %3842 = vsyncadd [#allocation4], 4294967232 }
 0x853   :  { %3584 = vsyncpa [#allocation4], 1 }

</bundles_post_ra>
